<compile_context>
chip_gen: v6e
topology: v6e:2x2x1
jax: 0.10.0
libtpu: 0.0.40
codegen_flags: <defaults>
</compile_context>

<pallas_src>
import functools

import numpy as np
import jax
import jax.numpy as jnp
from jax import lax
from jax.experimental import pallas as pl
from jax.experimental.pallas import tpu as pltpu

BN_EPS = 1e-5


# --------------------------------------------------------------------------
# Fused kernel: conv3x3+BN+ReLU -> conv3x3+BN (+shortcut) -> add -> ReLU.
#   xp_ref    : (1, H+2, W+2, Cin)  zero-padded NHWC input block (f32)
#   w1_ref    : (9*Cin, Cout)       BN1-scale-folded conv1 weights (bf16)
#   shift1_ref: (1, Cout)           conv1 bias + BN1 shift (f32)
#   w2_ref    : (K2, Cout)          BN2-folded conv2 weights, with the BNsc-folded
#                                   1x1 shortcut weights appended along K when the
#                                   projection shortcut is present (bf16)
#   shift2_ref: (1, Cout)           conv2 bias + BN2 shift (+ BNsc shift) (f32)
#   o_ref     : (1, H*W, Cout)      block output (f32)
#   scratches : col1 (H*W, 9*Cin), hpad (H+2, W+2, Cout), col2 (H*W, K2)  -- all f32
# Tap convention: k = kh*3 + kw, cross-correlation (same as PyTorch / lax.conv).
# --------------------------------------------------------------------------
def _texture_block_kernel(xp_ref, w1_ref, shift1_ref, w2_ref, shift2_ref,
                          o_ref, col1_ref, hpad_ref, col2_ref,
                          *, H, W, Cin, Cout, has_projection):
    HW = H * W

    # ---- Stage 1: build the (H*W, 9*Cin) im2col tile once, one big-K matmul ----
    for k in range(9):                                       # static unroll: 9 copies
        kh, kw = divmod(k, 3)
        col1_ref[:, k * Cin:(k + 1) * Cin] = (
            xp_ref[0, kh:kh + H, kw:kw + W, :].reshape(HW, Cin))
    acc1 = jnp.dot(col1_ref[...].astype(jnp.bfloat16), w1_ref[...],
                   preferred_element_type=jnp.float32)
    h = jnp.maximum(acc1 + shift1_ref[...], 0.0)             # BN1 scale already in w1

    # ---- Intermediate h (+ zero halo) lives only in VMEM: no HBM round trip ----
    hpad_ref[...] = jnp.zeros_like(hpad_ref)
    hpad_ref[1:H + 1, 1:W + 1, :] = h.reshape(H, W, Cout)

    # ---- Stage 2: im2col of h; projection shortcut rides in the same matmul ----
    for k in range(9):
        kh, kw = divmod(k, 3)
        col2_ref[:, k * Cout:(k + 1) * Cout] = (
            hpad_ref[kh:kh + H, kw:kw + W, :].reshape(HW, Cout))
    if has_projection:
        # extra K columns: the un-padded input pixels for the 1x1 shortcut conv
        col2_ref[:, 9 * Cout:9 * Cout + Cin] = (
            xp_ref[0, 1:H + 1, 1:W + 1, :].reshape(HW, Cin))
    acc2 = jnp.dot(col2_ref[...].astype(jnp.bfloat16), w2_ref[...],
                   preferred_element_type=jnp.float32)
    y = acc2 + shift2_ref[...]
    if not has_projection:                 # identity shortcut: plain add, no matmul
        y = y + xp_ref[0, 1:H + 1, 1:W + 1, :].reshape(HW, Cin)
    o_ref[0] = jnp.maximum(y, 0.0).astype(o_ref.dtype)


# --------------------------------------------------------------------------
# Full TextureExtractor forward (NCHW in / NCHW out, like the PyTorch module).
# --------------------------------------------------------------------------
def texture_extractor_forward(x_nchw, params):
    x = jnp.transpose(x_nchw, (0, 2, 3, 1)).astype(jnp.float32)   # NCHW -> NHWC
    N, H, W, Cin = x.shape
    Cout = params["w1"].shape[-1]
    HW = H * W

    def bn_affine(gamma, beta, mean, var):
        s = gamma * lax.rsqrt(var + BN_EPS)
        return s, beta - mean * s

    # Fold BN scale into the weight columns, conv bias + BN shift into one vector.
    s1, t1 = bn_affine(params["bn1_gamma"], params["bn1_beta"],
                       params["bn1_mean"], params["bn1_var"])
    w1f = (params["w1"] * s1).reshape(9 * Cin, Cout).astype(jnp.bfloat16)
    shift1 = (params["b1"] * s1 + t1).reshape(1, Cout).astype(jnp.float32)

    s2, t2 = bn_affine(params["bn2_gamma"], params["bn2_beta"],
                       params["bn2_mean"], params["bn2_var"])
    w2f = (params["w2"] * s2).reshape(9 * Cout, Cout)
    shift2 = params["b2"] * s2 + t2

    has_projection = "w_sc" in params
    if has_projection:                      # conv(1x1, bias=False) + BN shortcut
        ssc, tsc = bn_affine(params["bnsc_gamma"], params["bnsc_beta"],
                             params["bnsc_mean"], params["bnsc_var"])
        w2cat = jnp.concatenate([w2f, params["w_sc"] * ssc], axis=0)
        shift2 = shift2 + tsc
    else:                                   # identity shortcut (Cin == Cout)
        assert Cin == Cout, "identity shortcut requires in_channels == out_channels"
        w2cat = w2f
    w2cat = w2cat.astype(jnp.bfloat16)
    shift2 = shift2.reshape(1, Cout).astype(jnp.float32)
    K2 = w2cat.shape[0]

    xp = jnp.pad(x, ((0, 0), (1, 1), (1, 1), (0, 0)))
    Hp, Wp = H + 2, W + 2

    kern = functools.partial(_texture_block_kernel, H=H, W=W, Cin=Cin, Cout=Cout,
                             has_projection=has_projection)
    out = pl.pallas_call(
        kern,
        out_shape=jax.ShapeDtypeStruct((N, HW, Cout), jnp.float32),
        grid=(N,),
        in_specs=[
            pl.BlockSpec((1, Hp, Wp, Cin), lambda n: (n, 0, 0, 0)),
            pl.BlockSpec((9 * Cin, Cout), lambda n: (0, 0)),     # resident weights
            pl.BlockSpec((1, Cout), lambda n: (0, 0)),
            pl.BlockSpec((K2, Cout), lambda n: (0, 0)),          # resident weights
            pl.BlockSpec((1, Cout), lambda n: (0, 0)),
        ],
        out_specs=pl.BlockSpec((1, HW, Cout), lambda n: (n, 0, 0)),
        scratch_shapes=[
            pltpu.VMEM((HW, 9 * Cin), jnp.float32),   # im2col for conv1
            pltpu.VMEM((Hp, Wp, Cout), jnp.float32),  # h with zero halo (VMEM only)
            pltpu.VMEM((HW, K2), jnp.float32),        # im2col for conv2 (+shortcut)
        ],
        compiler_params=pltpu.CompilerParams(dimension_semantics=("parallel",)),
    )(xp, w1f, shift1, w2cat, shift2)

    y = out.reshape(N, H, W, Cout)                    # free row-major reshape
    return jnp.transpose(y, (0, 3, 1, 2))             # NHWC -> NCHW


# --------------------------------------------------------------------------
# Pure-JAX reference (explicit convs + BN, HIGHEST precision) for correctness.
# --------------------------------------------------------------------------
def texture_extractor_reference(x_nchw, params):
    hi = lax.Precision.HIGHEST
    x = jnp.transpose(x_nchw, (0, 2, 3, 1))

    def conv3(v, w9, b):
        Cin, Cout = v.shape[-1], w9.shape[-1]
        w_hwio = w9.reshape(3, 3, Cin, Cout)
        return lax.conv_general_dilated(
            v, w_hwio, (1, 1), "SAME",
            dimension_numbers=("NHWC", "HWIO", "NHWC"), precision=hi) + b

    def bn(v, g, b, m, var):
        return (v - m) * (g * lax.rsqrt(var + BN_EPS)) + b

    h = jax.nn.relu(bn(conv3(x, params["w1"], params["b1"]),
                       params["bn1_gamma"], params["bn1_beta"],
                       params["bn1_mean"], params["bn1_var"]))
    h2 = bn(conv3(h, params["w2"], params["b2"]),
            params["bn2_gamma"], params["bn2_beta"],
            params["bn2_mean"], params["bn2_var"])
    if "w_sc" in params:
        res = jnp.einsum("nhwc,co->nhwo", x, params["w_sc"], precision=hi)
        res = bn(res, params["bnsc_gamma"], params["bnsc_beta"],
                 params["bnsc_mean"], params["bnsc_var"])
    else:
        res = x
    return jnp.transpose(jax.nn.relu(h2 + res), (0, 3, 1, 2))


def make_params(key, in_ch, out_ch, with_shortcut):
    ks = iter(jax.random.split(key, 20))

    def nrm(shape, s=0.1):
        return s * jax.random.normal(next(ks), shape, jnp.float32)

    def var(shape):
        return 1.0 + 0.5 * jax.random.uniform(next(ks), shape, jnp.float32)

    p = {
        # conv weights stored as (9, Cin, Cout) with k = kh*3 + kw
        # (== PyTorch weight.permute(2, 3, 1, 0).reshape(9, Cin, Cout)).
        "w1": nrm((9, in_ch, out_ch)), "b1": nrm((out_ch,)),
        "w2": nrm((9, out_ch, out_ch)), "b2": nrm((out_ch,)),
        "bn1_gamma": 1.0 + nrm((out_ch,)), "bn1_beta": nrm((out_ch,)),
        "bn1_mean": nrm((out_ch,)), "bn1_var": var((out_ch,)),
        "bn2_gamma": 1.0 + nrm((out_ch,)), "bn2_beta": nrm((out_ch,)),
        "bn2_mean": nrm((out_ch,)), "bn2_var": var((out_ch,)),
    }
    if with_shortcut:
        p.update({
            "w_sc": nrm((in_ch, out_ch)),              # 1x1 conv, bias=False
            "bnsc_gamma": 1.0 + nrm((out_ch,)), "bnsc_beta": nrm((out_ch,)),
            "bnsc_mean": nrm((out_ch,)), "bnsc_var": var((out_ch,)),
        })
    return p


if __name__ == "__main__":
    key = jax.random.PRNGKey(0)
    k_x, k_p, k_x2, k_p2 = jax.random.split(key, 4)

    # bf16 MXU operands vs. a HIGHEST-precision f32 reference -> loose-ish tolerance.
    TOL = dict(rtol=4e-2, atol=4e-2)

    # Config A: in_channels != out_channels -> conv(1x1)+BN projection shortcut.
    N, Cin, Cout, H, W = 2, 4, 32, 16, 16
    x = jax.random.normal(k_x, (N, Cin, H, W), jnp.float32)
    params = make_params(k_p, Cin, Cout, with_shortcut=True)
    out = jax.block_until_ready(jax.jit(texture_extractor_forward)(x, params))
    assert out.shape == (N, Cout, H, W)
    ref = texture_extractor_reference(x, params)
    np.testing.assert_allclose(np.asarray(out), np.asarray(ref), **TOL)

    # Config B: in_channels == out_channels -> identity shortcut (no shortcut matmul).
    N2, C2, H2, W2 = 1, 32, 8, 8
    x2 = jax.random.normal(k_x2, (N2, C2, H2, W2), jnp.float32)
    params2 = make_params(k_p2, C2, C2, with_shortcut=False)
    out2 = jax.block_until_ready(jax.jit(texture_extractor_forward)(x2, params2))
    assert out2.shape == (N2, C2, H2, W2)
    ref2 = texture_extractor_reference(x2, params2)
    np.testing.assert_allclose(np.asarray(out2), np.asarray(ref2), **TOL)

    print("KERNEL_OK")
</pallas_src>

<mosaic_0001>
module attributes {stable_mosaic.version = 11 : i64} {
  func.func @_texture_block_kernel(%arg0: i32, %arg1: memref<1x18x18x4xf32, #tpu.memory_space<vmem>>, %arg2: memref<36x32xbf16, #tpu.memory_space<vmem>>, %arg3: memref<1x32xf32, #tpu.memory_space<vmem>>, %arg4: memref<292x32xbf16, #tpu.memory_space<vmem>>, %arg5: memref<1x32xf32, #tpu.memory_space<vmem>>, %arg6: memref<1x256x32xf32, #tpu.memory_space<vmem>>, %arg7: memref<256x36xf32, #tpu.memory_space<vmem>>, %arg8: memref<18x18x32xf32, #tpu.memory_space<vmem>>, %arg9: memref<256x292xf32, #tpu.memory_space<vmem>>) attributes {dimension_semantics = [#tpu.dimension_semantics<parallel>], iteration_bounds = array<i64: 2>, scalar_prefetch = 0 : i64, scratch_operands = 3 : i64, tpu.core_type = #tpu.core_type<tc>, window_params = [{transform_indices = @transform_0, window_bounds = array<i64: 1, 18, 18, 4>}, {pipeline_mode = #tpu.pipeline_mode<synchronous>, transform_indices = @transform_1, window_bounds = array<i64: 36, 32>}, {pipeline_mode = #tpu.pipeline_mode<synchronous>, transform_indices = @transform_2, window_bounds = array<i64: 1, 32>}, {pipeline_mode = #tpu.pipeline_mode<synchronous>, transform_indices = @transform_3, window_bounds = array<i64: 292, 32>}, {pipeline_mode = #tpu.pipeline_mode<synchronous>, transform_indices = @transform_4, window_bounds = array<i64: 1, 32>}, {transform_indices = @transform_5, window_bounds = array<i64: 1, 256, 32>}]} {
    %c0 = arith.constant 0 : index
    %c0_0 = arith.constant 0 : index
    %c0_1 = arith.constant 0 : index
    %c0_2 = arith.constant 0 : index
    %0 = vector.load %arg1[%c0, %c0_0, %c0_1, %c0_2] : memref<1x18x18x4xf32, #tpu.memory_space<vmem>>, vector<1x16x16x4xf32>
    %1 = vector.shape_cast %0 : vector<1x16x16x4xf32> to vector<16x16x4xf32>
    %2 = vector.shape_cast %1 : vector<16x16x4xf32> to vector<256x4xf32>
    %c0_3 = arith.constant 0 : index
    %c0_4 = arith.constant 0 : index
    %3 = vector.load %arg7[%c0_3, %c0_4] : memref<256x36xf32, #tpu.memory_space<vmem>>, vector<256x4xf32>
    tpu.vector_store %arg7[%c0_3, %c0_4], %2 {strides = array<i32>} : memref<256x36xf32, #tpu.memory_space<vmem>>, vector<256x4xf32>,
    %c0_5 = arith.constant 0 : index
    %c0_6 = arith.constant 0 : index
    %c1 = arith.constant 1 : index
    %c0_7 = arith.constant 0 : index
    %4 = vector.load %arg1[%c0_5, %c0_6, %c1, %c0_7] : memref<1x18x18x4xf32, #tpu.memory_space<vmem>>, vector<1x16x16x4xf32>
    %5 = vector.shape_cast %4 : vector<1x16x16x4xf32> to vector<16x16x4xf32>
    %6 = vector.shape_cast %5 : vector<16x16x4xf32> to vector<256x4xf32>
    %c0_8 = arith.constant 0 : index
    %c4 = arith.constant 4 : index
    %7 = vector.load %arg7[%c0_8, %c4] : memref<256x36xf32, #tpu.memory_space<vmem>>, vector<256x4xf32>
    tpu.vector_store %arg7[%c0_8, %c4], %6 {strides = array<i32>} : memref<256x36xf32, #tpu.memory_space<vmem>>, vector<256x4xf32>,
    %c0_9 = arith.constant 0 : index
    %c0_10 = arith.constant 0 : index
    %c2 = arith.constant 2 : index
    %c0_11 = arith.constant 0 : index
    %8 = vector.load %arg1[%c0_9, %c0_10, %c2, %c0_11] : memref<1x18x18x4xf32, #tpu.memory_space<vmem>>, vector<1x16x16x4xf32>
    %9 = vector.shape_cast %8 : vector<1x16x16x4xf32> to vector<16x16x4xf32>
    %10 = vector.shape_cast %9 : vector<16x16x4xf32> to vector<256x4xf32>
    %c0_12 = arith.constant 0 : index
    %c8 = arith.constant 8 : index
    %11 = vector.load %arg7[%c0_12, %c8] : memref<256x36xf32, #tpu.memory_space<vmem>>, vector<256x4xf32>
    tpu.vector_store %arg7[%c0_12, %c8], %10 {strides = array<i32>} : memref<256x36xf32, #tpu.memory_space<vmem>>, vector<256x4xf32>,
    %c0_13 = arith.constant 0 : index
    %c1_14 = arith.constant 1 : index
    %c0_15 = arith.constant 0 : index
    %c0_16 = arith.constant 0 : index
    %12 = vector.load %arg1[%c0_13, %c1_14, %c0_15, %c0_16] : memref<1x18x18x4xf32, #tpu.memory_space<vmem>>, vector<1x16x16x4xf32>
    %13 = vector.shape_cast %12 : vector<1x16x16x4xf32> to vector<16x16x4xf32>
    %14 = vector.shape_cast %13 : vector<16x16x4xf32> to vector<256x4xf32>
    %c0_17 = arith.constant 0 : index
    %c12 = arith.constant 12 : index
    %15 = vector.load %arg7[%c0_17, %c12] : memref<256x36xf32, #tpu.memory_space<vmem>>, vector<256x4xf32>
    tpu.vector_store %arg7[%c0_17, %c12], %14 {strides = array<i32>} : memref<256x36xf32, #tpu.memory_space<vmem>>, vector<256x4xf32>,
    %c0_18 = arith.constant 0 : index
    %c1_19 = arith.constant 1 : index
    %c1_20 = arith.constant 1 : index
    %c0_21 = arith.constant 0 : index
    %16 = vector.load %arg1[%c0_18, %c1_19, %c1_20, %c0_21] : memref<1x18x18x4xf32, #tpu.memory_space<vmem>>, vector<1x16x16x4xf32>
    %17 = vector.shape_cast %16 : vector<1x16x16x4xf32> to vector<16x16x4xf32>
    %18 = vector.shape_cast %17 : vector<16x16x4xf32> to vector<256x4xf32>
    %c0_22 = arith.constant 0 : index
    %c16 = arith.constant 16 : index
    %19 = vector.load %arg7[%c0_22, %c16] : memref<256x36xf32, #tpu.memory_space<vmem>>, vector<256x4xf32>
    tpu.vector_store %arg7[%c0_22, %c16], %18 {strides = array<i32>} : memref<256x36xf32, #tpu.memory_space<vmem>>, vector<256x4xf32>,
    %c0_23 = arith.constant 0 : index
    %c1_24 = arith.constant 1 : index
    %c2_25 = arith.constant 2 : index
    %c0_26 = arith.constant 0 : index
    %20 = vector.load %arg1[%c0_23, %c1_24, %c2_25, %c0_26] : memref<1x18x18x4xf32, #tpu.memory_space<vmem>>, vector<1x16x16x4xf32>
    %21 = vector.shape_cast %20 : vector<1x16x16x4xf32> to vector<16x16x4xf32>
    %22 = vector.shape_cast %21 : vector<16x16x4xf32> to vector<256x4xf32>
    %c0_27 = arith.constant 0 : index
    %c20 = arith.constant 20 : index
    %23 = vector.load %arg7[%c0_27, %c20] : memref<256x36xf32, #tpu.memory_space<vmem>>, vector<256x4xf32>
    tpu.vector_store %arg7[%c0_27, %c20], %22 {strides = array<i32>} : memref<256x36xf32, #tpu.memory_space<vmem>>, vector<256x4xf32>,
    %c0_28 = arith.constant 0 : index
    %c2_29 = arith.constant 2 : index
    %c0_30 = arith.constant 0 : index
    %c0_31 = arith.constant 0 : index
    %24 = vector.load %arg1[%c0_28, %c2_29, %c0_30, %c0_31] : memref<1x18x18x4xf32, #tpu.memory_space<vmem>>, vector<1x16x16x4xf32>
    %25 = vector.shape_cast %24 : vector<1x16x16x4xf32> to vector<16x16x4xf32>
    %26 = vector.shape_cast %25 : vector<16x16x4xf32> to vector<256x4xf32>
    %c0_32 = arith.constant 0 : index
    %c24 = arith.constant 24 : index
    %27 = vector.load %arg7[%c0_32, %c24] : memref<256x36xf32, #tpu.memory_space<vmem>>, vector<256x4xf32>
    tpu.vector_store %arg7[%c0_32, %c24], %26 {strides = array<i32>} : memref<256x36xf32, #tpu.memory_space<vmem>>, vector<256x4xf32>,
    %c0_33 = arith.constant 0 : index
    %c2_34 = arith.constant 2 : index
    %c1_35 = arith.constant 1 : index
    %c0_36 = arith.constant 0 : index
    %28 = vector.load %arg1[%c0_33, %c2_34, %c1_35, %c0_36] : memref<1x18x18x4xf32, #tpu.memory_space<vmem>>, vector<1x16x16x4xf32>
    %29 = vector.shape_cast %28 : vector<1x16x16x4xf32> to vector<16x16x4xf32>
    %30 = vector.shape_cast %29 : vector<16x16x4xf32> to vector<256x4xf32>
    %c0_37 = arith.constant 0 : index
    %c28 = arith.constant 28 : index
    %31 = vector.load %arg7[%c0_37, %c28] : memref<256x36xf32, #tpu.memory_space<vmem>>, vector<256x4xf32>
    tpu.vector_store %arg7[%c0_37, %c28], %30 {strides = array<i32>} : memref<256x36xf32, #tpu.memory_space<vmem>>, vector<256x4xf32>,
    %c0_38 = arith.constant 0 : index
    %c2_39 = arith.constant 2 : index
    %c2_40 = arith.constant 2 : index
    %c0_41 = arith.constant 0 : index
    %32 = vector.load %arg1[%c0_38, %c2_39, %c2_40, %c0_41] : memref<1x18x18x4xf32, #tpu.memory_space<vmem>>, vector<1x16x16x4xf32>
    %33 = vector.shape_cast %32 : vector<1x16x16x4xf32> to vector<16x16x4xf32>
    %34 = vector.shape_cast %33 : vector<16x16x4xf32> to vector<256x4xf32>
    %c0_42 = arith.constant 0 : index
    %c32 = arith.constant 32 : index
    %35 = vector.load %arg7[%c0_42, %c32] : memref<256x36xf32, #tpu.memory_space<vmem>>, vector<256x4xf32>
    tpu.vector_store %arg7[%c0_42, %c32], %34 {strides = array<i32>} : memref<256x36xf32, #tpu.memory_space<vmem>>, vector<256x4xf32>,
    %c0_43 = arith.constant 0 : index
    %c0_44 = arith.constant 0 : index
    %36 = vector.load %arg7[%c0_43, %c0_44] : memref<256x36xf32, #tpu.memory_space<vmem>>, vector<256x36xf32>
    %37 = arith.truncf %36 : vector<256x36xf32> to vector<256x36xbf16>
    %c0_45 = arith.constant 0 : index
    %c0_46 = arith.constant 0 : index
    %38 = vector.load %arg2[%c0_45, %c0_46] : memref<36x32xbf16, #tpu.memory_space<vmem>>, vector<36x32xbf16>
    %cst = arith.constant dense<0.000000e+00> : vector<256x32xf32>
    %39 = tpu.matmul %37, %38, %cst {dimension_numbers = #tpu.dot_dimension_numbers<[1], [0], [0], [1], [0, 0, 1, 1], [], []>} : vector<256x36xbf16>, vector<36x32xbf16>, vector<256x32xf32> -> vector<256x32xf32>
    %c0_47 = arith.constant 0 : index
    %c0_48 = arith.constant 0 : index
    %40 = vector.load %arg3[%c0_47, %c0_48] : memref<1x32xf32, #tpu.memory_space<vmem>>, vector<1x32xf32>
    %41 = vector.broadcast %40 : vector<1x32xf32> to vector<256x32xf32>
    %42 = arith.addf %39, %41 : vector<256x32xf32>
    %cst_49 = arith.constant 0.000000e+00 : f32
    %43 = vector.broadcast %cst_49 : f32 to vector<256x32xf32>
    %44 = arith.maximumf %42, %43 : vector<256x32xf32>
    %cst_50 = arith.constant 0.000000e+00 : f32
    %45 = vector.broadcast %cst_50 : f32 to vector<18x18x32xf32>
    %c0_51 = arith.constant 0 : index
    %c0_52 = arith.constant 0 : index
    %c0_53 = arith.constant 0 : index
    %46 = vector.load %arg8[%c0_51, %c0_52, %c0_53] : memref<18x18x32xf32, #tpu.memory_space<vmem>>, vector<18x18x32xf32>
    tpu.vector_store %arg8[%c0_51, %c0_52, %c0_53], %45 {strides = array<i32>} : memref<18x18x32xf32, #tpu.memory_space<vmem>>, vector<18x18x32xf32>,
    %47 = vector.shape_cast %44 : vector<256x32xf32> to vector<16x16x32xf32>
    %c1_54 = arith.constant 1 : index
    %c1_55 = arith.constant 1 : index
    %c0_56 = arith.constant 0 : index
    %48 = vector.load %arg8[%c1_54, %c1_55, %c0_56] : memref<18x18x32xf32, #tpu.memory_space<vmem>>, vector<16x16x32xf32>
    tpu.vector_store %arg8[%c1_54, %c1_55, %c0_56], %47 {strides = array<i32>} : memref<18x18x32xf32, #tpu.memory_space<vmem>>, vector<16x16x32xf32>,
    %c0_57 = arith.constant 0 : index
    %c0_58 = arith.constant 0 : index
    %c0_59 = arith.constant 0 : index
    %49 = vector.load %arg8[%c0_57, %c0_58, %c0_59] : memref<18x18x32xf32, #tpu.memory_space<vmem>>, vector<16x16x32xf32>
    %50 = vector.shape_cast %49 : vector<16x16x32xf32> to vector<256x32xf32>
    %c0_60 = arith.constant 0 : index
    %c0_61 = arith.constant 0 : index
    %51 = vector.load %arg9[%c0_60, %c0_61] : memref<256x292xf32, #tpu.memory_space<vmem>>, vector<256x32xf32>
    tpu.vector_store %arg9[%c0_60, %c0_61], %50 {strides = array<i32>} : memref<256x292xf32, #tpu.memory_space<vmem>>, vector<256x32xf32>,
    %c0_62 = arith.constant 0 : index
    %c1_63 = arith.constant 1 : index
    %c0_64 = arith.constant 0 : index
    %52 = vector.load %arg8[%c0_62, %c1_63, %c0_64] : memref<18x18x32xf32, #tpu.memory_space<vmem>>, vector<16x16x32xf32>
    %53 = vector.shape_cast %52 : vector<16x16x32xf32> to vector<256x32xf32>
    %c0_65 = arith.constant 0 : index
    %c32_66 = arith.constant 32 : index
    %54 = vector.load %arg9[%c0_65, %c32_66] : memref<256x292xf32, #tpu.memory_space<vmem>>, vector<256x32xf32>
    tpu.vector_store %arg9[%c0_65, %c32_66], %53 {strides = array<i32>} : memref<256x292xf32, #tpu.memory_space<vmem>>, vector<256x32xf32>,
    %c0_67 = arith.constant 0 : index
    %c2_68 = arith.constant 2 : index
    %c0_69 = arith.constant 0 : index
    %55 = vector.load %arg8[%c0_67, %c2_68, %c0_69] : memref<18x18x32xf32, #tpu.memory_space<vmem>>, vector<16x16x32xf32>
    %56 = vector.shape_cast %55 : vector<16x16x32xf32> to vector<256x32xf32>
    %c0_70 = arith.constant 0 : index
    %c64 = arith.constant 64 : index
    %57 = vector.load %arg9[%c0_70, %c64] : memref<256x292xf32, #tpu.memory_space<vmem>>, vector<256x32xf32>
    tpu.vector_store %arg9[%c0_70, %c64], %56 {strides = array<i32>} : memref<256x292xf32, #tpu.memory_space<vmem>>, vector<256x32xf32>,
    %c1_71 = arith.constant 1 : index
    %c0_72 = arith.constant 0 : index
    %c0_73 = arith.constant 0 : index
    %58 = vector.load %arg8[%c1_71, %c0_72, %c0_73] : memref<18x18x32xf32, #tpu.memory_space<vmem>>, vector<16x16x32xf32>
    %59 = vector.shape_cast %58 : vector<16x16x32xf32> to vector<256x32xf32>
    %c0_74 = arith.constant 0 : index
    %c96 = arith.constant 96 : index
    %60 = vector.load %arg9[%c0_74, %c96] : memref<256x292xf32, #tpu.memory_space<vmem>>, vector<256x32xf32>
    tpu.vector_store %arg9[%c0_74, %c96], %59 {strides = array<i32>} : memref<256x292xf32, #tpu.memory_space<vmem>>, vector<256x32xf32>,
    %c1_75 = arith.constant 1 : index
    %c1_76 = arith.constant 1 : index
    %c0_77 = arith.constant 0 : index
    %61 = vector.load %arg8[%c1_75, %c1_76, %c0_77] : memref<18x18x32xf32, #tpu.memory_space<vmem>>, vector<16x16x32xf32>
    %62 = vector.shape_cast %61 : vector<16x16x32xf32> to vector<256x32xf32>
    %c0_78 = arith.constant 0 : index
    %c128 = arith.constant 128 : index
    %63 = vector.load %arg9[%c0_78, %c128] : memref<256x292xf32, #tpu.memory_space<vmem>>, vector<256x32xf32>
    tpu.vector_store %arg9[%c0_78, %c128], %62 {strides = array<i32>} : memref<256x292xf32, #tpu.memory_space<vmem>>, vector<256x32xf32>,
    %c1_79 = arith.constant 1 : index
    %c2_80 = arith.constant 2 : index
    %c0_81 = arith.constant 0 : index
    %64 = vector.load %arg8[%c1_79, %c2_80, %c0_81] : memref<18x18x32xf32, #tpu.memory_space<vmem>>, vector<16x16x32xf32>
    %65 = vector.shape_cast %64 : vector<16x16x32xf32> to vector<256x32xf32>
    %c0_82 = arith.constant 0 : index
    %c160 = arith.constant 160 : index
    %66 = vector.load %arg9[%c0_82, %c160] : memref<256x292xf32, #tpu.memory_space<vmem>>, vector<256x32xf32>
    tpu.vector_store %arg9[%c0_82, %c160], %65 {strides = array<i32>} : memref<256x292xf32, #tpu.memory_space<vmem>>, vector<256x32xf32>,
    %c2_83 = arith.constant 2 : index
    %c0_84 = arith.constant 0 : index
    %c0_85 = arith.constant 0 : index
    %67 = vector.load %arg8[%c2_83, %c0_84, %c0_85] : memref<18x18x32xf32, #tpu.memory_space<vmem>>, vector<16x16x32xf32>
    %68 = vector.shape_cast %67 : vector<16x16x32xf32> to vector<256x32xf32>
    %c0_86 = arith.constant 0 : index
    %c192 = arith.constant 192 : index
    %69 = vector.load %arg9[%c0_86, %c192] : memref<256x292xf32, #tpu.memory_space<vmem>>, vector<256x32xf32>
    tpu.vector_store %arg9[%c0_86, %c192], %68 {strides = array<i32>} : memref<256x292xf32, #tpu.memory_space<vmem>>, vector<256x32xf32>,
    %c2_87 = arith.constant 2 : index
    %c1_88 = arith.constant 1 : index
    %c0_89 = arith.constant 0 : index
    %70 = vector.load %arg8[%c2_87, %c1_88, %c0_89] : memref<18x18x32xf32, #tpu.memory_space<vmem>>, vector<16x16x32xf32>
    %71 = vector.shape_cast %70 : vector<16x16x32xf32> to vector<256x32xf32>
    %c0_90 = arith.constant 0 : index
    %c224 = arith.constant 224 : index
    %72 = vector.load %arg9[%c0_90, %c224] : memref<256x292xf32, #tpu.memory_space<vmem>>, vector<256x32xf32>
    tpu.vector_store %arg9[%c0_90, %c224], %71 {strides = array<i32>} : memref<256x292xf32, #tpu.memory_space<vmem>>, vector<256x32xf32>,
    %c2_91 = arith.constant 2 : index
    %c2_92 = arith.constant 2 : index
    %c0_93 = arith.constant 0 : index
    %73 = vector.load %arg8[%c2_91, %c2_92, %c0_93] : memref<18x18x32xf32, #tpu.memory_space<vmem>>, vector<16x16x32xf32>
    %74 = vector.shape_cast %73 : vector<16x16x32xf32> to vector<256x32xf32>
    %c0_94 = arith.constant 0 : index
    %c256 = arith.constant 256 : index
    %75 = vector.load %arg9[%c0_94, %c256] : memref<256x292xf32, #tpu.memory_space<vmem>>, vector<256x32xf32>
    tpu.vector_store %arg9[%c0_94, %c256], %74 {strides = array<i32>} : memref<256x292xf32, #tpu.memory_space<vmem>>, vector<256x32xf32>,
    %c0_95 = arith.constant 0 : index
    %c1_96 = arith.constant 1 : index
    %c1_97 = arith.constant 1 : index
    %c0_98 = arith.constant 0 : index
    %76 = vector.load %arg1[%c0_95, %c1_96, %c1_97, %c0_98] : memref<1x18x18x4xf32, #tpu.memory_space<vmem>>, vector<1x16x16x4xf32>
    %77 = vector.shape_cast %76 : vector<1x16x16x4xf32> to vector<16x16x4xf32>
    %78 = vector.shape_cast %77 : vector<16x16x4xf32> to vector<256x4xf32>
    %c0_99 = arith.constant 0 : index
    %c288 = arith.constant 288 : index
    %79 = vector.load %arg9[%c0_99, %c288] : memref<256x292xf32, #tpu.memory_space<vmem>>, vector<256x4xf32>
    tpu.vector_store %arg9[%c0_99, %c288], %78 {strides = array<i32>} : memref<256x292xf32, #tpu.memory_space<vmem>>, vector<256x4xf32>,
    %c0_100 = arith.constant 0 : index
    %c0_101 = arith.constant 0 : index
    %80 = vector.load %arg9[%c0_100, %c0_101] : memref<256x292xf32, #tpu.memory_space<vmem>>, vector<256x292xf32>
    %81 = arith.truncf %80 : vector<256x292xf32> to vector<256x292xbf16>
    %c0_102 = arith.constant 0 : index
    %c0_103 = arith.constant 0 : index
    %82 = vector.load %arg4[%c0_102, %c0_103] : memref<292x32xbf16, #tpu.memory_space<vmem>>, vector<292x32xbf16>
    %cst_104 = arith.constant dense<0.000000e+00> : vector<256x32xf32>
    %83 = tpu.matmul %81, %82, %cst_104 {dimension_numbers = #tpu.dot_dimension_numbers<[1], [0], [0], [1], [0, 0, 1, 1], [], []>} : vector<256x292xbf16>, vector<292x32xbf16>, vector<256x32xf32> -> vector<256x32xf32>
    %c0_105 = arith.constant 0 : index
    %c0_106 = arith.constant 0 : index
    %84 = vector.load %arg5[%c0_105, %c0_106] : memref<1x32xf32, #tpu.memory_space<vmem>>, vector<1x32xf32>
    %85 = vector.broadcast %84 : vector<1x32xf32> to vector<256x32xf32>
    %86 = arith.addf %83, %85 : vector<256x32xf32>
    %cst_107 = arith.constant 0.000000e+00 : f32
    %87 = vector.broadcast %cst_107 : f32 to vector<256x32xf32>
    %88 = arith.maximumf %86, %87 : vector<256x32xf32>
    %c0_108 = arith.constant 0 : index
    %c0_109 = arith.constant 0 : index
    %c0_110 = arith.constant 0 : index
    %89 = vector.load %arg6[%c0_108, %c0_109, %c0_110] : memref<1x256x32xf32, #tpu.memory_space<vmem>>, vector<1x256x32xf32>
    %90 = vector.shape_cast %89 : vector<1x256x32xf32> to vector<256x32xf32>
    %91 = vector.shape_cast %88 : vector<256x32xf32> to vector<1x256x32xf32>
    tpu.vector_store %arg6[%c0_108, %c0_109, %c0_110], %91 {strides = array<i32>} : memref<1x256x32xf32, #tpu.memory_space<vmem>>, vector<1x256x32xf32>,
    return
  }
  func.func @transform_0(%arg0: i32) -> (i32, i32, i32, i32) {
    %c0_i32 = arith.constant 0 : i32
    %c0_i32_0 = arith.constant 0 : i32
    %c0_i32_1 = arith.constant 0 : i32
    %c0_i32_2 = arith.constant 0 : i32
    return %arg0, %c0_i32, %c0_i32_0, %c0_i32_1 : i32, i32, i32, i32
  }
  func.func @transform_1(%arg0: i32) -> (i32, i32) {
    %c0_i32 = arith.constant 0 : i32
    %c0_i32_0 = arith.constant 0 : i32
    %c0_i32_1 = arith.constant 0 : i32
    return %c0_i32, %c0_i32_0 : i32, i32
  }
  func.func @transform_2(%arg0: i32) -> (i32, i32) {
    %c0_i32 = arith.constant 0 : i32
    %c0_i32_0 = arith.constant 0 : i32
    %c0_i32_1 = arith.constant 0 : i32
    return %c0_i32, %c0_i32_0 : i32, i32
  }
  func.func @transform_3(%arg0: i32) -> (i32, i32) {
    %c0_i32 = arith.constant 0 : i32
    %c0_i32_0 = arith.constant 0 : i32
    %c0_i32_1 = arith.constant 0 : i32
    return %c0_i32, %c0_i32_0 : i32, i32
  }
  func.func @transform_4(%arg0: i32) -> (i32, i32) {
    %c0_i32 = arith.constant 0 : i32
    %c0_i32_0 = arith.constant 0 : i32
    %c0_i32_1 = arith.constant 0 : i32
    return %c0_i32, %c0_i32_0 : i32, i32
  }
  func.func @transform_5(%arg0: i32) -> (i32, i32, i32) {
    %c0_i32 = arith.constant 0 : i32
    %c0_i32_0 = arith.constant 0 : i32
    %c0_i32_1 = arith.constant 0 : i32
    return %arg0, %c0_i32, %c0_i32_0 : i32, i32, i32
  }
}

</mosaic_0001>

<bundles_post_ra>
// kernel: texture_extractor_forward.1
= control target key start
LH: loop header
LB: loop body
LE: loop exit
PB: predicated region body
PF: predicated region fallthrough
CT: control target
= control target key end

     0   :  { %10 = vsyncpa [#allocation6], 0  ;;  %s7771_s0 = inlined_call_operand.vmem [shape: f32[2,18,18,4], index: 0, kind: input, shape index: {}]   ;;  %s7772_s1 = inlined_call_operand.vmem [shape: bf16[36,32], index: 1, kind: input, shape index: {}]   ;;  %s7773_s2 = inlined_call_operand.vmem [shape: f32[1,32], index: 2, kind: input, shape index: {}]   ;;  %s7774_s3 = inlined_call_operand.vmem [shape: bf16[292,32], index: 3, kind: input, shape index: {}]   ;;  %s7775_s4 = inlined_call_operand.vmem [shape: f32[1,32], index: 4, kind: input, shape index: {}]   ;;  %s7776_s5 = inlined_call_operand.hbm [shape: f32[2,256,32], index: 5, kind: output, shape index: {}]  }
   0x1   :  { %12 = vsyncpa [#allocation6 + $0x1], 0  ;;  %s5297_s18 = smov 0   ;;  %s5299_s19 = smov 0  }
   0x2   :  { %s5301_s20 = smov 0   ;;  %s5303_s21 = smov 0  }
   0x3 LB: > { %s5318_s22 = sadd.s32 4294967295, %s5252_s21   ;;  %s4597_s23 = sadd.s32 4294967294, %s5252_s21   ;;  %s5252_s21 = sphi %s5303_s21, %s7840_s21   ;;  %s5248_s20 = sphi %s5301_s20, %s7839_s20   ;;  %s5244_s19 = sphi %s5299_s19, %s7838_s19   ;;  %s5240_s18 = sphi %s5297_s18, %s7837_s18  }
   0x4   : > { %s5322_s24 = sadd.s32 1, %s5252_s21   ;;  %s135_s25 = sadd.s32 1, %s5248_s20 }
   0x5   : > { %s132_s26 = ssub.s32 %s5252_s21, %s5322_s24  ;;  %p145_p0 = scmp.ne.s32.totalorder %s5248_s20, %s5244_s19 }
   0x6   : > { %p133_p1 = scmp.eq.s32.totalorder %s132_s26, 0  ;;  %p146_p2 = scmp.eq.s32.totalorder %s5318_s22, 1 }
   0x7   : > { %p151_p3 = scmp.ne.s32.totalorder %s5244_s19, %s5240_s18  ;;  %p152_p4 = scmp.eq.s32.totalorder %s4597_s23, 1 }
   0x8   : > { %s5333_s27 = scalar_select %p133_p1, %s5248_s20, %s135_s25  }
   0x9   : > { %p5335_p5 = por %p146_p2, %p145_p0  ;;  %p5339_p6 = por %p152_p4, %p151_p3 }
   0xa   : > { %p4600_p7 = scmp.ge.s32.totalorder %s5252_s21, 1  ;;  %p190_p8 = scmp.lt.s32.totalorder %s5252_s21, 3 }
   0xc   : > { %p191_p9 = pnand %p4600_p7, %p190_p8 }
   0xe   : > { %194 = sbr.rel (%p191_p9) target bundleno = 1549 (0x60d), region = 40 }
  0x13   : > { %p218_p10 = scmp.lt.s32.totalorder %s5318_s22, 1  ;;  %s5254_s10 = smov 4   ;;  %vm256_vm0 = vcmask 31744   ;;  %vm449_vm1 = vcmask 64544   ;;  %vm642_vm2 = vcmask 97344   ;;  %vm836_vm3 = vcmask 130144  }
  0x14   : > { %s5255_s11 = smov 8   ;;  %s5256_s12 = smov 12   ;;  %vm1959_vm4 = vcmask 1041408   ;;  %vm1029_vm5 = vcmask 162944   ;;  %vm1222_vm6 = vcmask 195744   ;;  %vm1416_vm7 = vcmask 228544  }
  0x15   : > { %s219_s30 = scalar_select %p218_p10, %s5318_s22, 1  ;;  %vm1609_vm8 = vcmask 261344   ;;  %vm1802_vm9 = vcmask 294144   ;;  %vm1910_vm10 = vcmask 293888   ;;  %vm2156_vm11 = vcmask 261120  }
  0x16   : > { %s5257_s13 = smov 16   ;;  %s5258_s14 = smov 20   ;;  %vm2159_vm12 = vcmask 254976   ;;  %vm2469_vm13 = vcmask 523520   ;;  %vm2662_vm14 = vcmask 785920   ;;  %vm2855_vm15 = vcmask 1048320  }
  0x17   : > { %s5117_s6 = smul.u32 432, %s219_s30  ;;  %s5259_s15 = smov 24  }
  0x18   : > { %s5260_s26 = smov 28   ;;  %s5261_s7 = smov 32  }
  0x19   : > { %s5350_s9 = scalar_lea.vmem %s7771_s0, %s5117_s6  ;;  %s5263_s8 = smov 64  }
  0x1a   : > { %v5353_v0 = vld [vmem:[%s5350_s9 + $0x19] sm:$0xff]  ;;  %v289_v1 = vld [vmem:[%s5350_s9 + $0x1] sm:$0xff]  ;;  %v290_v3 = vld [vmem:[%s5350_s9 + $0x9] sm:$0xff]  ;;  %s5264_s25 = smov 96   ;;  %s4888_s23 = sshll.u32 %s5318_s22, 12 }
  0x1b   : > { %357 = vrot.lane.b32.xlu1 %v5353_v0, %s5254_s10  ;;  %353 = vrot.lane.b32.xlu0 %v289_v1, %s5254_s10  ;;  %v5360_v2 = vld [vmem:[%s5350_s9 + $0x21] sm:$0xff]  ;;  %v5367_v4 = vld [vmem:[%s5350_s9 + $0x39] sm:$0xff]  ;;  %s7720_s6 = scalar_lea.hbm %s7776_s5, %s4888_s23 }
  0x1c   : > { %v5370_v5 = vld [vmem:[%s5350_s9 + $0x31] sm:$0xff]  ;;  %v5380_v7 = vld [vmem:[%s5350_s9 + $0x49] sm:$0xff]  ;;  %v5390_v9 = vld [vmem:[%s5350_s9 + $0x61] sm:$0xff] }
  0x1d   : > { %v5377_v6 = vld [vmem:[%s5350_s9 + $0x51] sm:$0xff]  ;;  %v5387_v8 = vld [vmem:[%s5350_s9 + $0x69] sm:$0xff]  ;;  %v5397_v10 = vld [vmem:[%s5350_s9 + $0x81] sm:$0xff] }
  0x1e   : > { %v5400_v11 = vld [vmem:[%s5350_s9 + $0x79] sm:$0xff]  ;;  %v5414_v15 = vld [vmem:[%s5350_s9 + $0x91] sm:$0xff]  ;;  %v225_v17 = vld [vmem:[%s5350_s9 + $0x8] sm:$0xff] }
  0x1f   : > { %359 = vrot.lane.b32.xlu1 %v5360_v2, %s5254_s10  ;;  %355 = vrot.lane.b32.xlu0 %v290_v3, %s5254_s10  ;;  %v5407_v12 = vld [vmem:[%s5350_s9 + $0x18] sm:$0xff]  ;;  %v224_v13 = vld [vmem:[%s5350_s9] sm:$0xff]  ;;  %258 = vst.msk [vmem:[#allocation2 + $0x8] sm:$0xff] %vm256_vm0, %v225_v17 }
  0x20   : > { %v5411_v14 = vld [vmem:[%s5350_s9 + $0x99] sm:$0xff]  ;;  %259 = vst.msk [vmem:[#allocation2 + $0x10] sm:$0xff] %vm256_vm0, %v5407_v12  ;;  %257 = vst.msk [vmem:[#allocation2] sm:$0xff] %vm256_vm0, %v224_v13  ;;  %v5426_v18 = vld [vmem:[%s5350_s9 + $0xb1] sm:$0xff] }
  0x21   : > { %v5420_v16 = vld [vmem:[%s5350_s9 + $0x20] sm:$0xff]  ;;  %v5430_v19 = vld [vmem:[%s5350_s9 + $0x38] sm:$0xff]  ;;  %v5433_v20 = vld [vmem:[%s5350_s9 + $0x30] sm:$0xff] }
  0x22   : > { %260 = vst.msk [vmem:[#allocation2 + $0x18] sm:$0xff] %vm256_vm0, %v5420_v16  ;;  %v5440_v21 = vld [vmem:[%s5350_s9 + $0xa9] sm:$0xff]  ;;  %262 = vst.msk [vmem:[#allocation2 + $0x28] sm:$0xff] %vm256_vm0, %v5430_v19  ;;  %v5458_v25 = vld [vmem:[%s5350_s9 + $0x60] sm:$0xff] }
  0x23   : > { %363 = vrot.lane.b32.xlu1 %v5367_v4, %s5254_s10  ;;  %361 = vrot.lane.b32.xlu0 %v5370_v5, %s5254_s10  ;;  %261 = vst.msk [vmem:[#allocation2 + $0x20] sm:$0xff] %vm256_vm0, %v5433_v20  ;;  %v5447_v22 = vld [vmem:[%s5350_s9 + $0x50] sm:$0xff]  ;;  %v5452_v23 = vld [vmem:[%s5350_s9 + $0x48] sm:$0xff]  ;;  %265 = vst.msk [vmem:[#allocation2 + $0x40] sm:$0xff] %vm256_vm0, %v5458_v25 }
  0x24   : > { %264 = vst.msk [vmem:[#allocation2 + $0x38] sm:$0xff] %vm256_vm0, %v5447_v22  ;;  %v5455_v24 = vld [vmem:[%s5350_s9 + $0x68] sm:$0xff]  ;;  %263 = vst.msk [vmem:[#allocation2 + $0x30] sm:$0xff] %vm256_vm0, %v5452_v23  ;;  %v5467_v26 = vld [vmem:[%s5350_s9 + $0x80] sm:$0xff] }
  0x25   : > { %266 = vst.msk [vmem:[#allocation2 + $0x48] sm:$0xff] %vm256_vm0, %v5455_v24  ;;  %v5470_v27 = vld [vmem:[%s5350_s9 + $0x78] sm:$0xff]  ;;  %v5476_v29 = vld [vmem:[%s5350_s9 + $0xc9] sm:$0xff]  ;;  %v5479_v30 = vld [vmem:[%s5350_s9 + $0xc1] sm:$0xff] }
  0x26   : > { %v5473_v28 = vld [vmem:[%s5350_s9 + $0x98] sm:$0xff]  ;;  %268 = vst.msk [vmem:[#allocation2 + $0x58] sm:$0xff] %vm256_vm0, %v5467_v26  ;;  %267 = vst.msk [vmem:[#allocation2 + $0x50] sm:$0xff] %vm256_vm0, %v5470_v27  ;;  %v5488_v31 = vld [vmem:[%s5350_s9 + $0x90] sm:$0xff] }
  0x27   : > { %367 = vrot.lane.b32.xlu1 %v5377_v6, %s5254_s10  ;;  %365 = vrot.lane.b32.xlu0 %v5380_v7, %s5254_s10  ;;  %270 = vst.msk [vmem:[#allocation2 + $0x68] sm:$0xff] %vm256_vm0, %v5473_v28  ;;  %v5491_v32 = vld [vmem:[%s5350_s9 + $0xb0] sm:$0xff]  ;;  %v5494_v33 = vld [vmem:[%s5350_s9 + $0xa8] sm:$0xff]  ;;  %269 = vst.msk [vmem:[#allocation2 + $0x60] sm:$0xff] %vm256_vm0, %v5488_v31 }
  0x28   : > { %272 = vst.msk [vmem:[#allocation2 + $0x78] sm:$0xff] %vm256_vm0, %v5491_v32  ;;  %271 = vst.msk [vmem:[#allocation2 + $0x70] sm:$0xff] %vm256_vm0, %v5494_v33  ;;  %v5507_v34 = vld [vmem:[%s5350_s9 + $0xc8] sm:$0xff]  ;;  %v5510_v35 = vld [vmem:[%s5350_s9 + $0xc0] sm:$0xff] }
  0x29   : > { %274 = vst.msk [vmem:[#allocation2 + $0x88] sm:$0xff] %vm256_vm0, %v5507_v34  ;;  %273 = vst.msk [vmem:[#allocation2 + $0x80] sm:$0xff] %vm256_vm0, %v5510_v35  ;;  %v5517_v36 = vld [vmem:[%s5350_s9 + $0xe0] sm:$0xff]  ;;  %v5520_v37 = vld [vmem:[%s5350_s9 + $0xd8] sm:$0xff] }
  0x2a   : > { %v5523_v38 = vld [vmem:[%s5350_s9 + $0xf8] sm:$0xff]  ;;  %276 = vst.msk [vmem:[#allocation2 + $0x98] sm:$0xff] %vm256_vm0, %v5517_v36  ;;  %275 = vst.msk [vmem:[#allocation2 + $0x90] sm:$0xff] %vm256_vm0, %v5520_v37  ;;  %v5532_v39 = vld [vmem:[%s5350_s9 + $0xf0] sm:$0xff] }
  0x2b   : > { %371 = vrot.lane.b32.xlu1 %v5387_v8, %s5254_s10  ;;  %369 = vrot.lane.b32.xlu0 %v5390_v9, %s5254_s10  ;;  %278 = vst.msk [vmem:[#allocation2 + $0xa8] sm:$0xff] %vm256_vm0, %v5523_v38  ;;  %v5535_v40 = vld [vmem:[%s5350_s9 + $0x110] sm:$0xff]  ;;  %v5538_v41 = vld [vmem:[%s5350_s9 + $0x108] sm:$0xff]  ;;  %277 = vst.msk [vmem:[#allocation2 + $0xa0] sm:$0xff] %vm256_vm0, %v5532_v39 }
  0x2c   : > { %v5541_v42 = vld [vmem:[%s5350_s9 + $0xe1] sm:$0xff]  ;;  %v5544_v43 = vld [vmem:[%s5350_s9 + $0xd9] sm:$0xff]  ;;  %280 = vst.msk [vmem:[#allocation2 + $0xb8] sm:$0xff] %vm256_vm0, %v5535_v40  ;;  %279 = vst.msk [vmem:[#allocation2 + $0xb0] sm:$0xff] %vm256_vm0, %v5538_v41 }
  0x2d   : > { %v5557_v44 = vld [vmem:[%s5350_s9 + $0x128] sm:$0xff]  ;;  %v5560_v45 = vld [vmem:[%s5350_s9 + $0x120] sm:$0xff]  ;;  %v5570_v47 = vld [vmem:[%s5350_s9 + $0xf1] sm:$0xff] }
  0x2e   : > { %282 = vst.msk [vmem:[#allocation2 + $0xc8] sm:$0xff] %vm256_vm0, %v5557_v44  ;;  %281 = vst.msk [vmem:[#allocation2 + $0xc0] sm:$0xff] %vm256_vm0, %v5560_v45  ;;  %v5567_v46 = vld [vmem:[%s5350_s9 + $0xf9] sm:$0xff]  ;;  %v5587_v50 = vld [vmem:[%s5350_s9 + $0x111] sm:$0xff] }
  0x2f   : > { %375 = vrot.lane.b32.xlu1 %v5397_v10, %s5254_s10  ;;  %373 = vrot.lane.b32.xlu0 %v5400_v11, %s5254_s10  ;;  %v5577_v48 = vld [vmem:[%s5350_s9 + $0x140] sm:$0xff]  ;;  %v5580_v49 = vld [vmem:[%s5350_s9 + $0x138] sm:$0xff] }
  0x30   : > { %284 = vst.msk [vmem:[#allocation2 + $0xd8] sm:$0xff] %vm256_vm0, %v5577_v48  ;;  %283 = vst.msk [vmem:[#allocation2 + $0xd0] sm:$0xff] %vm256_vm0, %v5580_v49  ;;  %v5590_v51 = vld [vmem:[%s5350_s9 + $0x109] sm:$0xff]  ;;  %v5597_v52 = vld [vmem:[%s5350_s9 + $0x158] sm:$0xff] }
  0x31   : > { %v5600_v53 = vld [vmem:[%s5350_s9 + $0x150] sm:$0xff]  ;;  %286 = vst.msk [vmem:[#allocation2 + $0xe8] sm:$0xff] %vm256_vm0, %v5597_v52  ;;  %v5614_v55 = vld [vmem:[%s5350_s9 + $0x121] sm:$0xff]  ;;  %v5634_v59 = vld [vmem:[%s5350_s9 + $0x139] sm:$0xff] }
  0x32   : > { %285 = vst.msk [vmem:[#allocation2 + $0xe0] sm:$0xff] %vm256_vm0, %v5600_v53  ;;  %v5611_v54 = vld [vmem:[%s5350_s9 + $0x129] sm:$0xff]  ;;  %v5631_v58 = vld [vmem:[%s5350_s9 + $0x141] sm:$0xff]  ;;  %7802 = vst [vmem:[#allocation9_spill] sm:$0xff] %v5634_v59 }
  0x33   : > { %379 = vrot.lane.b32.xlu1 %v5411_v14, %s5254_s10  ;;  %377 = vrot.lane.b32.xlu0 %v5414_v15, %s5254_s10  ;;  %v5617_v56 = vld [vmem:[%s5350_s9 + $0x170] sm:$0xff]  ;;  %v5620_v57 = vld [vmem:[%s5350_s9 + $0x168] sm:$0xff]  ;;  %7801 = vst [vmem:[#allocation8_spill] sm:$0xff] %v5631_v58 }
  0x34   : > { %288 = vst.msk [vmem:[#allocation2 + $0xf8] sm:$0xff] %vm256_vm0, %v5617_v56  ;;  %287 = vst.msk [vmem:[#allocation2 + $0xf0] sm:$0xff] %vm256_vm0, %v5620_v57  ;;  %v5641_v60 = vld [vmem:[%s5350_s9 + $0x159] sm:$0xff]  ;;  %v5644_v61 = vld [vmem:[%s5350_s9 + $0x151] sm:$0xff] }
  0x35   : > { %7803 = vst [vmem:[#allocation10_spill] sm:$0xff] %v5641_v60  ;;  %7804 = vst [vmem:[#allocation11_spill] sm:$0xff] %v5644_v61  ;;  %v5651_v62 = vld [vmem:[%s5350_s9 + $0x171] sm:$0xff]  ;;  %v5654_v63 = vld [vmem:[%s5350_s9 + $0x169] sm:$0xff] }
  0x36   : > { %7805 = vst [vmem:[#allocation12_spill] sm:$0xff] %v5651_v62  ;;  %7806 = vst [vmem:[#allocation13_spill] sm:$0xff] %v5654_v63  ;;  %v483_v1 = vld [vmem:[%s5350_s9 + $0xa] sm:$0xff]  ;;  %v482_v3 = vld [vmem:[%s5350_s9 + $0x2] sm:$0xff] }
  0x37   : > { %383 = vrot.lane.b32.xlu1 %v5426_v18, %s5254_s10  ;;  %381 = vrot.lane.b32.xlu0 %v5440_v21, %s5254_s10  ;;  %v5665_v13 = vld [vmem:[%s5350_s9 + $0x22] sm:$0xff]  ;;  %v5668_v17 = vld [vmem:[%s5350_s9 + $0x1a] sm:$0xff] }
  0x38   : > { %7807 = vst [vmem:[#allocation14_spill] sm:$0xff] %v5665_v13  ;;  %7808 = vst [vmem:[#allocation15_spill] sm:$0xff] %v5668_v17 }
  0x3b   : > { %387 = vrot.lane.b32.xlu1 %v5476_v29, %s5254_s10  ;;  %385 = vrot.lane.b32.xlu0 %v5479_v30, %s5254_s10 }
  0x3f   : > { %391 = vrot.lane.b32.xlu1 %v5541_v42, %s5254_s10  ;;  %389 = vrot.lane.b32.xlu0 %v5544_v43, %s5254_s10 }
  0x43   : > { %395 = vrot.lane.b32.xlu1 %v5567_v46, %s5254_s10  ;;  %393 = vrot.lane.b32.xlu0 %v5570_v47, %s5254_s10 }
  0x47   : > { %399 = vrot.lane.b32.xlu1 %v5587_v50, %s5254_s10  ;;  %397 = vrot.lane.b32.xlu0 %v5590_v51, %s5254_s10 }
  0x4b   : > { %403 = vrot.lane.b32.xlu1 %v5611_v54, %s5254_s10  ;;  %401 = vrot.lane.b32.xlu0 %v5614_v55, %s5254_s10 }
  0x4f   : > { %407 = vrot.lane.b32.xlu1 %v5631_v58, %s5254_s10  ;;  %405 = vrot.lane.b32.xlu0 %v5634_v59, %s5254_s10 }
  0x53   : > { %411 = vrot.lane.b32.xlu1 %v5641_v60, %s5254_s10  ;;  %409 = vrot.lane.b32.xlu0 %v5644_v61, %s5254_s10  ;;  %v500_v61 = vld [vmem:[%s5350_s9 + $0xda] sm:$0xff]  ;;  %v504_v60 = vld [vmem:[%s5350_s9 + $0x10a] sm:$0xff] }
  0x57   : > { %415 = vrot.lane.b32.xlu1 %v5651_v62, %s5254_s10  ;;  %413 = vrot.lane.b32.xlu0 %v5654_v63, %s5254_s10  ;;  %v5675_v63 = vld [vmem:[%s5350_s9 + $0x3a] sm:$0xff]  ;;  %v5678_v62 = vld [vmem:[%s5350_s9 + $0x32] sm:$0xff] }
  0x58   : > { %7809 = vst [vmem:[#allocation16_spill] sm:$0xff] %v5675_v63  ;;  %7810 = vst [vmem:[#allocation17_spill] sm:$0xff] %v5678_v62 }
  0x5b   : > { %548 = vrot.lane.b32.xlu1 %v483_v1, %s5255_s11  ;;  %546 = vrot.lane.b32.xlu0 %v482_v3, %s5255_s11  ;;  %v5685_v1 = vld [vmem:[%s5350_s9 + $0x52] sm:$0xff]  ;;  %v5688_v3 = vld [vmem:[%s5350_s9 + $0x4a] sm:$0xff] }
  0x5c   : > { %7811 = vst [vmem:[#allocation18_spill] sm:$0xff] %v5685_v1  ;;  %7812 = vst [vmem:[#allocation19_spill] sm:$0xff] %v5688_v3 }
  0x5f   : > { %552 = vrot.lane.b32.xlu1 %v5665_v13, %s5255_s11  ;;  %550 = vrot.lane.b32.xlu0 %v5668_v17, %s5255_s11  ;;  %v5695_v17 = vld [vmem:[%s5350_s9 + $0x6a] sm:$0xff]  ;;  %v5698_v13 = vld [vmem:[%s5350_s9 + $0x62] sm:$0xff] }
  0x60   : > { %7813 = vst [vmem:[#allocation20_spill] sm:$0xff] %v5695_v17  ;;  %7814 = vst [vmem:[#allocation21_spill] sm:$0xff] %v5698_v13 }
  0x63   : > { %556 = vrot.lane.b32.xlu1 %v5675_v63, %s5255_s11  ;;  %554 = vrot.lane.b32.xlu0 %v5678_v62, %s5255_s11  ;;  %v5705_v62 = vld [vmem:[%s5350_s9 + $0x82] sm:$0xff]  ;;  %v5708_v63 = vld [vmem:[%s5350_s9 + $0x7a] sm:$0xff] }
  0x64   : > { %7815 = vst [vmem:[#allocation22_spill] sm:$0xff] %v5705_v62  ;;  %7816 = vst [vmem:[#allocation23_spill] sm:$0xff] %v5708_v63 }
  0x67   : > { %560 = vrot.lane.b32.xlu1 %v5685_v1, %s5255_s11  ;;  %558 = vrot.lane.b32.xlu0 %v5688_v3, %s5255_s11  ;;  %v5715_v3 = vld [vmem:[%s5350_s9 + $0x9a] sm:$0xff]  ;;  %v5718_v1 = vld [vmem:[%s5350_s9 + $0x92] sm:$0xff] }
  0x68   : > { %7817 = vst [vmem:[#allocation24_spill] sm:$0xff] %v5715_v3  ;;  %7818 = vst [vmem:[#allocation25_spill] sm:$0xff] %v5718_v1 }
  0x6b   : > { %564 = vrot.lane.b32.xlu1 %v5695_v17, %s5255_s11  ;;  %562 = vrot.lane.b32.xlu0 %v5698_v13, %s5255_s11  ;;  %v497_v13 = vld [vmem:[%s5350_s9 + $0xb2] sm:$0xff]  ;;  %v496_v17 = vld [vmem:[%s5350_s9 + $0xaa] sm:$0xff] }
  0x6f   : > { %568 = vrot.lane.b32.xlu1 %v5705_v62, %s5255_s11  ;;  %566 = vrot.lane.b32.xlu0 %v5708_v63, %s5255_s11  ;;  %v499_v63 = vld [vmem:[%s5350_s9 + $0xca] sm:$0xff]  ;;  %v498_v62 = vld [vmem:[%s5350_s9 + $0xc2] sm:$0xff] }
  0x73   : > { %572 = vrot.lane.b32.xlu1 %v5715_v3, %s5255_s11  ;;  %570 = vrot.lane.b32.xlu0 %v5718_v1, %s5255_s11  ;;  %v501_v3 = vld [vmem:[%s5350_s9 + $0xe2] sm:$0xff]  ;;  %v503_v1 = vld [vmem:[%s5350_s9 + $0xfa] sm:$0xff] }
  0x77   : > { %576 = vrot.lane.b32.xlu1 %v497_v13, %s5255_s11  ;;  %574 = vrot.lane.b32.xlu0 %v496_v17, %s5255_s11  ;;  %v502_v13 = vld [vmem:[%s5350_s9 + $0xf2] sm:$0xff] }
  0x78   : > { %v505_v17 = vld [vmem:[%s5350_s9 + $0x112] sm:$0xff] }
  0x7b   : > { %580 = vrot.lane.b32.xlu1 %v499_v63, %s5255_s11  ;;  %578 = vrot.lane.b32.xlu0 %v498_v62, %s5255_s11  ;;  %v507_v62 = vld [vmem:[%s5350_s9 + $0x12a] sm:$0xff]  ;;  %v506_v63 = vld [vmem:[%s5350_s9 + $0x122] sm:$0xff] }
  0x7f   : > { %584 = vrot.lane.b32.xlu1 %v501_v3, %s5255_s11  ;;  %582 = vrot.lane.b32.xlu0 %v500_v61, %s5255_s11  ;;  %v509_v61 = vld [vmem:[%s5350_s9 + $0x142] sm:$0xff] }
  0x83   : > { %588 = vrot.lane.b32.xlu1 %v503_v1, %s5255_s11  ;;  %586 = vrot.lane.b32.xlu0 %v502_v13, %s5255_s11  ;;  %v508_v1 = vld [vmem:[%s5350_s9 + $0x13a] sm:$0xff] }
  0x87   : > { %592 = vrot.lane.b32.xlu1 %v505_v17, %s5255_s11  ;;  %590 = vrot.lane.b32.xlu0 %v504_v60, %s5255_s11  ;;  %v511_v60 = vld [vmem:[%s5350_s9 + $0x15a] sm:$0xff]  ;;  %v510_v17 = vld [vmem:[%s5350_s9 + $0x152] sm:$0xff] }
  0x8b   : > { %596 = vrot.lane.b32.xlu1 %v507_v62, %s5255_s11  ;;  %594 = vrot.lane.b32.xlu0 %v506_v63, %s5255_s11  ;;  %v513_v63 = vld [vmem:[%s5350_s9 + $0x172] sm:$0xff] }
  0x8d   : > { %v358_v3 = vpop.permute.xlu1 %357  ;;  %v354_v13 = vpop.permute.xlu0 %353 }
  0x8e   : > { %452 = vst.msk [vmem:[#allocation2 + $0x10] sm:$0xff] %vm449_vm1, %v358_v3  ;;  %450 = vst.msk [vmem:[#allocation2] sm:$0xff] %vm449_vm1, %v354_v13  ;;  %v512_v3 = vld [vmem:[%s5350_s9 + $0x16a] sm:$0xff] }
  0x8f   : > { %600 = vrot.lane.b32.xlu1 %v509_v61, %s5255_s11  ;;  %598 = vrot.lane.b32.xlu0 %v508_v1, %s5255_s11 }
  0x91   : > { %v360_v62 = vpop.permute.xlu1 %359  ;;  %v356_v59 = vpop.permute.xlu0 %355 }
  0x92   : > { %453 = vst.msk [vmem:[#allocation2 + $0x18] sm:$0xff] %vm449_vm1, %v360_v62  ;;  %451 = vst.msk [vmem:[#allocation2 + $0x8] sm:$0xff] %vm449_vm1, %v356_v59 }
  0x93   : > { %604 = vrot.lane.b32.xlu1 %v511_v60, %s5255_s11  ;;  %602 = vrot.lane.b32.xlu0 %v510_v17, %s5255_s11 }
  0x95   : > { %v364_v58 = vpop.permute.xlu1 %363  ;;  %v362_v13 = vpop.permute.xlu0 %361 }
  0x96   : > { %455 = vst.msk [vmem:[#allocation2 + $0x28] sm:$0xff] %vm449_vm1, %v364_v58  ;;  %454 = vst.msk [vmem:[#allocation2 + $0x20] sm:$0xff] %vm449_vm1, %v362_v13 }
  0x97   : > { %608 = vrot.lane.b32.xlu1 %v513_v63, %s5255_s11  ;;  %606 = vrot.lane.b32.xlu0 %v512_v3, %s5255_s11 }
  0x99   : > { %v368_v61 = vpop.permute.xlu1 %367  ;;  %v366_v1 = vpop.permute.xlu0 %365 }
  0x9a   : > { %457 = vst.msk [vmem:[#allocation2 + $0x38] sm:$0xff] %vm449_vm1, %v368_v61  ;;  %456 = vst.msk [vmem:[#allocation2 + $0x30] sm:$0xff] %vm449_vm1, %v366_v1 }
  0x9b   : > { %742 = vrot.lane.b32.xlu1 %v5420_v16, %s5256_s12  ;;  %740 = vrot.lane.b32.xlu0 %v5407_v12, %s5256_s12 }
  0x9d   : > { %v372_v58 = vpop.permute.xlu1 %371  ;;  %v370_v59 = vpop.permute.xlu0 %369 }
  0x9e   : > { %459 = vst.msk [vmem:[#allocation2 + $0x48] sm:$0xff] %vm449_vm1, %v372_v58  ;;  %458 = vst.msk [vmem:[#allocation2 + $0x40] sm:$0xff] %vm449_vm1, %v370_v59 }
  0x9f   : > { %746 = vrot.lane.b32.xlu1 %v5430_v19, %s5256_s12  ;;  %744 = vrot.lane.b32.xlu0 %v5433_v20, %s5256_s12 }
  0xa1   : > { %v376_v60 = vpop.permute.xlu1 %375  ;;  %v374_v17 = vpop.permute.xlu0 %373 }
  0xa2   : > { %461 = vst.msk [vmem:[#allocation2 + $0x58] sm:$0xff] %vm449_vm1, %v376_v60  ;;  %460 = vst.msk [vmem:[#allocation2 + $0x50] sm:$0xff] %vm449_vm1, %v374_v17 }
  0xa3   : > { %750 = vrot.lane.b32.xlu1 %v5447_v22, %s5256_s12  ;;  %748 = vrot.lane.b32.xlu0 %v5452_v23, %s5256_s12 }
  0xa5   : > { %v380_v12 = vpop.permute.xlu1 %379  ;;  %v378_v16 = vpop.permute.xlu0 %377 }
  0xa6   : > { %463 = vst.msk [vmem:[#allocation2 + $0x68] sm:$0xff] %vm449_vm1, %v380_v12  ;;  %462 = vst.msk [vmem:[#allocation2 + $0x60] sm:$0xff] %vm449_vm1, %v378_v16 }
  0xa7   : > { %754 = vrot.lane.b32.xlu1 %v5455_v24, %s5256_s12  ;;  %752 = vrot.lane.b32.xlu0 %v5458_v25, %s5256_s12 }
  0xa9   : > { %v384_v62 = vpop.permute.xlu1 %383  ;;  %v382_v63 = vpop.permute.xlu0 %381 }
  0xaa   : > { %465 = vst.msk [vmem:[#allocation2 + $0x78] sm:$0xff] %vm449_vm1, %v384_v62  ;;  %464 = vst.msk [vmem:[#allocation2 + $0x70] sm:$0xff] %vm449_vm1, %v382_v63 }
  0xab   : > { %758 = vrot.lane.b32.xlu1 %v5467_v26, %s5256_s12  ;;  %756 = vrot.lane.b32.xlu0 %v5470_v27, %s5256_s12 }
  0xad   : > { %v388_v3 = vpop.permute.xlu1 %387  ;;  %v386_v13 = vpop.permute.xlu0 %385 }
  0xae   : > { %467 = vst.msk [vmem:[#allocation2 + $0x88] sm:$0xff] %vm449_vm1, %v388_v3  ;;  %466 = vst.msk [vmem:[#allocation2 + $0x80] sm:$0xff] %vm449_vm1, %v386_v13 }
  0xaf   : > { %762 = vrot.lane.b32.xlu1 %v5473_v28, %s5256_s12  ;;  %760 = vrot.lane.b32.xlu0 %v5488_v31, %s5256_s12 }
  0xb1   : > { %v392_v61 = vpop.permute.xlu1 %391  ;;  %v390_v1 = vpop.permute.xlu0 %389 }
  0xb2   : > { %469 = vst.msk [vmem:[#allocation2 + $0x98] sm:$0xff] %vm449_vm1, %v392_v61  ;;  %468 = vst.msk [vmem:[#allocation2 + $0x90] sm:$0xff] %vm449_vm1, %v390_v1 }
  0xb3   : > { %766 = vrot.lane.b32.xlu1 %v5491_v32, %s5256_s12  ;;  %764 = vrot.lane.b32.xlu0 %v5494_v33, %s5256_s12 }
  0xb5   : > { %v396_v58 = vpop.permute.xlu1 %395  ;;  %v394_v59 = vpop.permute.xlu0 %393 }
  0xb6   : > { %471 = vst.msk [vmem:[#allocation2 + $0xa8] sm:$0xff] %vm449_vm1, %v396_v58  ;;  %470 = vst.msk [vmem:[#allocation2 + $0xa0] sm:$0xff] %vm449_vm1, %v394_v59 }
  0xb7   : > { %770 = vrot.lane.b32.xlu1 %v5507_v34, %s5256_s12  ;;  %768 = vrot.lane.b32.xlu0 %v5510_v35, %s5256_s12 }
  0xb9   : > { %v400_v60 = vpop.permute.xlu1 %399  ;;  %v398_v17 = vpop.permute.xlu0 %397 }
  0xba   : > { %473 = vst.msk [vmem:[#allocation2 + $0xb8] sm:$0xff] %vm449_vm1, %v400_v60  ;;  %472 = vst.msk [vmem:[#allocation2 + $0xb0] sm:$0xff] %vm449_vm1, %v398_v17 }
  0xbb   : > { %774 = vrot.lane.b32.xlu1 %v5517_v36, %s5256_s12  ;;  %772 = vrot.lane.b32.xlu0 %v5520_v37, %s5256_s12 }
  0xbd   : > { %v404_v12 = vpop.permute.xlu1 %403  ;;  %v402_v16 = vpop.permute.xlu0 %401 }
  0xbe   : > { %475 = vst.msk [vmem:[#allocation2 + $0xc8] sm:$0xff] %vm449_vm1, %v404_v12  ;;  %474 = vst.msk [vmem:[#allocation2 + $0xc0] sm:$0xff] %vm449_vm1, %v402_v16 }
  0xbf   : > { %778 = vrot.lane.b32.xlu1 %v5523_v38, %s5256_s12  ;;  %776 = vrot.lane.b32.xlu0 %v5532_v39, %s5256_s12 }
  0xc1   : > { %v408_v62 = vpop.permute.xlu1 %407  ;;  %v406_v63 = vpop.permute.xlu0 %405 }
  0xc2   : > { %477 = vst.msk [vmem:[#allocation2 + $0xd8] sm:$0xff] %vm449_vm1, %v408_v62  ;;  %476 = vst.msk [vmem:[#allocation2 + $0xd0] sm:$0xff] %vm449_vm1, %v406_v63  ;;  %v7822_v63 = vld [vmem:[#allocation11_spill] sm:$0xff] }
  0xc3   : > { %782 = vrot.lane.b32.xlu1 %v5535_v40, %s5256_s12  ;;  %780 = vrot.lane.b32.xlu0 %v5538_v41, %s5256_s12 }
  0xc5   : > { %v412_v3 = vpop.permute.xlu1 %411  ;;  %v410_v13 = vpop.permute.xlu0 %409 }
  0xc6   : > { %479 = vst.msk [vmem:[#allocation2 + $0xe8] sm:$0xff] %vm449_vm1, %v412_v3  ;;  %478 = vst.msk [vmem:[#allocation2 + $0xe0] sm:$0xff] %vm449_vm1, %v410_v13 }
  0xc7   : > { %786 = vrot.lane.b32.xlu1 %v5557_v44, %s5256_s12  ;;  %784 = vrot.lane.b32.xlu0 %v5560_v45, %s5256_s12 }
  0xc9   : > { %v416_v61 = vpop.permute.xlu1 %415  ;;  %v414_v1 = vpop.permute.xlu0 %413 }
  0xca   : > { %481 = vst.msk [vmem:[#allocation2 + $0xf8] sm:$0xff] %vm449_vm1, %v416_v61  ;;  %480 = vst.msk [vmem:[#allocation2 + $0xf0] sm:$0xff] %vm449_vm1, %v414_v1  ;;  %v7823_v61 = vld [vmem:[#allocation12_spill] sm:$0xff]  ;;  %v7824_v1 = vld [vmem:[#allocation13_spill] sm:$0xff] }
  0xcb   : > { %790 = vrot.lane.b32.xlu1 %v5577_v48, %s5256_s12  ;;  %788 = vrot.lane.b32.xlu0 %v5580_v49, %s5256_s12  ;;  %v4634_v48 = vld [vmem:[%s5350_s9 + $0x188] sm:$0xff]  ;;  %v4633_v49 = vld [vmem:[%s5350_s9 + $0x180] sm:$0xff] }
  0xcd   : > { %v549_v58 = vpop.permute.xlu1 %548  ;;  %v547_v44 = vpop.permute.xlu0 %546 }
  0xce   : > { %644 = vst.msk [vmem:[#allocation2 + $0x8] sm:$0xff] %vm642_vm2, %v549_v58  ;;  %643 = vst.msk [vmem:[#allocation2] sm:$0xff] %vm642_vm2, %v547_v44  ;;  %v4666_v58 = vld [vmem:[%s5350_s9 + $0x189] sm:$0xff]  ;;  %v4665_v44 = vld [vmem:[%s5350_s9 + $0x181] sm:$0xff] }
  0xcf   : > { %794 = vrot.lane.b32.xlu1 %v5597_v52, %s5256_s12  ;;  %792 = vrot.lane.b32.xlu0 %v5600_v53, %s5256_s12 }
  0xd1   : > { %v553_v45 = vpop.permute.xlu1 %552  ;;  %v551_v59 = vpop.permute.xlu0 %550 }
  0xd2   : > { %646 = vst.msk [vmem:[#allocation2 + $0x18] sm:$0xff] %vm642_vm2, %v553_v45  ;;  %645 = vst.msk [vmem:[#allocation2 + $0x10] sm:$0xff] %vm642_vm2, %v551_v59 }
  0xd3   : > { %798 = vrot.lane.b32.xlu1 %v5617_v56, %s5256_s12  ;;  %796 = vrot.lane.b32.xlu0 %v5620_v57, %s5256_s12 }
  0xd5   : > { %v557_v60 = vpop.permute.xlu1 %556  ;;  %v555_v17 = vpop.permute.xlu0 %554 }
  0xd6   : > { %648 = vst.msk [vmem:[#allocation2 + $0x28] sm:$0xff] %vm642_vm2, %v557_v60  ;;  %647 = vst.msk [vmem:[#allocation2 + $0x20] sm:$0xff] %vm642_vm2, %v555_v17  ;;  %v7825_v60 = vld [vmem:[#allocation14_spill] sm:$0xff]  ;;  %v7826_v17 = vld [vmem:[#allocation15_spill] sm:$0xff] }
  0xd7   : > { %802 = vrot.lane.b32.xlu1 %v4634_v48, %s5256_s12  ;;  %800 = vrot.lane.b32.xlu0 %v4633_v49, %s5256_s12  ;;  %s5265_s12 = smov [#allocation5]  }
  0xd9   : > { %v561_v52 = vpop.permute.xlu1 %560  ;;  %v559_v53 = vpop.permute.xlu0 %558 }
  0xda   : > { %650 = vst.msk [vmem:[#allocation2 + $0x38] sm:$0xff] %vm642_vm2, %v561_v52  ;;  %649 = vst.msk [vmem:[#allocation2 + $0x30] sm:$0xff] %vm642_vm2, %v559_v53 }
  0xdb   : > { %935 = vrot.lane.b32.xlu1 %v5360_v2, %s5257_s13  ;;  %933 = vrot.lane.b32.xlu0 %v5353_v0, %s5257_s13 }
  0xdd   : > { %v565_v56 = vpop.permute.xlu1 %564  ;;  %v563_v57 = vpop.permute.xlu0 %562 }
  0xde   : > { %652 = vst.msk [vmem:[#allocation2 + $0x48] sm:$0xff] %vm642_vm2, %v565_v56  ;;  %651 = vst.msk [vmem:[#allocation2 + $0x40] sm:$0xff] %vm642_vm2, %v563_v57  ;;  %v7827_v56 = vld [vmem:[#allocation16_spill] sm:$0xff]  ;;  %v7828_v57 = vld [vmem:[#allocation17_spill] sm:$0xff] }
  0xdf   : > { %939 = vrot.lane.b32.xlu1 %v5367_v4, %s5257_s13  ;;  %937 = vrot.lane.b32.xlu0 %v5370_v5, %s5257_s13 }
  0xe1   : > { %v569_v12 = vpop.permute.xlu1 %568  ;;  %v567_v16 = vpop.permute.xlu0 %566 }
  0xe2   : > { %654 = vst.msk [vmem:[#allocation2 + $0x58] sm:$0xff] %vm642_vm2, %v569_v12  ;;  %653 = vst.msk [vmem:[#allocation2 + $0x50] sm:$0xff] %vm642_vm2, %v567_v16 }
  0xe3   : > { %943 = vrot.lane.b32.xlu1 %v5377_v6, %s5257_s13  ;;  %941 = vrot.lane.b32.xlu0 %v5380_v7, %s5257_s13 }
  0xe5   : > { %v573_v0 = vpop.permute.xlu1 %572  ;;  %v571_v2 = vpop.permute.xlu0 %570 }
  0xe6   : > { %656 = vst.msk [vmem:[#allocation2 + $0x68] sm:$0xff] %vm642_vm2, %v573_v0  ;;  %655 = vst.msk [vmem:[#allocation2 + $0x60] sm:$0xff] %vm642_vm2, %v571_v2  ;;  %v7829_v0 = vld [vmem:[#allocation18_spill] sm:$0xff]  ;;  %v7830_v2 = vld [vmem:[#allocation19_spill] sm:$0xff] }
  0xe7   : > { %947 = vrot.lane.b32.xlu1 %v5387_v8, %s5257_s13  ;;  %945 = vrot.lane.b32.xlu0 %v5390_v9, %s5257_s13 }
  0xe9   : > { %v577_v4 = vpop.permute.xlu1 %576  ;;  %v575_v5 = vpop.permute.xlu0 %574 }
  0xea   : > { %658 = vst.msk [vmem:[#allocation2 + $0x78] sm:$0xff] %vm642_vm2, %v577_v4  ;;  %657 = vst.msk [vmem:[#allocation2 + $0x70] sm:$0xff] %vm642_vm2, %v575_v5 }
  0xeb   : > { %951 = vrot.lane.b32.xlu1 %v5397_v10, %s5257_s13  ;;  %949 = vrot.lane.b32.xlu0 %v5400_v11, %s5257_s13 }
  0xed   : > { %v581_v6 = vpop.permute.xlu1 %580  ;;  %v579_v7 = vpop.permute.xlu0 %578 }
  0xee   : > { %660 = vst.msk [vmem:[#allocation2 + $0x88] sm:$0xff] %vm642_vm2, %v581_v6  ;;  %659 = vst.msk [vmem:[#allocation2 + $0x80] sm:$0xff] %vm642_vm2, %v579_v7  ;;  %v7831_v6 = vld [vmem:[#allocation20_spill] sm:$0xff]  ;;  %v7832_v7 = vld [vmem:[#allocation21_spill] sm:$0xff] }
  0xef   : > { %955 = vrot.lane.b32.xlu1 %v5411_v14, %s5257_s13  ;;  %953 = vrot.lane.b32.xlu0 %v5414_v15, %s5257_s13 }
  0xf1   : > { %v585_v8 = vpop.permute.xlu1 %584  ;;  %v583_v9 = vpop.permute.xlu0 %582 }
  0xf2   : > { %662 = vst.msk [vmem:[#allocation2 + $0x98] sm:$0xff] %vm642_vm2, %v585_v8  ;;  %661 = vst.msk [vmem:[#allocation2 + $0x90] sm:$0xff] %vm642_vm2, %v583_v9 }
  0xf3   : > { %959 = vrot.lane.b32.xlu1 %v5426_v18, %s5257_s13  ;;  %957 = vrot.lane.b32.xlu0 %v5440_v21, %s5257_s13 }
  0xf5   : > { %v589_v10 = vpop.permute.xlu1 %588  ;;  %v587_v11 = vpop.permute.xlu0 %586 }
  0xf6   : > { %664 = vst.msk [vmem:[#allocation2 + $0xa8] sm:$0xff] %vm642_vm2, %v589_v10  ;;  %663 = vst.msk [vmem:[#allocation2 + $0xa0] sm:$0xff] %vm642_vm2, %v587_v11  ;;  %v7833_v10 = vld [vmem:[#allocation22_spill] sm:$0xff]  ;;  %v7834_v11 = vld [vmem:[#allocation23_spill] sm:$0xff] }
  0xf7   : > { %963 = vrot.lane.b32.xlu1 %v5476_v29, %s5257_s13  ;;  %961 = vrot.lane.b32.xlu0 %v5479_v30, %s5257_s13 }
  0xf9   : > { %v593_v14 = vpop.permute.xlu1 %592  ;;  %v591_v15 = vpop.permute.xlu0 %590 }
  0xfa   : > { %666 = vst.msk [vmem:[#allocation2 + $0xb8] sm:$0xff] %vm642_vm2, %v593_v14  ;;  %665 = vst.msk [vmem:[#allocation2 + $0xb0] sm:$0xff] %vm642_vm2, %v591_v15 }
  0xfb   : > { %967 = vrot.lane.b32.xlu1 %v5541_v42, %s5257_s13  ;;  %965 = vrot.lane.b32.xlu0 %v5544_v43, %s5257_s13 }
  0xfd   : > { %v597_v18 = vpop.permute.xlu1 %596  ;;  %v595_v21 = vpop.permute.xlu0 %594 }
  0xfe   : > { %668 = vst.msk [vmem:[#allocation2 + $0xc8] sm:$0xff] %vm642_vm2, %v597_v18  ;;  %667 = vst.msk [vmem:[#allocation2 + $0xc0] sm:$0xff] %vm642_vm2, %v595_v21  ;;  %v7835_v18 = vld [vmem:[#allocation24_spill] sm:$0xff]  ;;  %v7836_v21 = vld [vmem:[#allocation25_spill] sm:$0xff] }
  0xff   : > { %971 = vrot.lane.b32.xlu1 %v5567_v46, %s5257_s13  ;;  %969 = vrot.lane.b32.xlu0 %v5570_v47, %s5257_s13 }
 0x101   : > { %v601_v29 = vpop.permute.xlu1 %600  ;;  %v599_v30 = vpop.permute.xlu0 %598 }
 0x102   : > { %670 = vst.msk [vmem:[#allocation2 + $0xd8] sm:$0xff] %vm642_vm2, %v601_v29  ;;  %669 = vst.msk [vmem:[#allocation2 + $0xd0] sm:$0xff] %vm642_vm2, %v599_v30 }
 0x103   : > { %975 = vrot.lane.b32.xlu1 %v5587_v50, %s5257_s13  ;;  %973 = vrot.lane.b32.xlu0 %v5590_v51, %s5257_s13  ;;  %v7819_v50 = vld [vmem:[#allocation8_spill] sm:$0xff]  ;;  %v7820_v51 = vld [vmem:[#allocation9_spill] sm:$0xff] }
 0x105   : > { %v605_v42 = vpop.permute.xlu1 %604  ;;  %v603_v43 = vpop.permute.xlu0 %602 }
 0x106   : > { %672 = vst.msk [vmem:[#allocation2 + $0xe8] sm:$0xff] %vm642_vm2, %v605_v42  ;;  %671 = vst.msk [vmem:[#allocation2 + $0xe0] sm:$0xff] %vm642_vm2, %v603_v43 }
 0x107   : > { %979 = vrot.lane.b32.xlu1 %v5611_v54, %s5257_s13  ;;  %977 = vrot.lane.b32.xlu0 %v5614_v55, %s5257_s13  ;;  %v7821_v55 = vld [vmem:[#allocation10_spill] sm:$0xff] }
 0x109   : > { %v609_v46 = vpop.permute.xlu1 %608  ;;  %v607_v47 = vpop.permute.xlu0 %606 }
 0x10a   : > { %674 = vst.msk [vmem:[#allocation2 + $0xf8] sm:$0xff] %vm642_vm2, %v609_v46  ;;  %673 = vst.msk [vmem:[#allocation2 + $0xf0] sm:$0xff] %vm642_vm2, %v607_v47  ;;  %v5169_v46 = vld [vmem:[%s7772_s1 + $0x10] ss:$0 sps:$4 sm:$0x33]  }
 0x10b   : > { %983 = vrot.lane.b32.xlu1 %v7819_v50, %s5257_s13  ;;  %981 = vrot.lane.b32.xlu0 %v7820_v51, %s5257_s13  ;;  %v1961_v47 = vsel %vm1959_vm4, %v5169_v46, 0 }
 0x10c   : > { %5115 = vmatprep.subr.msk.bf16.mxu0 %vm1959_vm4, %v5169_v46 }
 0x10d   : > { %v743_v62 = vpop.permute.xlu1 %742  ;;  %v741_v54 = vpop.permute.xlu0 %740  ;;  %5040 = vmatpush3.bf16.msra.mxu0 %v1961_v47  ;;  %v4681_v47 = vld [vmem:[%s5350_s9 + $0xc2] sm:$0xff] }
 0x10e   : > { %838 = vst.msk [vmem:[#allocation2 + $0x8] sm:$0xff] %vm836_vm3, %v743_v62  ;;  %837 = vst.msk [vmem:[#allocation2] sm:$0xff] %vm836_vm3, %v741_v54  ;;  %v4733_v62 = vld [vmem:[%s5350_s9 + $0x49] sm:$0xff] }
 0x10f   : > { %987 = vrot.lane.b32.xlu1 %v7821_v55, %s5257_s13  ;;  %985 = vrot.lane.b32.xlu0 %v7822_v63, %s5257_s13  ;;  %v5171_v63 = vld [vmem:[%s7772_s1] sm:$0xff]  }
 0x111   : > { %v747_v3 = vpop.permute.xlu1 %746  ;;  %v745_v13 = vpop.permute.xlu0 %744 }
 0x112   : > { %840 = vst.msk [vmem:[#allocation2 + $0x18] sm:$0xff] %vm836_vm3, %v747_v3  ;;  %839 = vst.msk [vmem:[#allocation2 + $0x10] sm:$0xff] %vm836_vm3, %v745_v13 }
 0x113   : > { %991 = vrot.lane.b32.xlu1 %v7823_v61, %s5257_s13  ;;  %989 = vrot.lane.b32.xlu0 %v7824_v1, %s5257_s13 }
 0x115   : > { %v751_v45 = vpop.permute.xlu1 %750  ;;  %v749_v59 = vpop.permute.xlu0 %748 }
 0x116   : > { %842 = vst.msk [vmem:[#allocation2 + $0x28] sm:$0xff] %vm836_vm3, %v751_v45  ;;  %841 = vst.msk [vmem:[#allocation2 + $0x20] sm:$0xff] %vm836_vm3, %v749_v59 }
 0x117   : > { %995 = vrot.lane.b32.xlu1 %v4666_v58, %s5257_s13  ;;  %993 = vrot.lane.b32.xlu0 %v4665_v44, %s5257_s13  ;;  %s5196_s13 = sshll.u32 %s5265_s12, 4  ;;  %s5197_s13 = int_to_ptr.vmem [resolvable:$false] %s5196_s13 }
 0x119   : > { %v755_v48 = vpop.permute.xlu1 %754  ;;  %v753_v49 = vpop.permute.xlu0 %752 }
 0x11a   : > { %844 = vst.msk [vmem:[#allocation2 + $0x38] sm:$0xff] %vm836_vm3, %v755_v48  ;;  %843 = vst.msk [vmem:[#allocation2 + $0x30] sm:$0xff] %vm836_vm3, %v753_v49  ;;  %v4736_v48 = vld [vmem:[%s5350_s9 + $0x69] sm:$0xff] }
 0x11b   : > { %1128 = vrot.lane.b32.xlu1 %v7825_v60, %s5258_s14  ;;  %1126 = vrot.lane.b32.xlu0 %v7826_v17, %s5258_s14  ;;  %v4738_v60 = vld [vmem:[%s5350_s9 + $0x81] sm:$0xff] }
 0x11d   : > { %v759_v52 = vpop.permute.xlu1 %758  ;;  %v757_v53 = vpop.permute.xlu0 %756 }
 0x11e   : > { %846 = vst.msk [vmem:[#allocation2 + $0x48] sm:$0xff] %vm836_vm3, %v759_v52  ;;  %845 = vst.msk [vmem:[#allocation2 + $0x40] sm:$0xff] %vm836_vm3, %v757_v53  ;;  %v4768_v52 = vld [vmem:[%s5350_s9 + $0x6a] sm:$0xff]  ;;  %v4767_v53 = vld [vmem:[%s5350_s9 + $0x62] sm:$0xff] }
 0x11f   : > { %1132 = vrot.lane.b32.xlu1 %v7827_v56, %s5258_s14  ;;  %1130 = vrot.lane.b32.xlu0 %v7828_v57, %s5258_s14 }
 0x121   : > { %v763_v12 = vpop.permute.xlu1 %762  ;;  %v761_v16 = vpop.permute.xlu0 %760 }
 0x122   : > { %848 = vst.msk [vmem:[#allocation2 + $0x58] sm:$0xff] %vm836_vm3, %v763_v12  ;;  %847 = vst.msk [vmem:[#allocation2 + $0x50] sm:$0xff] %vm836_vm3, %v761_v16  ;;  %v4770_v12 = vld [vmem:[%s5350_s9 + $0x82] sm:$0xff]  ;;  %v4769_v16 = vld [vmem:[%s5350_s9 + $0x7a] sm:$0xff] }
 0x123   : > { %1136 = vrot.lane.b32.xlu1 %v7829_v0, %s5258_s14  ;;  %1134 = vrot.lane.b32.xlu0 %v7830_v2, %s5258_s14 }
 0x125   : > { %v767_v4 = vpop.permute.xlu1 %766  ;;  %v765_v5 = vpop.permute.xlu0 %764 }
 0x126   : > { %850 = vst.msk [vmem:[#allocation2 + $0x68] sm:$0xff] %vm836_vm3, %v767_v4  ;;  %849 = vst.msk [vmem:[#allocation2 + $0x60] sm:$0xff] %vm836_vm3, %v765_v5 }
 0x127   : > { %1140 = vrot.lane.b32.xlu1 %v7831_v6, %s5258_s14  ;;  %1138 = vrot.lane.b32.xlu0 %v7832_v7, %s5258_s14 }
 0x129   : > { %v771_v8 = vpop.permute.xlu1 %770  ;;  %v769_v9 = vpop.permute.xlu0 %768 }
 0x12a   : > { %852 = vst.msk [vmem:[#allocation2 + $0x78] sm:$0xff] %vm836_vm3, %v771_v8  ;;  %851 = vst.msk [vmem:[#allocation2 + $0x70] sm:$0xff] %vm836_vm3, %v769_v9  ;;  %v4740_v8 = vld [vmem:[%s5350_s9 + $0x99] sm:$0xff] }
 0x12b   : > { %1144 = vrot.lane.b32.xlu1 %v7833_v10, %s5258_s14  ;;  %1142 = vrot.lane.b32.xlu0 %v7834_v11, %s5258_s14 }
 0x12d   : > { %v775_v14 = vpop.permute.xlu1 %774  ;;  %v773_v15 = vpop.permute.xlu0 %772 }
 0x12e   : > { %854 = vst.msk [vmem:[#allocation2 + $0x88] sm:$0xff] %vm836_vm3, %v775_v14  ;;  %853 = vst.msk [vmem:[#allocation2 + $0x80] sm:$0xff] %vm836_vm3, %v773_v15  ;;  %v4772_v14 = vld [vmem:[%s5350_s9 + $0x9a] sm:$0xff]  ;;  %v4771_v15 = vld [vmem:[%s5350_s9 + $0x92] sm:$0xff] }
 0x12f   : > { %1148 = vrot.lane.b32.xlu1 %v7835_v18, %s5258_s14  ;;  %1146 = vrot.lane.b32.xlu0 %v7836_v21, %s5258_s14 }
 0x131   : > { %v779_v29 = vpop.permute.xlu1 %778  ;;  %v777_v30 = vpop.permute.xlu0 %776 }
 0x132   : > { %856 = vst.msk [vmem:[#allocation2 + $0x98] sm:$0xff] %vm836_vm3, %v779_v29  ;;  %855 = vst.msk [vmem:[#allocation2 + $0x90] sm:$0xff] %vm836_vm3, %v777_v30  ;;  %v4774_v29 = vld [vmem:[%s5350_s9 + $0xb2] sm:$0xff]  ;;  %v4773_v30 = vld [vmem:[%s5350_s9 + $0xaa] sm:$0xff] }
 0x133   : > { %1322 = vrot.lane.b32.xlu1 %v5430_v19, %s5259_s15  ;;  %1320 = vrot.lane.b32.xlu0 %v5433_v20, %s5259_s15  ;;  %v4732_v19 = vld [vmem:[%s5350_s9 + $0x39] sm:$0xff]  ;;  %v4731_v20 = vld [vmem:[%s5350_s9 + $0x31] sm:$0xff] }
 0x135   : > { %v783_v42 = vpop.permute.xlu1 %782  ;;  %v781_v43 = vpop.permute.xlu0 %780 }
 0x136   : > { %858 = vst.msk [vmem:[#allocation2 + $0xa8] sm:$0xff] %vm836_vm3, %v783_v42  ;;  %857 = vst.msk [vmem:[#allocation2 + $0xa0] sm:$0xff] %vm836_vm3, %v781_v43 }
 0x137   : > { %1326 = vrot.lane.b32.xlu1 %v5447_v22, %s5259_s15  ;;  %1324 = vrot.lane.b32.xlu0 %v5452_v23, %s5259_s15  ;;  %v5170_v22 = vld [vmem:[%s7772_s1 + $0x8] sm:$0xff]   ;;  %v4734_v23 = vld [vmem:[%s5350_s9 + $0x51] sm:$0xff] }
 0x138   : > { %5041 = vmatprep.subr.bf16.mxu0 %v5170_v22 }
 0x139   : > { %v787_v50 = vpop.permute.xlu1 %786  ;;  %v785_v51 = vpop.permute.xlu0 %784  ;;  %5042 = vmatpush3.bf16.msra.mxu0 %v5170_v22 }
 0x13a   : > { %860 = vst.msk [vmem:[#allocation2 + $0xb8] sm:$0xff] %vm836_vm3, %v787_v50  ;;  %859 = vst.msk [vmem:[#allocation2 + $0xb0] sm:$0xff] %vm836_vm3, %v785_v51  ;;  %5043 = vmatprep.subr.bf16.mxu0 %v5171_v63 }
 0x13b   : > { %1515 = vrot.lane.b32.xlu1 %v4732_v19, %s5260_s26  ;;  %1513 = vrot.lane.b32.xlu0 %v4731_v20, %s5260_s26  ;;  %v4682_v20 = vld [vmem:[%s5350_s9 + $0xca] sm:$0xff] }
 0x13d   : > { %v791_v54 = vpop.permute.xlu1 %790  ;;  %v789_v55 = vpop.permute.xlu0 %788  ;;  %5044 = vmatpush3.bf16.msra.mxu0 %v5171_v63  ;;  %v4743_v63 = vld [vmem:[%s5350_s9 + $0xc1] sm:$0xff] }
 0x13e   : > { %862 = vst.msk [vmem:[#allocation2 + $0xc8] sm:$0xff] %vm836_vm3, %v791_v54  ;;  %861 = vst.msk [vmem:[#allocation2 + $0xc0] sm:$0xff] %vm836_vm3, %v789_v55  ;;  %v4744_v55 = vld [vmem:[%s5350_s9 + $0xc9] sm:$0xff] }
 0x13f   : > { %1519 = vrot.lane.b32.xlu1 %v4734_v23, %s5260_s26  ;;  %1517 = vrot.lane.b32.xlu0 %v4733_v62, %s5260_s26 }
 0x141   : > { %v795_v3 = vpop.permute.xlu1 %794  ;;  %v793_v13 = vpop.permute.xlu0 %792 }
 0x142   : > { %864 = vst.msk [vmem:[#allocation2 + $0xd8] sm:$0xff] %vm836_vm3, %v795_v3  ;;  %863 = vst.msk [vmem:[#allocation2 + $0xd0] sm:$0xff] %vm836_vm3, %v793_v13 }
 0x143   : > { %1708 = vrot.lane.b32.xlu1 %v7827_v56, %s5261_s7  ;;  %1706 = vrot.lane.b32.xlu0 %v7828_v57, %s5261_s7 }
 0x145   : > { %v799_v61 = vpop.permute.xlu1 %798  ;;  %v797_v1 = vpop.permute.xlu0 %796 }
 0x146   : > { %866 = vst.msk [vmem:[#allocation2 + $0xe8] sm:$0xff] %vm836_vm3, %v799_v61  ;;  %865 = vst.msk [vmem:[#allocation2 + $0xe0] sm:$0xff] %vm836_vm3, %v797_v1 }
 0x147   : > { %1712 = vrot.lane.b32.xlu1 %v7829_v0, %s5261_s7  ;;  %1710 = vrot.lane.b32.xlu0 %v7830_v2, %s5261_s7 }
 0x149   : > { %v803_v58 = vpop.permute.xlu1 %802  ;;  %v801_v44 = vpop.permute.xlu0 %800 }
 0x14a   : > { %868 = vst.msk [vmem:[#allocation2 + $0xf8] sm:$0xff] %vm836_vm3, %v803_v58  ;;  %867 = vst.msk [vmem:[#allocation2 + $0xf0] sm:$0xff] %vm836_vm3, %v801_v44  ;;  %v4778_v58 = vld [vmem:[%s5350_s9 + $0xe2] sm:$0xff]  ;;  %v4777_v44 = vld [vmem:[%s5350_s9 + $0xda] sm:$0xff] }
 0x14b   : > { %1330 = vrot.lane.b32.xlu1 %v5455_v24, %s5259_s15  ;;  %1328 = vrot.lane.b32.xlu0 %v5458_v25, %s5259_s15  ;;  %v4735_v24 = vld [vmem:[%s5350_s9 + $0x61] sm:$0xff] }
 0x14d   : > { %v936_v45 = vpop.permute.xlu1 %935  ;;  %v934_v59 = vpop.permute.xlu0 %933 }
 0x14e   : > { %1031 = vst.msk [vmem:[#allocation2 + $0x8] sm:$0xff] %vm1029_vm5, %v936_v45  ;;  %1030 = vst.msk [vmem:[#allocation2] sm:$0xff] %vm1029_vm5, %v934_v59 }
 0x14f   : > { %1334 = vrot.lane.b32.xlu1 %v5467_v26, %s5259_s15  ;;  %1332 = vrot.lane.b32.xlu0 %v5470_v27, %s5259_s15  ;;  %v4737_v26 = vld [vmem:[%s5350_s9 + $0x79] sm:$0xff] }
 0x151   : > { %v940_v25 = vpop.permute.xlu1 %939  ;;  %v938_v49 = vpop.permute.xlu0 %937 }
 0x152   : > { %1033 = vst.msk [vmem:[#allocation2 + $0x18] sm:$0xff] %vm1029_vm5, %v940_v25  ;;  %1032 = vst.msk [vmem:[#allocation2 + $0x10] sm:$0xff] %vm1029_vm5, %v938_v49  ;;  %v4686_v25 = vld [vmem:[%s5350_s9 + $0xfa] sm:$0xff]  ;;  %v4685_v49 = vld [vmem:[%s5350_s9 + $0xf2] sm:$0xff] }
 0x153   : > { %1523 = vrot.lane.b32.xlu1 %v4736_v48, %s5260_s26  ;;  %1521 = vrot.lane.b32.xlu0 %v4735_v24, %s5260_s26 }
 0x155   : > { %v944_v17 = vpop.permute.xlu1 %943  ;;  %v942_v27 = vpop.permute.xlu0 %941 }
 0x156   : > { %1035 = vst.msk [vmem:[#allocation2 + $0x28] sm:$0xff] %vm1029_vm5, %v944_v17  ;;  %1034 = vst.msk [vmem:[#allocation2 + $0x20] sm:$0xff] %vm1029_vm5, %v942_v27 }
 0x157   : > { %1527 = vrot.lane.b32.xlu1 %v4738_v60, %s5260_s26  ;;  %1525 = vrot.lane.b32.xlu0 %v4737_v26, %s5260_s26 }
 0x159   : > { %v948_v56 = vpop.permute.xlu1 %947  ;;  %v946_v57 = vpop.permute.xlu0 %945 }
 0x15a   : > { %1037 = vst.msk [vmem:[#allocation2 + $0x38] sm:$0xff] %vm1029_vm5, %v948_v56  ;;  %1036 = vst.msk [vmem:[#allocation2 + $0x30] sm:$0xff] %vm1029_vm5, %v946_v57  ;;  %v4748_v56 = vld [vmem:[%s5350_s9 + $0xf9] sm:$0xff] }
 0x15b   : > { %1716 = vrot.lane.b32.xlu1 %v4768_v52, %s5261_s7  ;;  %1714 = vrot.lane.b32.xlu0 %v4767_v53, %s5261_s7 }
 0x15d   : > { %v952_v0 = vpop.permute.xlu1 %951  ;;  %v950_v2 = vpop.permute.xlu0 %949 }
 0x15e   : > { %1039 = vst.msk [vmem:[#allocation2 + $0x48] sm:$0xff] %vm1029_vm5, %v952_v0  ;;  %1038 = vst.msk [vmem:[#allocation2 + $0x40] sm:$0xff] %vm1029_vm5, %v950_v2 }
 0x15f   : > { %1720 = vrot.lane.b32.xlu1 %v4770_v12, %s5261_s7  ;;  %1718 = vrot.lane.b32.xlu0 %v4769_v16, %s5261_s7 }
 0x161   : > { %v956_v4 = vpop.permute.xlu1 %955  ;;  %v954_v5 = vpop.permute.xlu0 %953 }
 0x162   : > { %1041 = vst.msk [vmem:[#allocation2 + $0x58] sm:$0xff] %vm1029_vm5, %v956_v4  ;;  %1040 = vst.msk [vmem:[#allocation2 + $0x50] sm:$0xff] %vm1029_vm5, %v954_v5  ;;  %v4782_v4 = vld [vmem:[%s5350_s9 + $0x112] sm:$0xff]  ;;  %v4781_v5 = vld [vmem:[%s5350_s9 + $0x10a] sm:$0xff] }
 0x163   : > { %1338 = vrot.lane.b32.xlu1 %v5473_v28, %s5259_s15  ;;  %1336 = vrot.lane.b32.xlu0 %v5488_v31, %s5259_s15  ;;  %v4739_v28 = vld [vmem:[%s5350_s9 + $0x91] sm:$0xff] }
 0x164   : > { %v4742_v31 = vld [vmem:[%s5350_s9 + $0xb1] sm:$0xff] }
 0x165   : > { %v960_v6 = vpop.permute.xlu1 %959  ;;  %v958_v7 = vpop.permute.xlu0 %957 }
 0x166   : > { %1043 = vst.msk [vmem:[#allocation2 + $0x68] sm:$0xff] %vm1029_vm5, %v960_v6  ;;  %1042 = vst.msk [vmem:[#allocation2 + $0x60] sm:$0xff] %vm1029_vm5, %v958_v7 }
 0x167   : > { %1342 = vrot.lane.b32.xlu1 %v5491_v32, %s5259_s15  ;;  %1340 = vrot.lane.b32.xlu0 %v5494_v33, %s5259_s15  ;;  %v4741_v32 = vld [vmem:[%s5350_s9 + $0xa9] sm:$0xff] }
 0x169   : > { %v964_v9 = vpop.permute.xlu1 %963  ;;  %v962_v10 = vpop.permute.xlu0 %961 }
 0x16a   : > { %1045 = vst.msk [vmem:[#allocation2 + $0x78] sm:$0xff] %vm1029_vm5, %v964_v9  ;;  %1044 = vst.msk [vmem:[#allocation2 + $0x70] sm:$0xff] %vm1029_vm5, %v962_v10  ;;  %v4690_v9 = vld [vmem:[%s5350_s9 + $0x12a] sm:$0xff]  ;;  %v4689_v10 = vld [vmem:[%s5350_s9 + $0x122] sm:$0xff] }
 0x16b   : > { %1531 = vrot.lane.b32.xlu1 %v4740_v8, %s5260_s26  ;;  %1529 = vrot.lane.b32.xlu0 %v4739_v28, %s5260_s26 }
 0x16d   : > { %v968_v11 = vpop.permute.xlu1 %967  ;;  %v966_v33 = vpop.permute.xlu0 %965 }
 0x16e   : > { %1047 = vst.msk [vmem:[#allocation2 + $0x88] sm:$0xff] %vm1029_vm5, %v968_v11  ;;  %1046 = vst.msk [vmem:[#allocation2 + $0x80] sm:$0xff] %vm1029_vm5, %v966_v33 }
 0x16f   : > { %1535 = vrot.lane.b32.xlu1 %v4742_v31, %s5260_s26  ;;  %1533 = vrot.lane.b32.xlu0 %v4741_v32, %s5260_s26 }
 0x171   : > { %v972_v18 = vpop.permute.xlu1 %971  ;;  %v970_v21 = vpop.permute.xlu0 %969 }
 0x172   : > { %1049 = vst.msk [vmem:[#allocation2 + $0x98] sm:$0xff] %vm1029_vm5, %v972_v18  ;;  %1048 = vst.msk [vmem:[#allocation2 + $0x90] sm:$0xff] %vm1029_vm5, %v970_v21  ;;  %v4719_v18 = vld [vmem:[%s5350_s9 + $0x120] sm:$0xff] }
 0x173   : > { %1724 = vrot.lane.b32.xlu1 %v4772_v14, %s5261_s7  ;;  %1722 = vrot.lane.b32.xlu0 %v4771_v15, %s5261_s7  ;;  %v4720_v15 = vld [vmem:[%s5350_s9 + $0x128] sm:$0xff] }
 0x175   : > { %v976_v42 = vpop.permute.xlu1 %975  ;;  %v974_v43 = vpop.permute.xlu0 %973 }
 0x176   : > { %1051 = vst.msk [vmem:[#allocation2 + $0xa8] sm:$0xff] %vm1029_vm5, %v976_v42  ;;  %1050 = vst.msk [vmem:[#allocation2 + $0xa0] sm:$0xff] %vm1029_vm5, %v974_v43 }
 0x177   : > { %1728 = vrot.lane.b32.xlu1 %v4774_v29, %s5261_s7  ;;  %1726 = vrot.lane.b32.xlu0 %v4773_v30, %s5261_s7 }
 0x179   : > { %v980_v46 = vpop.permute.xlu1 %979  ;;  %v978_v19 = vpop.permute.xlu0 %977 }
 0x17a   : > { %1053 = vst.msk [vmem:[#allocation2 + $0xb8] sm:$0xff] %vm1029_vm5, %v980_v46  ;;  %1052 = vst.msk [vmem:[#allocation2 + $0xb0] sm:$0xff] %vm1029_vm5, %v978_v19  ;;  %v4722_v46 = vld [vmem:[%s5350_s9 + $0x140] sm:$0xff]  ;;  %v4721_v19 = vld [vmem:[%s5350_s9 + $0x138] sm:$0xff] }
 0x17b   : > { %1152 = vrot.lane.b32.xlu1 %v4774_v29, %s5258_s14  ;;  %1150 = vrot.lane.b32.xlu0 %v4773_v30, %s5258_s14 }
 0x17d   : > { %v984_v50 = vpop.permute.xlu1 %983  ;;  %v982_v51 = vpop.permute.xlu0 %981 }
 0x17e   : > { %1055 = vst.msk [vmem:[#allocation2 + $0xc8] sm:$0xff] %vm1029_vm5, %v984_v50  ;;  %1054 = vst.msk [vmem:[#allocation2 + $0xc0] sm:$0xff] %vm1029_vm5, %v982_v51  ;;  %v4752_v50 = vld [vmem:[%s5350_s9 + $0x129] sm:$0xff]  ;;  %v4751_v51 = vld [vmem:[%s5350_s9 + $0x121] sm:$0xff] }
 0x17f   : > { %1156 = vrot.lane.b32.xlu1 %v4682_v20, %s5258_s14  ;;  %1154 = vrot.lane.b32.xlu0 %v4681_v47, %s5258_s14 }
 0x181   : > { %v988_v22 = vpop.permute.xlu1 %987  ;;  %v986_v23 = vpop.permute.xlu0 %985 }
 0x182   : > { %1057 = vst.msk [vmem:[#allocation2 + $0xd8] sm:$0xff] %vm1029_vm5, %v988_v22  ;;  %1056 = vst.msk [vmem:[#allocation2 + $0xd0] sm:$0xff] %vm1029_vm5, %v986_v23 }
 0x183   : > { %1346 = vrot.lane.b32.xlu1 %v5507_v34, %s5259_s15  ;;  %1344 = vrot.lane.b32.xlu0 %v5510_v35, %s5259_s15  ;;  %v4746_v35 = vld [vmem:[%s5350_s9 + $0xe1] sm:$0xff] }
 0x185   : > { %v992_v62 = vpop.permute.xlu1 %991  ;;  %v990_v54 = vpop.permute.xlu0 %989 }
 0x186   : > { %1059 = vst.msk [vmem:[#allocation2 + $0xe8] sm:$0xff] %vm1029_vm5, %v992_v62  ;;  %1058 = vst.msk [vmem:[#allocation2 + $0xe0] sm:$0xff] %vm1029_vm5, %v990_v54  ;;  %v4754_v62 = vld [vmem:[%s5350_s9 + $0x141] sm:$0xff]  ;;  %v4753_v54 = vld [vmem:[%s5350_s9 + $0x139] sm:$0xff] }
 0x187   : > { %1350 = vrot.lane.b32.xlu1 %v5517_v36, %s5259_s15  ;;  %1348 = vrot.lane.b32.xlu0 %v5520_v37, %s5259_s15  ;;  %v4745_v36 = vld [vmem:[%s5350_s9 + $0xd9] sm:$0xff] }
 0x189   : > { %v996_v34 = vpop.permute.xlu1 %995  ;;  %v994_v3 = vpop.permute.xlu0 %993 }
 0x18a   : > { %1061 = vst.msk [vmem:[#allocation2 + $0xf8] sm:$0xff] %vm1029_vm5, %v996_v34  ;;  %1060 = vst.msk [vmem:[#allocation2 + $0xf0] sm:$0xff] %vm1029_vm5, %v994_v3 }
 0x18b   : > { %1539 = vrot.lane.b32.xlu1 %v4744_v55, %s5260_s26  ;;  %1537 = vrot.lane.b32.xlu0 %v4743_v63, %s5260_s26 }
 0x18d   : > { %v1129_v13 = vpop.permute.xlu1 %1128  ;;  %v1127_v61 = vpop.permute.xlu0 %1126 }
 0x18e   : > { %1224 = vst.msk [vmem:[#allocation2 + $0x8] sm:$0xff] %vm1222_vm6, %v1129_v13  ;;  %1223 = vst.msk [vmem:[#allocation2] sm:$0xff] %vm1222_vm6, %v1127_v61 }
 0x18f   : > { %1543 = vrot.lane.b32.xlu1 %v4746_v35, %s5260_s26  ;;  %1541 = vrot.lane.b32.xlu0 %v4745_v36, %s5260_s26  ;;  %v4786_v35 = vld [vmem:[%s5350_s9 + $0x142] sm:$0xff]  ;;  %v4785_v36 = vld [vmem:[%s5350_s9 + $0x13a] sm:$0xff] }
 0x191   : > { %v1133_v37 = vpop.permute.xlu1 %1132  ;;  %v1131_v1 = vpop.permute.xlu0 %1130 }
 0x192   : > { %1226 = vst.msk [vmem:[#allocation2 + $0x18] sm:$0xff] %vm1222_vm6, %v1133_v37  ;;  %1225 = vst.msk [vmem:[#allocation2 + $0x10] sm:$0xff] %vm1222_vm6, %v1131_v1 }
 0x193   : > { %1732 = vrot.lane.b32.xlu1 %v4682_v20, %s5261_s7  ;;  %1730 = vrot.lane.b32.xlu0 %v4681_v47, %s5261_s7 }
 0x195   : > { %v1137_v45 = vpop.permute.xlu1 %1136  ;;  %v1135_v59 = vpop.permute.xlu0 %1134 }
 0x196   : > { %1228 = vst.msk [vmem:[#allocation2 + $0x28] sm:$0xff] %vm1222_vm6, %v1137_v45  ;;  %1227 = vst.msk [vmem:[#allocation2 + $0x20] sm:$0xff] %vm1222_vm6, %v1135_v59 }
 0x197   : > { %1736 = vrot.lane.b32.xlu1 %v4778_v58, %s5261_s7  ;;  %1734 = vrot.lane.b32.xlu0 %v4777_v44, %s5261_s7 }
 0x199   : > { %v1141_v48 = vpop.permute.xlu1 %1140  ;;  %v1139_v24 = vpop.permute.xlu0 %1138 }
 0x19a   : > { %1230 = vst.msk [vmem:[#allocation2 + $0x38] sm:$0xff] %vm1222_vm6, %v1141_v48  ;;  %1229 = vst.msk [vmem:[#allocation2 + $0x30] sm:$0xff] %vm1222_vm6, %v1139_v24 }
 0x19b   : > { %1160 = vrot.lane.b32.xlu1 %v4778_v58, %s5258_s14  ;;  %1158 = vrot.lane.b32.xlu0 %v4777_v44, %s5258_s14 }
 0x19d   : > { %v1145_v60 = vpop.permute.xlu1 %1144  ;;  %v1143_v26 = vpop.permute.xlu0 %1142 }
 0x19e   : > { %1232 = vst.msk [vmem:[#allocation2 + $0x48] sm:$0xff] %vm1222_vm6, %v1145_v60  ;;  %1231 = vst.msk [vmem:[#allocation2 + $0x40] sm:$0xff] %vm1222_vm6, %v1143_v26 }
 0x19f   : > { %1164 = vrot.lane.b32.xlu1 %v4686_v25, %s5258_s14  ;;  %1162 = vrot.lane.b32.xlu0 %v4685_v49, %s5258_s14 }
 0x1a1   : > { %v1149_v17 = vpop.permute.xlu1 %1148  ;;  %v1147_v27 = vpop.permute.xlu0 %1146 }
 0x1a2   : > { %1234 = vst.msk [vmem:[#allocation2 + $0x58] sm:$0xff] %vm1222_vm6, %v1149_v17  ;;  %1233 = vst.msk [vmem:[#allocation2 + $0x50] sm:$0xff] %vm1222_vm6, %v1147_v27  ;;  %v4723_v17 = vld [vmem:[%s5350_s9 + $0x150] sm:$0xff]  ;;  %v4724_v27 = vld [vmem:[%s5350_s9 + $0x158] sm:$0xff] }
 0x1a3   : > { %1354 = vrot.lane.b32.xlu1 %v5523_v38, %s5259_s15  ;;  %1352 = vrot.lane.b32.xlu0 %v5532_v39, %s5259_s15  ;;  %v4747_v38 = vld [vmem:[%s5350_s9 + $0xf1] sm:$0xff] }
 0x1a4   : > { %v4750_v39 = vld [vmem:[%s5350_s9 + $0x111] sm:$0xff] }
 0x1a5   : > { %v1323_v52 = vpop.permute.xlu1 %1322  ;;  %v1321_v53 = vpop.permute.xlu0 %1320 }
 0x1a6   : > { %1418 = vst.msk [vmem:[#allocation2 + $0x8] sm:$0xff] %vm1416_vm7, %v1323_v52  ;;  %1417 = vst.msk [vmem:[#allocation2] sm:$0xff] %vm1416_vm7, %v1321_v53 }
 0x1a7   : > { %1358 = vrot.lane.b32.xlu1 %v5535_v40, %s5259_s15  ;;  %1356 = vrot.lane.b32.xlu0 %v5538_v41, %s5259_s15  ;;  %v4749_v40 = vld [vmem:[%s5350_s9 + $0x109] sm:$0xff] }
 0x1a9   : > { %v1327_v57 = vpop.permute.xlu1 %1326  ;;  %v1325_v12 = vpop.permute.xlu0 %1324 }
 0x1aa   : > { %1420 = vst.msk [vmem:[#allocation2 + $0x18] sm:$0xff] %vm1416_vm7, %v1327_v57  ;;  %1419 = vst.msk [vmem:[#allocation2 + $0x10] sm:$0xff] %vm1416_vm7, %v1325_v12 }
 0x1ab   : > { %1547 = vrot.lane.b32.xlu1 %v4748_v56, %s5260_s26  ;;  %1545 = vrot.lane.b32.xlu0 %v4747_v38, %s5260_s26  ;;  %v4725_v56 = vld [vmem:[%s5350_s9 + $0x168] sm:$0xff]  ;;  %v4726_v38 = vld [vmem:[%s5350_s9 + $0x170] sm:$0xff] }
 0x1ad   : > { %v1516_v16 = vpop.permute.xlu1 %1515  ;;  %v1514_v0 = vpop.permute.xlu0 %1513 }
 0x1ae   : > { %1611 = vst.msk [vmem:[#allocation2 + $0x8] sm:$0xff] %vm1609_vm8, %v1516_v16  ;;  %1610 = vst.msk [vmem:[#allocation2] sm:$0xff] %vm1609_vm8, %v1514_v0 }
 0x1af   : > { %1551 = vrot.lane.b32.xlu1 %v4750_v39, %s5260_s26  ;;  %1549 = vrot.lane.b32.xlu0 %v4749_v40, %s5260_s26  ;;  %v4755_v39 = vld [vmem:[%s5350_s9 + $0x151] sm:$0xff]  ;;  %v4756_v40 = vld [vmem:[%s5350_s9 + $0x159] sm:$0xff] }
 0x1b1   : > { %v1520_v41 = vpop.permute.xlu1 %1519  ;;  %v1518_v2 = vpop.permute.xlu0 %1517 }
 0x1b2   : > { %1613 = vst.msk [vmem:[#allocation2 + $0x18] sm:$0xff] %vm1609_vm8, %v1520_v41  ;;  %1612 = vst.msk [vmem:[#allocation2 + $0x10] sm:$0xff] %vm1609_vm8, %v1518_v2  ;;  %v4757_v41 = vld [vmem:[%s5350_s9 + $0x169] sm:$0xff]  ;;  %v4758_v2 = vld [vmem:[%s5350_s9 + $0x171] sm:$0xff] }
 0x1b3   : > { %1740 = vrot.lane.b32.xlu1 %v4686_v25, %s5261_s7  ;;  %1738 = vrot.lane.b32.xlu0 %v4685_v49, %s5261_s7  ;;  %v4693_v25 = vld [vmem:[%s5350_s9 + $0x152] sm:$0xff]  ;;  %v4694_v49 = vld [vmem:[%s5350_s9 + $0x15a] sm:$0xff] }
 0x1b5   : > { %v1709_v6 = vpop.permute.xlu1 %1708  ;;  %v1707_v7 = vpop.permute.xlu0 %1706 }
 0x1b6   : > { %1804 = vst.msk [vmem:[#allocation2 + $0x8] sm:$0xff] %vm1802_vm9, %v1709_v6  ;;  %1803 = vst.msk [vmem:[#allocation2] sm:$0xff] %vm1802_vm9, %v1707_v7 }
 0x1b7   : > { %1744 = vrot.lane.b32.xlu1 %v4782_v4, %s5261_s7  ;;  %1742 = vrot.lane.b32.xlu0 %v4781_v5, %s5261_s7 }
 0x1b9   : > { %v1713_v8 = vpop.permute.xlu1 %1712  ;;  %v1711_v28 = vpop.permute.xlu0 %1710 }
 0x1ba   : > { %1806 = vst.msk [vmem:[#allocation2 + $0x18] sm:$0xff] %vm1802_vm9, %v1713_v8  ;;  %1805 = vst.msk [vmem:[#allocation2 + $0x10] sm:$0xff] %vm1802_vm9, %v1711_v28 }
 0x1bb   : > { %1168 = vrot.lane.b32.xlu1 %v4782_v4, %s5258_s14  ;;  %1166 = vrot.lane.b32.xlu0 %v4781_v5, %s5258_s14 }
 0x1bd   : > { %v1331_v31 = vpop.permute.xlu1 %1330  ;;  %v1329_v32 = vpop.permute.xlu0 %1328  ;;  %v1835_v11 = vld [vmem:[#allocation2] sm:$0xff]  ;;  %v1836_v33 = vld [vmem:[#allocation2 + $0x8] sm:$0xff] }
 0x1be   : > { %1422 = vst.msk [vmem:[#allocation2 + $0x28] sm:$0xff] %vm1416_vm7, %v1331_v31  ;;  %1421 = vst.msk [vmem:[#allocation2 + $0x20] sm:$0xff] %vm1416_vm7, %v1329_v32  ;;  %v1867_v14 = vpack.c.bf16 %v1836_v33, %v1835_v11  ;;  %v4789_v11 = vld [vmem:[%s5350_s9 + $0x16a] sm:$0xff]  ;;  %v4790_v33 = vld [vmem:[%s5350_s9 + $0x172] sm:$0xff] }
 0x1bf   : > { %1172 = vrot.lane.b32.xlu1 %v4690_v9, %s5258_s14  ;;  %1170 = vrot.lane.b32.xlu0 %v4689_v10, %s5258_s14 }
 0x1c0   : > { %5045 = vmatprep.mubr.msk.bf16.mxu0 %vm1910_vm10, %v1867_v14 }
 0x1c1   : > { %v1335_v21 = vpop.permute.xlu1 %1334  ;;  %v1333_v29 = vpop.permute.xlu0 %1332  ;;  %v1837_v30 = vld [vmem:[#allocation2 + $0x10] sm:$0xff]  ;;  %v1838_v42 = vld [vmem:[#allocation2 + $0x18] sm:$0xff] }
 0x1c2   : > { %1424 = vst.msk [vmem:[#allocation2 + $0x38] sm:$0xff] %vm1416_vm7, %v1335_v21  ;;  %1423 = vst.msk [vmem:[#allocation2 + $0x30] sm:$0xff] %vm1416_vm7, %v1333_v29  ;;  %v1868_v43 = vpack.c.bf16 %v1838_v42, %v1837_v30  ;;  %v6300_v29 = vld [vmem:[%s5350_s9 + $0x182] sm:$0xff]  ;;  %v6303_v30 = vld [vmem:[%s5350_s9 + $0x18a] sm:$0xff] }
 0x1c3   : > { %1362 = vrot.lane.b32.xlu1 %v4720_v15, %s5259_s15  ;;  %1360 = vrot.lane.b32.xlu0 %v4719_v18, %s5259_s15 }
 0x1c4   : > { %5046 = vmatmul.mubr.msk.bf16.vlgmr.msra.gmra.mxu0 %vm1910_vm10, %v1868_v43 }
 0x1c5   : > { %v1524_v20 = vpop.permute.xlu1 %1523  ;;  %v1522_v47 = vpop.permute.xlu0 %1521 }
 0x1c6   : > { %1615 = vst.msk [vmem:[#allocation2 + $0x28] sm:$0xff] %vm1609_vm8, %v1524_v20  ;;  %1614 = vst.msk [vmem:[#allocation2 + $0x20] sm:$0xff] %vm1609_vm8, %v1522_v47 }
 0x1c7   : > { %1366 = vrot.lane.b32.xlu1 %v4722_v46, %s5259_s15  ;;  %1364 = vrot.lane.b32.xlu0 %v4721_v19, %s5259_s15  ;;  %v4727_v46 = vld [vmem:[%s5350_s9 + $0x180] sm:$0xff]  ;;  %v4728_v19 = vld [vmem:[%s5350_s9 + $0x188] sm:$0xff] }
 0x1c9   : > { %v1528_v22 = vpop.permute.xlu1 %1527  ;;  %v1526_v23 = vpop.permute.xlu0 %1525 }
 0x1ca   : > { %1617 = vst.msk [vmem:[#allocation2 + $0x38] sm:$0xff] %vm1609_vm8, %v1528_v22  ;;  %1616 = vst.msk [vmem:[#allocation2 + $0x30] sm:$0xff] %vm1609_vm8, %v1526_v23 }
 0x1cb   : > { %1555 = vrot.lane.b32.xlu1 %v4752_v50, %s5260_s26  ;;  %1553 = vrot.lane.b32.xlu0 %v4751_v51, %s5260_s26  ;;  %v4729_v50 = vld [vmem:[%s5350_s9 + $0x198] sm:$0xff]  ;;  %v4730_v51 = vld [vmem:[%s5350_s9 + $0x1a0] sm:$0xff] }
 0x1cd   : > { %v1717_v55 = vpop.permute.xlu1 %1716  ;;  %v1715_v63 = vpop.permute.xlu0 %1714 }
 0x1ce   : > { %1808 = vst.msk [vmem:[#allocation2 + $0x28] sm:$0xff] %vm1802_vm9, %v1717_v55  ;;  %1807 = vst.msk [vmem:[#allocation2 + $0x20] sm:$0xff] %vm1802_vm9, %v1715_v63  ;;  %v4760_v55 = vld [vmem:[%s5350_s9 + $0x189] sm:$0xff] }
 0x1cf   : > { %1559 = vrot.lane.b32.xlu1 %v4754_v62, %s5260_s26  ;;  %1557 = vrot.lane.b32.xlu0 %v4753_v54, %s5260_s26  ;;  %v5262_v62 = vmov 0.0   ;;  %v4759_v54 = vld [vmem:[%s5350_s9 + $0x181] sm:$0xff] }
 0x1d0   : > { %2164 = vst.msk [vmem:[#allocation3 + $0x30] sm:$0xff] %vm2156_vm11, %v5262_v62  ;;  %2165 = vst.msk [vmem:[#allocation3 + $0x38] sm:$0xff] %vm2156_vm11, %v5262_v62 }
 0x1d1   : > { %v1721_v34 = vpop.permute.xlu1 %1720  ;;  %v1719_v3 = vpop.permute.xlu0 %1718  ;;  %2157 = vst.msk [vmem:[#allocation3] sm:$0xff] %vm2156_vm11, %v5262_v62  ;;  %2158 = vst.msk [vmem:[#allocation3 + $0x8] sm:$0xff] %vm2156_vm11, %v5262_v62 }
 0x1d2   : > { %1810 = vst.msk [vmem:[#allocation2 + $0x38] sm:$0xff] %vm1802_vm9, %v1721_v34  ;;  %1809 = vst.msk [vmem:[#allocation2 + $0x30] sm:$0xff] %vm1802_vm9, %v1719_v3  ;;  %v4761_v3 = vld [vmem:[%s5350_s9 + $0x199] sm:$0xff] }
 0x1d3   : > { %1748 = vrot.lane.b32.xlu1 %v4690_v9, %s5261_s7  ;;  %1746 = vrot.lane.b32.xlu0 %v4689_v10, %s5261_s7  ;;  %2161 = vst.msk [vmem:[#allocation3 + $0x18] sm:$0xff] %vm2156_vm11, %v5262_v62  ;;  %2162 = vst.msk [vmem:[#allocation3 + $0x20] sm:$0xff] %vm2156_vm11, %v5262_v62 }
 0x1d4   : > { %2167 = vst.msk [vmem:[#allocation3 + $0x48] sm:$0xff] %vm2156_vm11, %v5262_v62  ;;  %2168 = vst.msk [vmem:[#allocation3 + $0x50] sm:$0xff] %vm2156_vm11, %v5262_v62 }
 0x1d5   : > { %v1339_v13 = vpop.permute.xlu1 %1338  ;;  %v1337_v61 = vpop.permute.xlu0 %1336  ;;  %v1839_v37 = vld [vmem:[#allocation2 + $0x20] sm:$0xff]  ;;  %v1840_v1 = vld [vmem:[#allocation2 + $0x28] sm:$0xff]  ;;  %2170 = vst.msk [vmem:[#allocation3 + $0x60] sm:$0xff] %vm2156_vm11, %v5262_v62  ;;  %2171 = vst.msk [vmem:[#allocation3 + $0x68] sm:$0xff] %vm2156_vm11, %v5262_v62 }
 0x1d6   : > { %1426 = vst.msk [vmem:[#allocation2 + $0x48] sm:$0xff] %vm1416_vm7, %v1339_v13  ;;  %1425 = vst.msk [vmem:[#allocation2 + $0x40] sm:$0xff] %vm1416_vm7, %v1337_v61  ;;  %v1869_v58 = vpack.c.bf16 %v1840_v1, %v1839_v37 }
 0x1d7   : > { %1752 = vrot.lane.b32.xlu1 %v4786_v35, %s5261_s7  ;;  %1750 = vrot.lane.b32.xlu0 %v4785_v36, %s5261_s7  ;;  %2173 = vst.msk [vmem:[#allocation3 + $0x78] sm:$0xff] %vm2156_vm11, %v5262_v62  ;;  %2174 = vst.msk [vmem:[#allocation3 + $0x80] sm:$0xff] %vm2156_vm11, %v5262_v62 }
 0x1d8   : > { %5049 = vmatprep.mubr.msk.bf16.mxu0 %vm1910_vm10, %v1869_v58  ;;  %2176 = vst.msk [vmem:[#allocation3 + $0x90] sm:$0xff] %vm2156_vm11, %v5262_v62  ;;  %2177 = vst.msk [vmem:[#allocation3 + $0x98] sm:$0xff] %vm2156_vm11, %v5262_v62 }
 0x1d9   : > { %v1343_v44 = vpop.permute.xlu1 %1342  ;;  %v1341_v45 = vpop.permute.xlu0 %1340  ;;  %v1841_v59 = vld [vmem:[#allocation2 + $0x30] sm:$0xff]  ;;  %v1842_v48 = vld [vmem:[#allocation2 + $0x38] sm:$0xff]  ;;  %2179 = vst.msk [vmem:[#allocation3 + $0xa8] sm:$0xff] %vm2156_vm11, %v5262_v62  ;;  %2180 = vst.msk [vmem:[#allocation3 + $0xb0] sm:$0xff] %vm2156_vm11, %v5262_v62 }
 0x1da   : > { %1428 = vst.msk [vmem:[#allocation2 + $0x58] sm:$0xff] %vm1416_vm7, %v1343_v44  ;;  %1427 = vst.msk [vmem:[#allocation2 + $0x50] sm:$0xff] %vm1416_vm7, %v1341_v45  ;;  %v1870_v24 = vpack.c.bf16 %v1842_v48, %v1841_v59 }
 0x1db   : > { %1174 = vrot.lane.b32.xlu0 %v4785_v36, %s5258_s14  ;;  %1176 = vrot.lane.b32.xlu1 %v4786_v35, %s5258_s14  ;;  %2182 = vst.msk [vmem:[#allocation3 + $0xc0] sm:$0xff] %vm2156_vm11, %v5262_v62  ;;  %2183 = vst.msk [vmem:[#allocation3 + $0xc8] sm:$0xff] %vm2156_vm11, %v5262_v62  ;;  %v4762_v35 = vld [vmem:[%s5350_s9 + $0x1a1] sm:$0xff] }
 0x1dc   : > { %5050 = vmatmul.mubr.msk.bf16.gmra.mxu0 %vm1910_vm10, %v1870_v24  ;;  %2185 = vst.msk [vmem:[#allocation3 + $0xd8] sm:$0xff] %vm2156_vm11, %v5262_v62  ;;  %2186 = vst.msk [vmem:[#allocation3 + $0xe0] sm:$0xff] %vm2156_vm11, %v5262_v62  ;;  %v4793_v24 = vld [vmem:[%s5350_s9 + $0x19a] sm:$0xff] }
 0x1dd   : > { %v1532_v60 = vpop.permute.xlu1 %1531  ;;  %v1530_v26 = vpop.permute.xlu0 %1529  ;;  %2188 = vst.msk [vmem:[#allocation3 + $0xf0] sm:$0xff] %vm2156_vm11, %v5262_v62  ;;  %2189 = vst.msk [vmem:[#allocation3 + $0xf8] sm:$0xff] %vm2156_vm11, %v5262_v62 }
 0x1de   : > { %1619 = vst.msk [vmem:[#allocation2 + $0x48] sm:$0xff] %vm1609_vm8, %v1532_v60  ;;  %1618 = vst.msk [vmem:[#allocation2 + $0x40] sm:$0xff] %vm1609_vm8, %v1530_v26  ;;  %v2309_v26 = vld [vmem:[#allocation3 + $0x1] sm:$0xff] }
 0x1df   : > { %1178 = vrot.lane.b32.xlu0 %v4693_v25, %s5258_s14  ;;  %1180 = vrot.lane.b32.xlu1 %v4694_v49, %s5258_s14  ;;  %2191 = vst.msk [vmem:[#allocation3 + $0x108] sm:$0xff] %vm2156_vm11, %v5262_v62  ;;  %2192 = vst.msk [vmem:[#allocation3 + $0x110] sm:$0xff] %vm2156_vm11, %v5262_v62 }
 0x1e0   : > { %2194 = vst.msk [vmem:[#allocation3 + $0x120] sm:$0xff] %vm2156_vm11, %v5262_v62  ;;  %2195 = vst.msk [vmem:[#allocation3 + $0x128] sm:$0xff] %vm2156_vm11, %v5262_v62 }
 0x1e1   : > { %v1536_v52 = vpop.permute.xlu1 %1535  ;;  %v1534_v53 = vpop.permute.xlu0 %1533  ;;  %2197 = vst.msk [vmem:[#allocation3 + $0x138] sm:$0xff] %vm2156_vm11, %v5262_v62  ;;  %2198 = vst.msk [vmem:[#allocation3 + $0x140] sm:$0xff] %vm2156_vm11, %v5262_v62 }
 0x1e2   : > { %1621 = vst.msk [vmem:[#allocation2 + $0x58] sm:$0xff] %vm1609_vm8, %v1536_v52  ;;  %1620 = vst.msk [vmem:[#allocation2 + $0x50] sm:$0xff] %vm1609_vm8, %v1534_v53 }
 0x1e3   : > { %1368 = vrot.lane.b32.xlu0 %v4723_v17, %s5259_s15  ;;  %1370 = vrot.lane.b32.xlu1 %v4724_v27, %s5259_s15  ;;  %2200 = vst.msk [vmem:[#allocation3 + $0x150] sm:$0xff] %vm2156_vm11, %v5262_v62  ;;  %2201 = vst.msk [vmem:[#allocation3 + $0x158] sm:$0xff] %vm2156_vm11, %v5262_v62 }
 0x1e4   : > { %2203 = vst.msk [vmem:[#allocation3 + $0x168] sm:$0xff] %vm2156_vm11, %v5262_v62  ;;  %2204 = vst.msk [vmem:[#allocation3 + $0x170] sm:$0xff] %vm2156_vm11, %v5262_v62 }
 0x1e5   : > { %v1725_v57 = vpop.permute.xlu1 %1724  ;;  %v1723_v12 = vpop.permute.xlu0 %1722  ;;  %2206 = vst.msk [vmem:[#allocation3 + $0x180] sm:$0xff] %vm2156_vm11, %v5262_v62  ;;  %2207 = vst.msk [vmem:[#allocation3 + $0x188] sm:$0xff] %vm2156_vm11, %v5262_v62 }
 0x1e6   : > { %1812 = vst.msk [vmem:[#allocation2 + $0x48] sm:$0xff] %vm1802_vm9, %v1725_v57  ;;  %1811 = vst.msk [vmem:[#allocation2 + $0x40] sm:$0xff] %vm1802_vm9, %v1723_v12 }
 0x1e7   : > { %1372 = vrot.lane.b32.xlu0 %v4725_v56, %s5259_s15  ;;  %1374 = vrot.lane.b32.xlu1 %v4726_v38, %s5259_s15  ;;  %2209 = vst.msk [vmem:[#allocation3 + $0x198] sm:$0xff] %vm2156_vm11, %v5262_v62  ;;  %2210 = vst.msk [vmem:[#allocation3 + $0x1a0] sm:$0xff] %vm2156_vm11, %v5262_v62 }
 0x1e8   : > { %2166 = vst.msk [vmem:[#allocation3 + $0x40] sm:$0x3] %vm2159_vm12, %v5262_v62  ;;  %2160 = vst.msk [vmem:[#allocation3 + $0x10] sm:$0x3] %vm2159_vm12, %v5262_v62 }
 0x1e9   : > { %v1729_v16 = vpop.permute.xlu1 %1728  ;;  %v1727_v0 = vpop.permute.xlu0 %1726  ;;  %2163 = vst.msk [vmem:[#allocation3 + $0x28] sm:$0x3] %vm2159_vm12, %v5262_v62  ;;  %2169 = vst.msk [vmem:[#allocation3 + $0x58] sm:$0x3] %vm2159_vm12, %v5262_v62 }
 0x1ea   : > { %1814 = vst.msk [vmem:[#allocation2 + $0x58] sm:$0xff] %vm1802_vm9, %v1729_v16  ;;  %1813 = vst.msk [vmem:[#allocation2 + $0x50] sm:$0xff] %vm1802_vm9, %v1727_v0 }
 0x1eb   : > { %1561 = vrot.lane.b32.xlu0 %v4755_v39, %s5260_s26  ;;  %1563 = vrot.lane.b32.xlu1 %v4756_v40, %s5260_s26  ;;  %2172 = vst.msk [vmem:[#allocation3 + $0x70] sm:$0x3] %vm2159_vm12, %v5262_v62  ;;  %2175 = vst.msk [vmem:[#allocation3 + $0x88] sm:$0x3] %vm2159_vm12, %v5262_v62 }
 0x1ec   : > { %2178 = vst.msk [vmem:[#allocation3 + $0xa0] sm:$0x3] %vm2159_vm12, %v5262_v62  ;;  %2181 = vst.msk [vmem:[#allocation3 + $0xb8] sm:$0x3] %vm2159_vm12, %v5262_v62 }
 0x1ed   : > { %v1153_v4 = vpop.permute.xlu1 %1152  ;;  %v1151_v5 = vpop.permute.xlu0 %1150  ;;  %v1843_v6 = vld [vmem:[#allocation2 + $0x40] sm:$0xff]  ;;  %v1844_v7 = vld [vmem:[#allocation2 + $0x48] sm:$0xff]  ;;  %2184 = vst.msk [vmem:[#allocation3 + $0xd0] sm:$0x3] %vm2159_vm12, %v5262_v62  ;;  %2187 = vst.msk [vmem:[#allocation3 + $0xe8] sm:$0x3] %vm2159_vm12, %v5262_v62 }
 0x1ee   : > { %1236 = vst.msk [vmem:[#allocation2 + $0x68] sm:$0xff] %vm1222_vm6, %v1153_v4  ;;  %1235 = vst.msk [vmem:[#allocation2 + $0x60] sm:$0xff] %vm1222_vm6, %v1151_v5  ;;  %v1871_v8 = vpack.c.bf16 %v1844_v7, %v1843_v6 }
 0x1ef   : > { %1565 = vrot.lane.b32.xlu0 %v4757_v41, %s5260_s26  ;;  %1567 = vrot.lane.b32.xlu1 %v4758_v2, %s5260_s26  ;;  %2190 = vst.msk [vmem:[#allocation3 + $0x100] sm:$0x3] %vm2159_vm12, %v5262_v62  ;;  %2193 = vst.msk [vmem:[#allocation3 + $0x118] sm:$0x3] %vm2159_vm12, %v5262_v62  ;;  %v2310_v17 = vld [vmem:[#allocation3 + $0x9] sm:$0xff] }
 0x1f0   : > { %5053 = vmatprep.mubr.msk.bf16.mxu0 %vm1910_vm10, %v1871_v8  ;;  %2196 = vst.msk [vmem:[#allocation3 + $0x130] sm:$0x3] %vm2159_vm12, %v5262_v62  ;;  %2199 = vst.msk [vmem:[#allocation3 + $0x148] sm:$0x3] %vm2159_vm12, %v5262_v62 }
 0x1f1   : > { %v1157_v28 = vpop.permute.xlu1 %1156  ;;  %v1155_v9 = vpop.permute.xlu0 %1154  ;;  %v1845_v10 = vld [vmem:[#allocation2 + $0x50] sm:$0xff]  ;;  %v1846_v31 = vld [vmem:[#allocation2 + $0x58] sm:$0xff]  ;;  %2202 = vst.msk [vmem:[#allocation3 + $0x160] sm:$0x3] %vm2159_vm12, %v5262_v62  ;;  %2205 = vst.msk [vmem:[#allocation3 + $0x178] sm:$0x3] %vm2159_vm12, %v5262_v62 }
 0x1f2   : > { %1238 = vst.msk [vmem:[#allocation2 + $0x78] sm:$0xff] %vm1222_vm6, %v1157_v28  ;;  %1237 = vst.msk [vmem:[#allocation2 + $0x70] sm:$0xff] %vm1222_vm6, %v1155_v9  ;;  %v1872_v32 = vpack.c.bf16 %v1846_v31, %v1845_v10 }
 0x1f3   : > { %1754 = vrot.lane.b32.xlu0 %v4693_v25, %s5261_s7  ;;  %1756 = vrot.lane.b32.xlu1 %v4694_v49, %s5261_s7  ;;  %2208 = vst.msk [vmem:[#allocation3 + $0x190] sm:$0x3] %vm2159_vm12, %v5262_v62  ;;  %2211 = vst.msk [vmem:[#allocation3 + $0x1a8] sm:$0x3] %vm2159_vm12, %v5262_v62  ;;  %v4794_v25 = vld [vmem:[%s5350_s9 + $0x1a2] sm:$0xff] }
 0x1f4   : > { %5054 = vmatmul.mubr.msk.bf16.gmra.mxu0 %vm1910_vm10, %v1872_v32 }
 0x1f5   : > { %v1347_v14 = vpop.permute.xlu1 %1346  ;;  %v1345_v15 = vpop.permute.xlu0 %1344 }
 0x1f6   : > { %1430 = vst.msk [vmem:[#allocation2 + $0x68] sm:$0xff] %vm1416_vm7, %v1347_v14  ;;  %1429 = vst.msk [vmem:[#allocation2 + $0x60] sm:$0xff] %vm1416_vm7, %v1345_v15 }
 0x1f7   : > { %1758 = vrot.lane.b32.xlu0 %v4789_v11, %s5261_s7  ;;  %1760 = vrot.lane.b32.xlu1 %v4790_v33, %s5261_s7 }
 0x1f9   : > { %v1351_v18 = vpop.permute.xlu1 %1350  ;;  %v1349_v21 = vpop.permute.xlu0 %1348 }
 0x1fa   : > { %1432 = vst.msk [vmem:[#allocation2 + $0x78] sm:$0xff] %vm1416_vm7, %v1351_v18  ;;  %1431 = vst.msk [vmem:[#allocation2 + $0x70] sm:$0xff] %vm1416_vm7, %v1349_v21 }
 0x1fb   : > { %1182 = vrot.lane.b32.xlu0 %v4789_v11, %s5258_s14  ;;  %1184 = vrot.lane.b32.xlu1 %v4790_v33, %s5258_s14 }
 0x1fd   : > { %v1540_v42 = vpop.permute.xlu1 %1539  ;;  %v1538_v43 = vpop.permute.xlu0 %1537 }
 0x1fe   : > { %1623 = vst.msk [vmem:[#allocation2 + $0x68] sm:$0xff] %vm1609_vm8, %v1540_v42  ;;  %1622 = vst.msk [vmem:[#allocation2 + $0x60] sm:$0xff] %vm1609_vm8, %v1538_v43 }
 0x1ff   : > { %1186 = vrot.lane.b32.xlu0 %v6300_v29, %s5258_s14  ;;  %1188 = vrot.lane.b32.xlu1 %v6303_v30, %s5258_s14  ;;  %s5198_s14 = scalar_lea.vmem %s5197_s13, 8192 }
 0x201   : > { %v1544_v20 = vpop.permute.xlu1 %1543  ;;  %v1542_v47 = vpop.permute.xlu0 %1541 }
 0x202   : > { %1625 = vst.msk [vmem:[#allocation2 + $0x78] sm:$0xff] %vm1609_vm8, %v1544_v20  ;;  %1624 = vst.msk [vmem:[#allocation2 + $0x70] sm:$0xff] %vm1609_vm8, %v1542_v47 }
 0x203   : > { %1376 = vrot.lane.b32.xlu0 %v4727_v46, %s5259_s15  ;;  %1378 = vrot.lane.b32.xlu1 %v4728_v19, %s5259_s15 }
 0x205   : > { %v1733_v22 = vpop.permute.xlu1 %1732  ;;  %v1731_v23 = vpop.permute.xlu0 %1730 }
 0x206   : > { %1816 = vst.msk [vmem:[#allocation2 + $0x68] sm:$0xff] %vm1802_vm9, %v1733_v22  ;;  %1815 = vst.msk [vmem:[#allocation2 + $0x60] sm:$0xff] %vm1802_vm9, %v1731_v23 }
 0x207   : > { %1380 = vrot.lane.b32.xlu0 %v4729_v50, %s5259_s15  ;;  %1382 = vrot.lane.b32.xlu1 %v4730_v51, %s5259_s15 }
 0x209   : > { %v1737_v63 = vpop.permute.xlu1 %1736  ;;  %v1735_v34 = vpop.permute.xlu0 %1734 }
 0x20a   : > { %1818 = vst.msk [vmem:[#allocation2 + $0x78] sm:$0xff] %vm1802_vm9, %v1737_v63  ;;  %1817 = vst.msk [vmem:[#allocation2 + $0x70] sm:$0xff] %vm1802_vm9, %v1735_v34 }
 0x20b   : > { %1569 = vrot.lane.b32.xlu0 %v4759_v54, %s5260_s26  ;;  %1571 = vrot.lane.b32.xlu1 %v4760_v55, %s5260_s26 }
 0x20d   : > { %v1161_v36 = vpop.permute.xlu1 %1160  ;;  %v1159_v13 = vpop.permute.xlu0 %1158  ;;  %v1847_v61 = vld [vmem:[#allocation2 + $0x60] sm:$0xff]  ;;  %v1848_v37 = vld [vmem:[#allocation2 + $0x68] sm:$0xff] }
 0x20e   : > { %1240 = vst.msk [vmem:[#allocation2 + $0x88] sm:$0xff] %vm1222_vm6, %v1161_v36  ;;  %1239 = vst.msk [vmem:[#allocation2 + $0x80] sm:$0xff] %vm1222_vm6, %v1159_v13  ;;  %v1873_v1 = vpack.c.bf16 %v1848_v37, %v1847_v61 }
 0x20f   : > { %1573 = vrot.lane.b32.xlu0 %v4761_v3, %s5260_s26  ;;  %1575 = vrot.lane.b32.xlu1 %v4762_v35, %s5260_s26 }
 0x210   : > { %5057 = vmatprep.mubr.msk.bf16.mxu0 %vm1910_vm10, %v1873_v1 }
 0x211   : > { %v1165_v58 = vpop.permute.xlu1 %1164  ;;  %v1163_v44 = vpop.permute.xlu0 %1162  ;;  %v1849_v45 = vld [vmem:[#allocation2 + $0x70] sm:$0xff]  ;;  %v1850_v59 = vld [vmem:[#allocation2 + $0x78] sm:$0xff] }
 0x212   : > { %1242 = vst.msk [vmem:[#allocation2 + $0x98] sm:$0xff] %vm1222_vm6, %v1165_v58  ;;  %1241 = vst.msk [vmem:[#allocation2 + $0x90] sm:$0xff] %vm1222_vm6, %v1163_v44  ;;  %v1874_v48 = vpack.c.bf16 %v1850_v59, %v1849_v45 }
 0x213   : > { %1762 = vrot.lane.b32.xlu0 %v6300_v29, %s5261_s7  ;;  %1764 = vrot.lane.b32.xlu1 %v6303_v30, %s5261_s7 }
 0x214   : > { %5058 = vmatmul.mubr.msk.bf16.gmra.mxu0 %vm1910_vm10, %v1874_v48 }
 0x215   : > { %v1355_v49 = vpop.permute.xlu1 %1354  ;;  %v1353_v60 = vpop.permute.xlu0 %1352 }
 0x216   : > { %1434 = vst.msk [vmem:[#allocation2 + $0x88] sm:$0xff] %vm1416_vm7, %v1355_v49  ;;  %1433 = vst.msk [vmem:[#allocation2 + $0x80] sm:$0xff] %vm1416_vm7, %v1353_v60 }
 0x217   : > { %1766 = vrot.lane.b32.xlu0 %v4793_v24, %s5261_s7  ;;  %1768 = vrot.lane.b32.xlu1 %v4794_v25, %s5261_s7 }
 0x219   : > { %v1359_v27 = vpop.permute.xlu1 %1358  ;;  %v1357_v52 = vpop.permute.xlu0 %1356 }
 0x21a   : > { %1436 = vst.msk [vmem:[#allocation2 + $0x98] sm:$0xff] %vm1416_vm7, %v1359_v27  ;;  %1435 = vst.msk [vmem:[#allocation2 + $0x90] sm:$0xff] %vm1416_vm7, %v1357_v52  ;;  %v2245_v27 = vld [vmem:[#allocation3] sm:$0xff] }
 0x21b   : > { %2373 = vrot.lane.b32.xlu0 %v2309_v26, %s5261_s7  ;;  %2375 = vrot.lane.b32.xlu1 %v2310_v17, %s5261_s7  ;;  %2277 = vst.msk [vmem:[#allocation4] sm:$0xff] %vm2156_vm11, %v2245_v27 }
 0x21d   : > { %v1548_v53 = vpop.permute.xlu1 %1547  ;;  %v1546_v56 = vpop.permute.xlu0 %1545 }
 0x21e   : > { %1627 = vst.msk [vmem:[#allocation2 + $0x88] sm:$0xff] %vm1609_vm8, %v1548_v53  ;;  %1626 = vst.msk [vmem:[#allocation2 + $0x80] sm:$0xff] %vm1609_vm8, %v1546_v56  ;;  %v6519_v56 = vld [vmem:[%s7773_s2] ss:$0 sm:$0xff] }
 0x221   : > { %v1552_v38 = vpop.permute.xlu1 %1551  ;;  %v1550_v57 = vpop.permute.xlu0 %1549 }
 0x222   : > { %1629 = vst.msk [vmem:[#allocation2 + $0x98] sm:$0xff] %vm1609_vm8, %v1552_v38  ;;  %1628 = vst.msk [vmem:[#allocation2 + $0x90] sm:$0xff] %vm1609_vm8, %v1550_v57  ;;  %v2246_v38 = vld [vmem:[#allocation3 + $0x8] sm:$0xff] }
 0x223   : > { %2278 = vst.msk [vmem:[#allocation4 + $0x18] sm:$0xff] %vm2156_vm11, %v2246_v38 }
 0x225   : > { %v1741_v12 = vpop.permute.xlu1 %1740  ;;  %v1739_v39 = vpop.permute.xlu0 %1738 }
 0x226   : > { %1820 = vst.msk [vmem:[#allocation2 + $0x88] sm:$0xff] %vm1802_vm9, %v1741_v12  ;;  %1819 = vst.msk [vmem:[#allocation2 + $0x80] sm:$0xff] %vm1802_vm9, %v1739_v39 }
 0x229   : > { %v1745_v40 = vpop.permute.xlu1 %1744  ;;  %v1743_v16 = vpop.permute.xlu0 %1742 }
 0x22a   : > { %1822 = vst.msk [vmem:[#allocation2 + $0x98] sm:$0xff] %vm1802_vm9, %v1745_v40  ;;  %1821 = vst.msk [vmem:[#allocation2 + $0x90] sm:$0xff] %vm1802_vm9, %v1743_v16 }
 0x22d   : > { %v1169_v0 = vpop.permute.xlu1 %1168  ;;  %v1167_v41 = vpop.permute.xlu0 %1166  ;;  %v1851_v2 = vld [vmem:[#allocation2 + $0x80] sm:$0xff]  ;;  %v1852_v4 = vld [vmem:[#allocation2 + $0x88] sm:$0xff] }
 0x22e   : > { %1244 = vst.msk [vmem:[#allocation2 + $0xa8] sm:$0xff] %vm1222_vm6, %v1169_v0  ;;  %1243 = vst.msk [vmem:[#allocation2 + $0xa0] sm:$0xff] %vm1222_vm6, %v1167_v41  ;;  %v1875_v5 = vpack.c.bf16 %v1852_v4, %v1851_v2 }
 0x230   : > { %5061 = vmatprep.mubr.msk.bf16.mxu0 %vm1910_vm10, %v1875_v5 }
 0x231   : > { %v1173_v6 = vpop.permute.xlu1 %1172  ;;  %v1171_v7 = vpop.permute.xlu0 %1170  ;;  %v1853_v8 = vld [vmem:[#allocation2 + $0x90] sm:$0xff]  ;;  %v1854_v28 = vld [vmem:[#allocation2 + $0x98] sm:$0xff] }
 0x232   : > { %1246 = vst.msk [vmem:[#allocation2 + $0xb8] sm:$0xff] %vm1222_vm6, %v1173_v6  ;;  %1245 = vst.msk [vmem:[#allocation2 + $0xb0] sm:$0xff] %vm1222_vm6, %v1171_v7  ;;  %v1876_v9 = vpack.c.bf16 %v1854_v28, %v1853_v8 }
 0x234   : > { %5062 = vmatmul.mubr.msk.bf16.gmra.mxu0 %vm1910_vm10, %v1876_v9 }
 0x235   : > { %v1363_v10 = vpop.permute.xlu1 %1362  ;;  %v1361_v31 = vpop.permute.xlu0 %1360 }
 0x236   : > { %1438 = vst.msk [vmem:[#allocation2 + $0xa8] sm:$0xff] %vm1416_vm7, %v1363_v10  ;;  %1437 = vst.msk [vmem:[#allocation2 + $0xa0] sm:$0xff] %vm1416_vm7, %v1361_v31 }
 0x239   : > { %v1367_v32 = vpop.permute.xlu1 %1366  ;;  %v1365_v11 = vpop.permute.xlu0 %1364 }
 0x23a   : > { %1440 = vst.msk [vmem:[#allocation2 + $0xb8] sm:$0xff] %vm1416_vm7, %v1367_v32  ;;  %1439 = vst.msk [vmem:[#allocation2 + $0xb0] sm:$0xff] %vm1416_vm7, %v1365_v11 }
 0x23d   : > { %v1556_v33 = vpop.permute.xlu1 %1555  ;;  %v1554_v14 = vpop.permute.xlu0 %1553 }
 0x23e   : > { %1631 = vst.msk [vmem:[#allocation2 + $0xa8] sm:$0xff] %vm1609_vm8, %v1556_v33  ;;  %1630 = vst.msk [vmem:[#allocation2 + $0xa0] sm:$0xff] %vm1609_vm8, %v1554_v14 }
 0x241   : > { %v1560_v15 = vpop.permute.xlu1 %1559  ;;  %v1558_v18 = vpop.permute.xlu0 %1557 }
 0x242   : > { %1633 = vst.msk [vmem:[#allocation2 + $0xb8] sm:$0xff] %vm1609_vm8, %v1560_v15  ;;  %1632 = vst.msk [vmem:[#allocation2 + $0xb0] sm:$0xff] %vm1609_vm8, %v1558_v18 }
 0x245   : > { %v1749_v21 = vpop.permute.xlu1 %1748  ;;  %v1747_v29 = vpop.permute.xlu0 %1746 }
 0x246   : > { %1824 = vst.msk [vmem:[#allocation2 + $0xa8] sm:$0xff] %vm1802_vm9, %v1749_v21  ;;  %1823 = vst.msk [vmem:[#allocation2 + $0xa0] sm:$0xff] %vm1802_vm9, %v1747_v29 }
 0x249   : > { %v1753_v30 = vpop.permute.xlu1 %1752  ;;  %v1751_v42 = vpop.permute.xlu0 %1750 }
 0x24a   : > { %1826 = vst.msk [vmem:[#allocation2 + $0xb8] sm:$0xff] %vm1802_vm9, %v1753_v30  ;;  %1825 = vst.msk [vmem:[#allocation2 + $0xb0] sm:$0xff] %vm1802_vm9, %v1751_v42 }
 0x24d   : > { %v1855_v43 = vld [vmem:[#allocation2 + $0xa0] sm:$0xff]  ;;  %v1856_v46 = vld [vmem:[#allocation2 + $0xa8] sm:$0xff]  ;;  %v1175_v19 = vpop.permute.xlu0 %1174  ;;  %v1177_v20 = vpop.permute.xlu1 %1176 }
 0x24e   : > { %v1877_v47 = vpack.c.bf16 %v1856_v46, %v1855_v43  ;;  %1247 = vst.msk [vmem:[#allocation2 + $0xc0] sm:$0xff] %vm1222_vm6, %v1175_v19  ;;  %1248 = vst.msk [vmem:[#allocation2 + $0xc8] sm:$0xff] %vm1222_vm6, %v1177_v20 }
 0x250   : > { %5065 = vmatprep.mubr.msk.bf16.mxu0 %vm1910_vm10, %v1877_v47 }
 0x251   : > { %v1857_v50 = vld [vmem:[#allocation2 + $0xb0] sm:$0xff]  ;;  %v1858_v51 = vld [vmem:[#allocation2 + $0xb8] sm:$0xff]  ;;  %v1179_v22 = vpop.permute.xlu0 %1178  ;;  %v1181_v23 = vpop.permute.xlu1 %1180 }
 0x252   : > { %v1878_v62 = vpack.c.bf16 %v1858_v51, %v1857_v50  ;;  %1249 = vst.msk [vmem:[#allocation2 + $0xd0] sm:$0xff] %vm1222_vm6, %v1179_v22  ;;  %1250 = vst.msk [vmem:[#allocation2 + $0xd8] sm:$0xff] %vm1222_vm6, %v1181_v23 }
 0x254   : > { %5066 = vmatmul.mubr.msk.bf16.gmra.mxu0 %vm1910_vm10, %v1878_v62 }
 0x255   : > { %v1369_v54 = vpop.permute.xlu0 %1368  ;;  %v1371_v55 = vpop.permute.xlu1 %1370 }
 0x256   : > { %1441 = vst.msk [vmem:[#allocation2 + $0xc0] sm:$0xff] %vm1416_vm7, %v1369_v54  ;;  %1442 = vst.msk [vmem:[#allocation2 + $0xc8] sm:$0xff] %vm1416_vm7, %v1371_v55 }
 0x259   : > { %v1373_v63 = vpop.permute.xlu0 %1372  ;;  %v1375_v34 = vpop.permute.xlu1 %1374 }
 0x25a   : > { %1443 = vst.msk [vmem:[#allocation2 + $0xd0] sm:$0xff] %vm1416_vm7, %v1373_v63  ;;  %1444 = vst.msk [vmem:[#allocation2 + $0xd8] sm:$0xff] %vm1416_vm7, %v1375_v34 }
 0x25d   : > { %v1562_v3 = vpop.permute.xlu0 %1561  ;;  %v1564_v35 = vpop.permute.xlu1 %1563 }
 0x25e   : > { %1634 = vst.msk [vmem:[#allocation2 + $0xc0] sm:$0xff] %vm1609_vm8, %v1562_v3  ;;  %1635 = vst.msk [vmem:[#allocation2 + $0xc8] sm:$0xff] %vm1609_vm8, %v1564_v35 }
 0x261   : > { %v1566_v36 = vpop.permute.xlu0 %1565  ;;  %v1568_v13 = vpop.permute.xlu1 %1567 }
 0x262   : > { %1636 = vst.msk [vmem:[#allocation2 + $0xd0] sm:$0xff] %vm1609_vm8, %v1566_v36  ;;  %1637 = vst.msk [vmem:[#allocation2 + $0xd8] sm:$0xff] %vm1609_vm8, %v1568_v13 }
 0x265   : > { %v1755_v61 = vpop.permute.xlu0 %1754  ;;  %v1757_v37 = vpop.permute.xlu1 %1756 }
 0x266   : > { %1827 = vst.msk [vmem:[#allocation2 + $0xc0] sm:$0xff] %vm1802_vm9, %v1755_v61  ;;  %1828 = vst.msk [vmem:[#allocation2 + $0xc8] sm:$0xff] %vm1802_vm9, %v1757_v37 }
 0x269   : > { %v1759_v1 = vpop.permute.xlu0 %1758  ;;  %v1761_v58 = vpop.permute.xlu1 %1760 }
 0x26a   : > { %1829 = vst.msk [vmem:[#allocation2 + $0xd0] sm:$0xff] %vm1802_vm9, %v1759_v1  ;;  %1830 = vst.msk [vmem:[#allocation2 + $0xd8] sm:$0xff] %vm1802_vm9, %v1761_v58 }
 0x26d   : > { %v1183_v44 = vpop.permute.xlu0 %1182  ;;  %v1185_v45 = vpop.permute.xlu1 %1184 }
 0x26e   : > { %1251 = vst.msk [vmem:[#allocation2 + $0xe0] sm:$0xff] %vm1222_vm6, %v1183_v44  ;;  %1252 = vst.msk [vmem:[#allocation2 + $0xe8] sm:$0xff] %vm1222_vm6, %v1185_v45 }
 0x271   : > { %v1187_v59 = vpop.permute.xlu0 %1186  ;;  %v1189_v48 = vpop.permute.xlu1 %1188 }
 0x272   : > { %1253 = vst.msk [vmem:[#allocation2 + $0xf0] sm:$0xff] %vm1222_vm6, %v1187_v59  ;;  %1254 = vst.msk [vmem:[#allocation2 + $0xf8] sm:$0xff] %vm1222_vm6, %v1189_v48 }
 0x275   : > { %v1377_v24 = vpop.permute.xlu0 %1376  ;;  %v1379_v25 = vpop.permute.xlu1 %1378 }
 0x276   : > { %1445 = vst.msk [vmem:[#allocation2 + $0xe0] sm:$0xff] %vm1416_vm7, %v1377_v24  ;;  %1446 = vst.msk [vmem:[#allocation2 + $0xe8] sm:$0xff] %vm1416_vm7, %v1379_v25 }
 0x279   : > { %v1381_v49 = vpop.permute.xlu0 %1380  ;;  %v1383_v60 = vpop.permute.xlu1 %1382 }
 0x27a   : > { %1447 = vst.msk [vmem:[#allocation2 + $0xf0] sm:$0xff] %vm1416_vm7, %v1381_v49  ;;  %1448 = vst.msk [vmem:[#allocation2 + $0xf8] sm:$0xff] %vm1416_vm7, %v1383_v60 }
 0x27d   : > { %v1570_v26 = vpop.permute.xlu0 %1569  ;;  %v1572_v17 = vpop.permute.xlu1 %1571 }
 0x27e   : > { %1638 = vst.msk [vmem:[#allocation2 + $0xe0] sm:$0xff] %vm1609_vm8, %v1570_v26  ;;  %1639 = vst.msk [vmem:[#allocation2 + $0xe8] sm:$0xff] %vm1609_vm8, %v1572_v17 }
 0x281   : > { %v1574_v52 = vpop.permute.xlu0 %1573  ;;  %v1576_v53 = vpop.permute.xlu1 %1575 }
 0x282   : > { %1640 = vst.msk [vmem:[#allocation2 + $0xf0] sm:$0xff] %vm1609_vm8, %v1574_v52  ;;  %1641 = vst.msk [vmem:[#allocation2 + $0xf8] sm:$0xff] %vm1609_vm8, %v1576_v53 }
 0x284   : > { %v5047_v57 = vpop.f32.mrf.mxu0 }
 0x285   : > { %v2006_v12 = vadd.f32 %v5047_v57, %v6519_v56  ;;  %v1763_v39 = vpop.permute.xlu0 %1762  ;;  %v1765_v40 = vpop.permute.xlu1 %1764 }
 0x286   : > { %v1997_v16 = vpop.f32.mrf.mxu0  ;;  %1831 = vst.msk [vmem:[#allocation2 + $0xe0] sm:$0xff] %vm1802_vm9, %v1763_v39  ;;  %1832 = vst.msk [vmem:[#allocation2 + $0xe8] sm:$0xff] %vm1802_vm9, %v1765_v40 }
 0x287   : > { %v2126_v0 = vmax.f32 %v2006_v12, 0.0  ;;  %v1998_v41 = vadd.f32 %v6519_v56, %v1997_v16 }
 0x288   : > { %v5048_v2 = vpop.f32.mrf.mxu0 }
 0x289   : > { %2215 = vst.msk [vmem:[#allocation3 + $0x31] sm:$0xff] %vm2156_vm11, %v2126_v0  ;;  %v2124_v4 = vmax.f32 %v1998_v41, 0.0  ;;  %v2009_v5 = vadd.f32 %v5048_v2, %v6519_v56  ;;  %v1767_v6 = vpop.permute.xlu0 %1766  ;;  %v1769_v7 = vpop.permute.xlu1 %1768 }
 0x28a   : > { %v2000_v8 = vpop.f32.mrf.mxu0  ;;  %1833 = vst.msk [vmem:[#allocation2 + $0xf0] sm:$0xff] %vm1802_vm9, %v1767_v6  ;;  %1834 = vst.msk [vmem:[#allocation2 + $0xf8] sm:$0xff] %vm1802_vm9, %v1769_v7 }
 0x28b   : > { %2213 = vst.msk [vmem:[#allocation3 + $0x19] sm:$0xff] %vm2156_vm11, %v2124_v4  ;;  %v2127_v28 = vmax.f32 %v2009_v5, 0.0  ;;  %v2001_v9 = vadd.f32 %v6519_v56, %v2000_v8 }
 0x28d   : > { %2216 = vst.msk [vmem:[#allocation3 + $0x39] sm:$0xff] %vm2156_vm11, %v2127_v28  ;;  %v2125_v10 = vmax.f32 %v2001_v9, 0.0  ;;  %v2374_v31 = vpop.permute.xlu0 %2373  ;;  %v2376_v32 = vpop.permute.xlu1 %2375 }
 0x28e   : > { %2470 = vst.msk [vmem:[#allocation4] sm:$0xff] %vm2469_vm13, %v2374_v31  ;;  %2471 = vst.msk [vmem:[#allocation4 + $0x18] sm:$0xff] %vm2469_vm13, %v2376_v32 }
 0x28f   : > { %2214 = vst.msk [vmem:[#allocation3 + $0x21] sm:$0xff] %vm2156_vm11, %v2125_v10 }
 0x290   : > { %v6538_v11 = vld [vmem:[#allocation3 + $0x30] sm:$0xff] }
 0x291   : > { %v2890_v33 = vld [vmem:[#allocation3 + $0x31] sm:$0xff]  ;;  %2281 = vst.msk [vmem:[#allocation4 + $0x60] sm:$0xff] %vm2156_vm11, %v6538_v11 }
 0x292   : > { %2922 = vst.msk [vmem:[#allocation4 + $0x38] sm:$0xff] %vm2156_vm11, %v2890_v33  ;;  %v2311_v14 = vld [vmem:[#allocation3 + $0x19] sm:$0xff]  ;;  %v6553_v42 = vld [vmem:[#allocation3 + $0x31] sm:$0xff] }
 0x293   : > { %v6543_v15 = vld [vmem:[#allocation3 + $0x18] sm:$0xff]  ;;  %2377 = vrot.lane.b32.xlu0 %v2311_v14, %s5261_s7  ;;  %2920 = vst.msk [vmem:[#allocation4 + $0x8] sm:$0xff] %vm2156_vm11, %v2311_v14 }
 0x294   : > { %2279 = vst.msk [vmem:[#allocation4 + $0x30] sm:$0xff] %vm2156_vm11, %v6543_v15  ;;  %v6549_v18 = vld [vmem:[#allocation3 + $0x38] sm:$0xff] }
 0x295   : > { %2282 = vst.msk [vmem:[#allocation4 + $0x78] sm:$0xff] %vm2156_vm11, %v6549_v18  ;;  %v2891_v21 = vld [vmem:[#allocation3 + $0x39] sm:$0xff] }
 0x296   : > { %v3529_v29 = vld [vmem:[#allocation3 + $0x32] sm:$0xff]  ;;  %v2312_v30 = vld [vmem:[#allocation3 + $0x21] sm:$0xff]  ;;  %2923 = vst.msk [vmem:[#allocation4 + $0x50] sm:$0xff] %vm2156_vm11, %v2891_v21 }
 0x297   : > { %v6555_v43 = vld [vmem:[#allocation3 + $0x20] sm:$0xff]  ;;  %3561 = vst.msk [vmem:[#allocation4 + $0x10] sm:$0xff] %vm2156_vm11, %v3529_v29  ;;  %2379 = vrot.lane.b32.xlu1 %v2312_v30, %s5261_s7  ;;  %2381 = vrot.lane.b32.xlu0 %v6553_v42, %s5261_s7  ;;  %2921 = vst.msk [vmem:[#allocation4 + $0x20] sm:$0xff] %vm2156_vm11, %v2312_v30 }
 0x298   : > { %2280 = vst.msk [vmem:[#allocation4 + $0x48] sm:$0xff] %vm2156_vm11, %v6555_v43  ;;  %v3530_v46 = vld [vmem:[#allocation3 + $0x3a] sm:$0xff] }
 0x299   : > { %3562 = vst.msk [vmem:[#allocation4 + $0x28] sm:$0xff] %vm2156_vm11, %v3530_v46  ;;  %v6566_v19 = vld [vmem:[#allocation3 + $0x39] sm:$0xff] }
 0x29a   : > { %v1859_v46 = vld [vmem:[#allocation2 + $0xc0] sm:$0xff] }
 0x29b   : > { %2383 = vrot.lane.b32.xlu1 %v6566_v19, %s5261_s7 }
 0x29c   : > { %v5051_v20 = vpop.f32.mrf.mxu0 }
 0x29d   : > { %v2022_v47 = vadd.f32 %v5051_v20, %v6519_v56  ;;  %v1860_v20 = vld [vmem:[#allocation2 + $0xc8] sm:$0xff] }
 0x29e   : > { %v2013_v50 = vpop.f32.mrf.mxu0 }
 0x29f   : > { %v2130_v51 = vmax.f32 %v2022_v47, 0.0  ;;  %v2014_v22 = vadd.f32 %v6519_v56, %v2013_v50  ;;  %v1861_v47 = vld [vmem:[#allocation2 + $0xd0] sm:$0xff]  ;;  %v1879_v50 = vpack.c.bf16 %v1860_v20, %v1859_v46 }
 0x2a0   : > { %v5052_v23 = vpop.f32.mrf.mxu0 }
 0x2a1   : > { %2219 = vst.msk [vmem:[#allocation3 + $0x61] sm:$0xff] %vm2156_vm11, %v2130_v51  ;;  %v2128_v62 = vmax.f32 %v2014_v22, 0.0  ;;  %v2025_v54 = vadd.f32 %v5052_v23, %v6519_v56  ;;  %v1862_v51 = vld [vmem:[#allocation2 + $0xd8] sm:$0xff]  ;;  %5069 = vmatprep.mubr.msk.bf16.mxu0 %vm1910_vm10, %v1879_v50 }
 0x2a2   : > { %v2016_v55 = vpop.f32.mrf.mxu0  ;;  %v1880_v22 = vpack.c.bf16 %v1862_v51, %v1861_v47 }
 0x2a3   : > { %2217 = vst.msk [vmem:[#allocation3 + $0x49] sm:$0xff] %vm2156_vm11, %v2128_v62  ;;  %v2131_v63 = vmax.f32 %v2025_v54, 0.0  ;;  %v2017_v34 = vadd.f32 %v6519_v56, %v2016_v55 }
 0x2a4   : > { %5070 = vmatmul.mubr.msk.bf16.gmra.mxu0 %vm1910_vm10, %v1880_v22 }
 0x2a5   : > { %2220 = vst.msk [vmem:[#allocation3 + $0x69] sm:$0xff] %vm2156_vm11, %v2131_v63  ;;  %v2129_v3 = vmax.f32 %v2017_v34, 0.0 }
 0x2a7   : > { %2218 = vst.msk [vmem:[#allocation3 + $0x51] sm:$0xff] %vm2156_vm11, %v2129_v3 }
 0x2a8   : > { %v6578_v35 = vld [vmem:[#allocation3 + $0x60] sm:$0xff] }
 0x2a9   : > { %v2894_v36 = vld [vmem:[#allocation3 + $0x61] sm:$0xff]  ;;  %2285 = vst.msk [vmem:[#allocation4 + $0xc0] sm:$0xff] %vm2156_vm11, %v6578_v35 }
 0x2aa   : > { %2926 = vst.msk [vmem:[#allocation4 + $0x98] sm:$0xff] %vm2156_vm11, %v2894_v36  ;;  %v6583_v13 = vld [vmem:[#allocation3 + $0x49] sm:$0xff]  ;;  %v6598_v59 = vld [vmem:[#allocation3 + $0x61] sm:$0xff] }
 0x2ab   : > { %v6585_v61 = vld [vmem:[#allocation3 + $0x48] sm:$0xff]  ;;  %2385 = vrot.lane.b32.xlu0 %v6583_v13, %s5261_s7 }
 0x2ac   : > { %v2892_v37 = vld [vmem:[#allocation3 + $0x49] sm:$0xff]  ;;  %2283 = vst.msk [vmem:[#allocation4 + $0x90] sm:$0xff] %vm2156_vm11, %v6585_v61 }
 0x2ad   : > { %2924 = vst.msk [vmem:[#allocation4 + $0x68] sm:$0xff] %vm2156_vm11, %v2892_v37  ;;  %v6592_v1 = vld [vmem:[#allocation3 + $0x68] sm:$0xff] }
 0x2ae   : > { %2286 = vst.msk [vmem:[#allocation4 + $0xd8] sm:$0xff] %vm2156_vm11, %v6592_v1  ;;  %v2895_v58 = vld [vmem:[#allocation3 + $0x69] sm:$0xff]  ;;  %v6596_v45 = vld [vmem:[#allocation3 + $0x51] sm:$0xff] }
 0x2af   : > { %v3533_v44 = vld [vmem:[#allocation3 + $0x62] sm:$0xff]  ;;  %v6600_v48 = vld [vmem:[#allocation3 + $0x50] sm:$0xff]  ;;  %2927 = vst.msk [vmem:[#allocation4 + $0xb0] sm:$0xff] %vm2156_vm11, %v2895_v58  ;;  %2387 = vrot.lane.b32.xlu1 %v6596_v45, %s5261_s7  ;;  %2389 = vrot.lane.b32.xlu0 %v6598_v59, %s5261_s7 }
 0x2b0   : > { %3565 = vst.msk [vmem:[#allocation4 + $0x70] sm:$0xff] %vm2156_vm11, %v3533_v44  ;;  %2284 = vst.msk [vmem:[#allocation4 + $0xa8] sm:$0xff] %vm2156_vm11, %v6600_v48  ;;  %v2893_v24 = vld [vmem:[#allocation3 + $0x51] sm:$0xff]  ;;  %v6614_v26 = vld [vmem:[#allocation3 + $0x69] sm:$0xff] }
 0x2b1   : > { %2925 = vst.msk [vmem:[#allocation4 + $0x80] sm:$0xff] %vm2156_vm11, %v2893_v24  ;;  %v3531_v25 = vld [vmem:[#allocation3 + $0x4a] sm:$0xff]  ;;  %v3532_v49 = vld [vmem:[#allocation3 + $0x52] sm:$0xff] }
 0x2b2   : > { %v3534_v60 = vld [vmem:[#allocation3 + $0x6a] sm:$0xff]  ;;  %3563 = vst.msk [vmem:[#allocation4 + $0x40] sm:$0xff] %vm2156_vm11, %v3531_v25  ;;  %3564 = vst.msk [vmem:[#allocation4 + $0x58] sm:$0xff] %vm2156_vm11, %v3532_v49 }
 0x2b3   : > { %3566 = vst.msk [vmem:[#allocation4 + $0x88] sm:$0xff] %vm2156_vm11, %v3534_v60  ;;  %2391 = vrot.lane.b32.xlu1 %v6614_v26, %s5261_s7 }
 0x2b4   : > { %v5055_v17 = vpop.f32.mrf.mxu0 }
 0x2b5   : > { %v2038_v27 = vadd.f32 %v5055_v17, %v6519_v56 }
 0x2b6   : > { %v2029_v52 = vpop.f32.mrf.mxu0 }
 0x2b7   : > { %v2134_v53 = vmax.f32 %v2038_v27, 0.0  ;;  %v2030_v38 = vadd.f32 %v6519_v56, %v2029_v52 }
 0x2b8   : > { %v5056_v57 = vpop.f32.mrf.mxu0 }
 0x2b9   : > { %2223 = vst.msk [vmem:[#allocation3 + $0x91] sm:$0xff] %vm2156_vm11, %v2134_v53  ;;  %v2132_v12 = vmax.f32 %v2030_v38, 0.0  ;;  %v2041_v39 = vadd.f32 %v5056_v57, %v6519_v56 }
 0x2ba   : > { %v2032_v40 = vpop.f32.mrf.mxu0 }
 0x2bb   : > { %2221 = vst.msk [vmem:[#allocation3 + $0x79] sm:$0xff] %vm2156_vm11, %v2132_v12  ;;  %v2135_v16 = vmax.f32 %v2041_v39, 0.0  ;;  %v2033_v0 = vadd.f32 %v6519_v56, %v2032_v40 }
 0x2bd   : > { %2224 = vst.msk [vmem:[#allocation3 + $0x99] sm:$0xff] %vm2156_vm11, %v2135_v16  ;;  %v2133_v41 = vmax.f32 %v2033_v0, 0.0 }
 0x2bf   : > { %2222 = vst.msk [vmem:[#allocation3 + $0x81] sm:$0xff] %vm2156_vm11, %v2133_v41 }
 0x2c0   : > { %v6626_v2 = vld [vmem:[#allocation3 + $0x90] sm:$0xff] }
 0x2c1   : > { %v2898_v4 = vld [vmem:[#allocation3 + $0x91] sm:$0xff]  ;;  %2289 = vst.msk [vmem:[#allocation4 + $0x120] sm:$0xff] %vm2156_vm11, %v6626_v2 }
 0x2c2   : > { %2930 = vst.msk [vmem:[#allocation4 + $0xf8] sm:$0xff] %vm2156_vm11, %v2898_v4  ;;  %v6631_v5 = vld [vmem:[#allocation3 + $0x79] sm:$0xff]  ;;  %v6646_v31 = vld [vmem:[#allocation3 + $0x91] sm:$0xff] }
 0x2c3   : > { %v6633_v6 = vld [vmem:[#allocation3 + $0x78] sm:$0xff]  ;;  %2393 = vrot.lane.b32.xlu0 %v6631_v5, %s5261_s7 }
 0x2c4   : > { %v2896_v7 = vld [vmem:[#allocation3 + $0x79] sm:$0xff]  ;;  %2287 = vst.msk [vmem:[#allocation4 + $0xf0] sm:$0xff] %vm2156_vm11, %v6633_v6 }
 0x2c5   : > { %2928 = vst.msk [vmem:[#allocation4 + $0xc8] sm:$0xff] %vm2156_vm11, %v2896_v7  ;;  %v6640_v8 = vld [vmem:[#allocation3 + $0x98] sm:$0xff]  ;;  %v1863_v7 = vld [vmem:[#allocation2 + $0xe0] sm:$0xff] }
 0x2c6   : > { %2290 = vst.msk [vmem:[#allocation4 + $0x138] sm:$0xff] %vm2156_vm11, %v6640_v8  ;;  %v2899_v28 = vld [vmem:[#allocation3 + $0x99] sm:$0xff]  ;;  %v6644_v10 = vld [vmem:[#allocation3 + $0x81] sm:$0xff] }
 0x2c7   : > { %v3537_v9 = vld [vmem:[#allocation3 + $0x92] sm:$0xff]  ;;  %v6648_v32 = vld [vmem:[#allocation3 + $0x80] sm:$0xff]  ;;  %2931 = vst.msk [vmem:[#allocation4 + $0x110] sm:$0xff] %vm2156_vm11, %v2899_v28  ;;  %2395 = vrot.lane.b32.xlu1 %v6644_v10, %s5261_s7  ;;  %2397 = vrot.lane.b32.xlu0 %v6646_v31, %s5261_s7  ;;  %v1864_v28 = vld [vmem:[#allocation2 + $0xe8] sm:$0xff] }
 0x2c8   : > { %3569 = vst.msk [vmem:[#allocation4 + $0xd0] sm:$0xff] %vm2156_vm11, %v3537_v9  ;;  %2288 = vst.msk [vmem:[#allocation4 + $0x108] sm:$0xff] %vm2156_vm11, %v6648_v32  ;;  %v2897_v33 = vld [vmem:[#allocation3 + $0x81] sm:$0xff]  ;;  %v6662_v30 = vld [vmem:[#allocation3 + $0x99] sm:$0xff] }
 0x2c9   : > { %v3535_v14 = vld [vmem:[#allocation3 + $0x7a] sm:$0xff]  ;;  %2929 = vst.msk [vmem:[#allocation4 + $0xe0] sm:$0xff] %vm2156_vm11, %v2897_v33  ;;  %v3536_v21 = vld [vmem:[#allocation3 + $0x82] sm:$0xff]  ;;  %v1865_v9 = vld [vmem:[#allocation2 + $0xf0] sm:$0xff]  ;;  %v1881_v33 = vpack.c.bf16 %v1864_v28, %v1863_v7 }
 0x2ca   : > { %3567 = vst.msk [vmem:[#allocation4 + $0xa0] sm:$0xff] %vm2156_vm11, %v3535_v14  ;;  %v3538_v29 = vld [vmem:[#allocation3 + $0x9a] sm:$0xff]  ;;  %3568 = vst.msk [vmem:[#allocation4 + $0xb8] sm:$0xff] %vm2156_vm11, %v3536_v21 }
 0x2cb   : > { %3570 = vst.msk [vmem:[#allocation4 + $0xe8] sm:$0xff] %vm2156_vm11, %v3538_v29  ;;  %2399 = vrot.lane.b32.xlu1 %v6662_v30, %s5261_s7  ;;  %v1866_v14 = vld [vmem:[#allocation2 + $0xf8] sm:$0xff]  ;;  %5073 = vmatprep.mubr.msk.bf16.mxu0 %vm1910_vm10, %v1881_v33 }
 0x2cc   : > { %v1882_v21 = vpack.c.bf16 %v1866_v14, %v1865_v9 }
 0x2ce   : > { %5074 = vmatmul.mubr.msk.bf16.gmra.mxu0 %vm1910_vm10, %v1882_v21 }
 0x2d4   : > { %v5059_v23 = vpop.f32.mrf.mxu0 }
 0x2d5   : > { %v2054_v62 = vadd.f32 %v5059_v23, %v6519_v56 }
 0x2d6   : > { %v2045_v54 = vpop.f32.mrf.mxu0 }
 0x2d7   : > { %v2138_v55 = vmax.f32 %v2054_v62, 0.0  ;;  %v2046_v63 = vadd.f32 %v6519_v56, %v2045_v54 }
 0x2d8   : > { %v5060_v34 = vpop.f32.mrf.mxu0 }
 0x2d9   : > { %2227 = vst.msk [vmem:[#allocation3 + $0xc1] sm:$0xff] %vm2156_vm11, %v2138_v55  ;;  %v2136_v3 = vmax.f32 %v2046_v63, 0.0  ;;  %v2057_v36 = vadd.f32 %v5060_v34, %v6519_v56 }
 0x2da   : > { %v2048_v37 = vpop.f32.mrf.mxu0 }
 0x2db   : > { %2225 = vst.msk [vmem:[#allocation3 + $0xa9] sm:$0xff] %vm2156_vm11, %v2136_v3  ;;  %v2139_v58 = vmax.f32 %v2057_v36, 0.0  ;;  %v2049_v44 = vadd.f32 %v6519_v56, %v2048_v37 }
 0x2dd   : > { %2228 = vst.msk [vmem:[#allocation3 + $0xc9] sm:$0xff] %vm2156_vm11, %v2139_v58  ;;  %v2137_v24 = vmax.f32 %v2049_v44, 0.0 }
 0x2df   : > { %2226 = vst.msk [vmem:[#allocation3 + $0xb1] sm:$0xff] %vm2156_vm11, %v2137_v24 }
 0x2e0   : > { %v6676_v25 = vld [vmem:[#allocation3 + $0xc0] sm:$0xff] }
 0x2e1   : > { %v2902_v49 = vld [vmem:[#allocation3 + $0xc1] sm:$0xff]  ;;  %2293 = vst.msk [vmem:[#allocation4 + $0x180] sm:$0xff] %vm2156_vm11, %v6676_v25 }
 0x2e2   : > { %2934 = vst.msk [vmem:[#allocation4 + $0x158] sm:$0xff] %vm2156_vm11, %v2902_v49  ;;  %v6681_v60 = vld [vmem:[#allocation3 + $0xa9] sm:$0xff]  ;;  %v6696_v12 = vld [vmem:[#allocation3 + $0xc1] sm:$0xff] }
 0x2e3   : > { %v6683_v17 = vld [vmem:[#allocation3 + $0xa8] sm:$0xff]  ;;  %2401 = vrot.lane.b32.xlu0 %v6681_v60, %s5261_s7 }
 0x2e4   : > { %v2900_v27 = vld [vmem:[#allocation3 + $0xa9] sm:$0xff]  ;;  %2291 = vst.msk [vmem:[#allocation4 + $0x150] sm:$0xff] %vm2156_vm11, %v6683_v17 }
 0x2e5   : > { %2932 = vst.msk [vmem:[#allocation4 + $0x128] sm:$0xff] %vm2156_vm11, %v2900_v27  ;;  %v6690_v52 = vld [vmem:[#allocation3 + $0xc8] sm:$0xff] }
 0x2e6   : > { %2294 = vst.msk [vmem:[#allocation4 + $0x198] sm:$0xff] %vm2156_vm11, %v6690_v52  ;;  %v2903_v53 = vld [vmem:[#allocation3 + $0xc9] sm:$0xff]  ;;  %v6694_v57 = vld [vmem:[#allocation3 + $0xb1] sm:$0xff] }
 0x2e7   : > { %v3541_v38 = vld [vmem:[#allocation3 + $0xc2] sm:$0xff]  ;;  %v6698_v39 = vld [vmem:[#allocation3 + $0xb0] sm:$0xff]  ;;  %2935 = vst.msk [vmem:[#allocation4 + $0x170] sm:$0xff] %vm2156_vm11, %v2903_v53  ;;  %2403 = vrot.lane.b32.xlu1 %v6694_v57, %s5261_s7  ;;  %2405 = vrot.lane.b32.xlu0 %v6696_v12, %s5261_s7 }
 0x2e8   : > { %3573 = vst.msk [vmem:[#allocation4 + $0x130] sm:$0xff] %vm2156_vm11, %v3541_v38  ;;  %2292 = vst.msk [vmem:[#allocation4 + $0x168] sm:$0xff] %vm2156_vm11, %v6698_v39  ;;  %v2901_v40 = vld [vmem:[#allocation3 + $0xb1] sm:$0xff]  ;;  %v6712_v4 = vld [vmem:[#allocation3 + $0xc9] sm:$0xff] }
 0x2e9   : > { %v3539_v16 = vld [vmem:[#allocation3 + $0xaa] sm:$0xff]  ;;  %2933 = vst.msk [vmem:[#allocation4 + $0x140] sm:$0xff] %vm2156_vm11, %v2901_v40  ;;  %v3540_v0 = vld [vmem:[#allocation3 + $0xb2] sm:$0xff] }
 0x2ea   : > { %3571 = vst.msk [vmem:[#allocation4 + $0x100] sm:$0xff] %vm2156_vm11, %v3539_v16  ;;  %v3542_v41 = vld [vmem:[#allocation3 + $0xca] sm:$0xff]  ;;  %3572 = vst.msk [vmem:[#allocation4 + $0x118] sm:$0xff] %vm2156_vm11, %v3540_v0 }
 0x2eb   : > { %3574 = vst.msk [vmem:[#allocation4 + $0x148] sm:$0xff] %vm2156_vm11, %v3542_v41  ;;  %2407 = vrot.lane.b32.xlu1 %v6712_v4, %s5261_s7 }
 0x2f4   : > { %v5063_v29 = vpop.f32.mrf.mxu0 }
 0x2f5   : > { %v2070_v46 = vadd.f32 %v5063_v29, %v6519_v56 }
 0x2f6   : > { %v2061_v20 = vpop.f32.mrf.mxu0 }
 0x2f7   : > { %v2142_v47 = vmax.f32 %v2070_v46, 0.0  ;;  %v2062_v50 = vadd.f32 %v6519_v56, %v2061_v20 }
 0x2f8   : > { %v5064_v51 = vpop.f32.mrf.mxu0 }
 0x2f9   : > { %2231 = vst.msk [vmem:[#allocation3 + $0xf1] sm:$0xff] %vm2156_vm11, %v2142_v47  ;;  %v2140_v22 = vmax.f32 %v2062_v50, 0.0  ;;  %v2073_v23 = vadd.f32 %v5064_v51, %v6519_v56  ;;  %v5172_v50 = vld [vmem:[%s7774_s3 + $0x78] sm:$0xff]  }
 0x2fa   : > { %v2064_v62 = vpop.f32.mrf.mxu0  ;;  %v5173_v51 = vld [vmem:[%s7774_s3 + $0x38] sm:$0xff]   ;;  %4908 = vmatprep.subr.bf16.mxu1 %v5172_v50 }
 0x2fb   : > { %2229 = vst.msk [vmem:[#allocation3 + $0xd9] sm:$0xff] %vm2156_vm11, %v2140_v22  ;;  %v2143_v54 = vmax.f32 %v2073_v23, 0.0  ;;  %v2065_v55 = vadd.f32 %v6519_v56, %v2064_v62  ;;  %4909 = vmatpush3.bf16.msra.mxu1 %v5173_v51 }
 0x2fd   : > { %2232 = vst.msk [vmem:[#allocation3 + $0xf9] sm:$0xff] %vm2156_vm11, %v2143_v54  ;;  %v2141_v63 = vmax.f32 %v2065_v55, 0.0 }
 0x2ff   : > { %2230 = vst.msk [vmem:[#allocation3 + $0xe1] sm:$0xff] %vm2156_vm11, %v2141_v63 }
 0x300   : > { %v6726_v34 = vld [vmem:[#allocation3 + $0xf0] sm:$0xff] }
 0x301   : > { %v2906_v3 = vld [vmem:[#allocation3 + $0xf1] sm:$0xff]  ;;  %2297 = vst.msk [vmem:[#allocation4 + $0x1e0] sm:$0xff] %vm2156_vm11, %v6726_v34 }
 0x302   : > { %2938 = vst.msk [vmem:[#allocation4 + $0x1b8] sm:$0xff] %vm2156_vm11, %v2906_v3  ;;  %v6731_v36 = vld [vmem:[#allocation3 + $0xd9] sm:$0xff]  ;;  %v6747_v38 = vld [vmem:[#allocation3 + $0xf1] sm:$0xff] }
 0x303   : > { %v6733_v37 = vld [vmem:[#allocation3 + $0xd8] sm:$0xff]  ;;  %2409 = vrot.lane.b32.xlu0 %v6731_v36, %s5261_s7  ;;  %v5174_v3 = vld [vmem:[%s7774_s3 + $0x70] sm:$0xff]  }
 0x304   : > { %v2904_v58 = vld [vmem:[#allocation3 + $0xd9] sm:$0xff]  ;;  %2295 = vst.msk [vmem:[#allocation4 + $0x1b0] sm:$0xff] %vm2156_vm11, %v6733_v37  ;;  %4910 = vmatprep.subr.bf16.mxu1 %v5174_v3 }
 0x305   : > { %2936 = vst.msk [vmem:[#allocation4 + $0x188] sm:$0xff] %vm2156_vm11, %v2904_v58  ;;  %v6740_v44 = vld [vmem:[#allocation3 + $0xf8] sm:$0xff]  ;;  %v2378_v24 = vpop.permute.xlu0 %2377  ;;  %v5175_v58 = vld [vmem:[%s7774_s3 + $0x30] sm:$0xff]  }
 0x306   : > { %2298 = vst.msk [vmem:[#allocation4 + $0x1f8] sm:$0xff] %vm2156_vm11, %v6740_v44  ;;  %v2907_v49 = vld [vmem:[#allocation3 + $0xf9] sm:$0xff]  ;;  %v6745_v53 = vld [vmem:[#allocation3 + $0xe1] sm:$0xff]  ;;  %4911 = vmatpush3.bf16.msra.mxu1 %v5175_v58 }
 0x307   : > { %v3545_v27 = vld [vmem:[#allocation3 + $0xf2] sm:$0xff]  ;;  %2472 = vst.msk [vmem:[#allocation4 + $0x30] sm:$0xff] %vm2469_vm13, %v2378_v24  ;;  %v6749_v40 = vld [vmem:[#allocation3 + $0xe0] sm:$0xff]  ;;  %2411 = vrot.lane.b32.xlu1 %v6745_v53, %s5261_s7  ;;  %2413 = vrot.lane.b32.xlu0 %v6747_v38, %s5261_s7 }
 0x308   : > { %2939 = vst.msk [vmem:[#allocation4 + $0x1d0] sm:$0xff] %vm2156_vm11, %v2907_v49  ;;  %3577 = vst.msk [vmem:[#allocation4 + $0x190] sm:$0xff] %vm2156_vm11, %v3545_v27  ;;  %v2905_v16 = vld [vmem:[#allocation3 + $0xe1] sm:$0xff]  ;;  %v6765_v33 = vld [vmem:[#allocation3 + $0xf9] sm:$0xff] }
 0x309   : > { %2296 = vst.msk [vmem:[#allocation4 + $0x1c8] sm:$0xff] %vm2156_vm11, %v6749_v40  ;;  %v3543_v0 = vld [vmem:[#allocation3 + $0xda] sm:$0xff]  ;;  %2937 = vst.msk [vmem:[#allocation4 + $0x1a0] sm:$0xff] %vm2156_vm11, %v2905_v16  ;;  %v3544_v41 = vld [vmem:[#allocation3 + $0xe2] sm:$0xff]  ;;  %v2380_v28 = vpop.permute.xlu1 %2379  ;;  %v2382_v9 = vpop.permute.xlu0 %2381 }
 0x30a   : > { %3575 = vst.msk [vmem:[#allocation4 + $0x160] sm:$0xff] %vm2156_vm11, %v3543_v0  ;;  %v3546_v7 = vld [vmem:[#allocation3 + $0xfa] sm:$0xff]  ;;  %3576 = vst.msk [vmem:[#allocation4 + $0x178] sm:$0xff] %vm2156_vm11, %v3544_v41  ;;  %v5176_v27 = vld [vmem:[%s7774_s3 + $0x68] sm:$0xff]  }
 0x30b   : > { %3578 = vst.msk [vmem:[#allocation4 + $0x1a8] sm:$0xff] %vm2156_vm11, %v3546_v7  ;;  %2415 = vrot.lane.b32.xlu1 %v6765_v33, %s5261_s7  ;;  %v5177_v16 = vld [vmem:[%s7774_s3 + $0x28] sm:$0xff]   ;;  %4912 = vmatprep.subr.bf16.mxu1 %v5176_v27 }
 0x30c   : > { %2473 = vst.msk [vmem:[#allocation4 + $0x48] sm:$0xff] %vm2469_vm13, %v2380_v28  ;;  %2474 = vst.msk [vmem:[#allocation4 + $0x60] sm:$0xff] %vm2469_vm13, %v2382_v9  ;;  %4913 = vmatpush3.bf16.msra.mxu1 %v5177_v16  ;;  %v2953_v27 = vld [vmem:[#allocation3 + $0x22] sm:$0xff]  ;;  %v5182_v16 = vld [vmem:[%s7774_s3 + $0x50] sm:$0xff]  }
 0x30d   : > { %v2384_v14 = vpop.permute.xlu1 %2383 }
 0x30e   : > { %2475 = vst.msk [vmem:[#allocation4 + $0x78] sm:$0xff] %vm2469_vm13, %v2384_v14 }
 0x314   : > { %v5067_v21 = vpop.f32.mrf.mxu0 }
 0x315   : > { %v2086_v29 = vadd.f32 %v5067_v21, %v6519_v56 }
 0x316   : > { %v2077_v46 = vpop.f32.mrf.mxu0 }
 0x317   : > { %v2146_v20 = vmax.f32 %v2086_v29, 0.0  ;;  %v2078_v47 = vadd.f32 %v6519_v56, %v2077_v46  ;;  %v5178_v29 = vld [vmem:[%s7774_s3 + $0x60] sm:$0xff]  }
 0x318   : > { %v5068_v22 = vpop.f32.mrf.mxu0  ;;  %v5179_v46 = vld [vmem:[%s7774_s3 + $0x20] sm:$0xff]   ;;  %4914 = vmatprep.subr.bf16.mxu1 %v5178_v29 }
 0x319   : > { %2235 = vst.msk [vmem:[#allocation3 + $0x121] sm:$0xff] %vm2156_vm11, %v2146_v20  ;;  %v2144_v23 = vmax.f32 %v2078_v47, 0.0  ;;  %v2089_v62 = vadd.f32 %v5068_v22, %v6519_v56  ;;  %4915 = vmatpush3.bf16.msra.mxu1 %v5179_v46  ;;  %v2502_v29 = vld [vmem:[#allocation3 + $0x2] sm:$0xff]  ;;  %v2503_v46 = vld [vmem:[#allocation3 + $0xa] sm:$0xff] }
 0x31a   : > { %v2080_v54 = vpop.f32.mrf.mxu0 }
 0x31b   : > { %2233 = vst.msk [vmem:[#allocation3 + $0x109] sm:$0xff] %vm2156_vm11, %v2144_v23  ;;  %v2147_v55 = vmax.f32 %v2089_v62, 0.0  ;;  %v2081_v63 = vadd.f32 %v6519_v56, %v2080_v54  ;;  %v5180_v54 = vld [vmem:[%s7774_s3 + $0x58] sm:$0xff]  }
 0x31c   : > { %4916 = vmatprep.subr.bf16.mxu1 %v5180_v54 }
 0x31d   : > { %2236 = vst.msk [vmem:[#allocation3 + $0x129] sm:$0xff] %vm2156_vm11, %v2147_v55  ;;  %v2145_v24 = vmax.f32 %v2081_v63, 0.0  ;;  %v2386_v49 = vpop.permute.xlu0 %2385  ;;  %v5181_v55 = vld [vmem:[%s7774_s3 + $0x18] sm:$0xff]  }
 0x31e   : > { %2476 = vst.msk [vmem:[#allocation4 + $0x90] sm:$0xff] %vm2469_vm13, %v2386_v49  ;;  %v2952_v49 = vld [vmem:[#allocation3 + $0x1a] sm:$0xff]  ;;  %4917 = vmatpush3.bf16.msra.mxu1 %v5181_v55 }
 0x31f   : > { %2234 = vst.msk [vmem:[#allocation3 + $0x111] sm:$0xff] %vm2156_vm11, %v2145_v24  ;;  %4918 = vmatprep.subr.bf16.mxu1 %v5182_v16 }
 0x320   : > { %v6797_v0 = vld [vmem:[#allocation3 + $0x120] sm:$0xff] }
 0x321   : > { %v6799_v41 = vld [vmem:[#allocation3 + $0x121] sm:$0xff]  ;;  %v2388_v7 = vpop.permute.xlu1 %2387  ;;  %v2390_v28 = vpop.permute.xlu0 %2389  ;;  %2301 = vst.msk [vmem:[#allocation4 + $0x240] sm:$0xff] %vm2156_vm11, %v6797_v0 }
 0x322   : > { %2942 = vst.msk [vmem:[#allocation4 + $0x218] sm:$0xff] %vm2156_vm11, %v6799_v41  ;;  %v6807_v9 = vld [vmem:[#allocation3 + $0x109] sm:$0xff]  ;;  %v2333_v23 = vld [vmem:[#allocation3 + $0x121] sm:$0xff] }
 0x323   : > { %2477 = vst.msk [vmem:[#allocation4 + $0xa8] sm:$0xff] %vm2469_vm13, %v2388_v7  ;;  %2478 = vst.msk [vmem:[#allocation4 + $0xc0] sm:$0xff] %vm2469_vm13, %v2390_v28  ;;  %v6809_v14 = vld [vmem:[#allocation3 + $0x108] sm:$0xff]  ;;  %2417 = vrot.lane.b32.xlu0 %v6807_v9, %s5261_s7  ;;  %v5183_v7 = vld [vmem:[%s7774_s3 + $0x10] sm:$0xff]  }
 0x324   : > { %v2908_v21 = vld [vmem:[#allocation3 + $0x109] sm:$0xff]  ;;  %2299 = vst.msk [vmem:[#allocation4 + $0x210] sm:$0xff] %vm2156_vm11, %v6809_v14  ;;  %4919 = vmatpush3.bf16.msra.mxu1 %v5183_v7 }
 0x325   : > { %2940 = vst.msk [vmem:[#allocation4 + $0x1e8] sm:$0xff] %vm2156_vm11, %v2908_v21  ;;  %v6822_v20 = vld [vmem:[#allocation3 + $0x129] sm:$0xff]  ;;  %v2392_v47 = vpop.permute.xlu1 %2391 }
 0x326   : > { %2943 = vst.msk [vmem:[#allocation4 + $0x230] sm:$0xff] %vm2156_vm11, %v6822_v20  ;;  %v2270_v50 = vld [vmem:[#allocation3 + $0x128] sm:$0xff]  ;;  %v6827_v22 = vld [vmem:[#allocation3 + $0x111] sm:$0xff] }
 0x327   : > { %v3549_v51 = vld [vmem:[#allocation3 + $0x122] sm:$0xff]  ;;  %2479 = vst.msk [vmem:[#allocation4 + $0xd8] sm:$0xff] %vm2469_vm13, %v2392_v47  ;;  %v6829_v62 = vld [vmem:[#allocation3 + $0x110] sm:$0xff]  ;;  %2419 = vrot.lane.b32.xlu1 %v6827_v22, %s5261_s7  ;;  %2421 = vrot.lane.b32.xlu0 %v2333_v23, %s5261_s7 }
 0x328   : > { %2302 = vst.msk [vmem:[#allocation4 + $0x258] sm:$0xff] %vm2156_vm11, %v2270_v50  ;;  %3581 = vst.msk [vmem:[#allocation4 + $0x1f0] sm:$0xff] %vm2156_vm11, %v3549_v51  ;;  %v2909_v63 = vld [vmem:[#allocation3 + $0x111] sm:$0xff]  ;;  %v5184_v28 = vld [vmem:[%s7774_s3 + $0x48] sm:$0xff]  }
 0x329   : > { %2300 = vst.msk [vmem:[#allocation4 + $0x228] sm:$0xff] %vm2156_vm11, %v6829_v62  ;;  %v3547_v3 = vld [vmem:[#allocation3 + $0x10a] sm:$0xff]  ;;  %v3548_v58 = vld [vmem:[#allocation3 + $0x112] sm:$0xff]  ;;  %2941 = vst.msk [vmem:[#allocation4 + $0x200] sm:$0xff] %vm2156_vm11, %v2909_v63  ;;  %4920 = vmatprep.subr.bf16.mxu1 %v5184_v28 }
 0x32a   : > { %3579 = vst.msk [vmem:[#allocation4 + $0x1c0] sm:$0xff] %vm2156_vm11, %v3547_v3  ;;  %3580 = vst.msk [vmem:[#allocation4 + $0x1d8] sm:$0xff] %vm2156_vm11, %v3548_v58  ;;  %v3550_v24 = vld [vmem:[#allocation3 + $0x12a] sm:$0xff]  ;;  %v5186_v47 = vld [vmem:[%s7774_s3 + $0x40] sm:$0xff]  }
 0x32b   : > { %3582 = vst.msk [vmem:[#allocation4 + $0x208] sm:$0xff] %vm2156_vm11, %v3550_v24  ;;  %3016 = vrot.lane.b32.xlu1 %v2952_v49, %s5261_s7  ;;  %3018 = vrot.lane.b32.xlu0 %v2953_v27, %s5261_s7  ;;  %v5185_v21 = vld [vmem:[%s7774_s3 + $0x8] sm:$0xff]   ;;  %v5187_v50 = vld [vmem:[%s7774_s3] sm:$0xff]   ;;  %v2954_v63 = vld [vmem:[#allocation3 + $0x32] sm:$0xff] }
 0x32c   : > { %4921 = vmatpush3.bf16.msra.mxu1 %v5185_v21  ;;  %v2959_v3 = vld [vmem:[#allocation3 + $0x6a] sm:$0xff] }
 0x32d   : > { %4922 = vmatprep.subr.bf16.mxu1 %v5186_v47 }
 0x32f   : > { %3209 = vrot.lane.b32.xlu1 %v6538_v11, %s5263_s8  ;;  %3211 = vrot.lane.b32.xlu0 %v6549_v18, %s5263_s8 }
 0x330   : > { %4923 = vmatpush3.bf16.msra.mxu1 %v5187_v50 }
 0x333   : > { %2566 = vrot.lane.b32.xlu1 %v2502_v29, %s5263_s8  ;;  %2568 = vrot.lane.b32.xlu0 %v2503_v46, %s5263_s8 }
 0x335   : > { %v2394_v51 = vpop.permute.xlu0 %2393 }
 0x336   : > { %2480 = vst.msk [vmem:[#allocation4 + $0xf0] sm:$0xff] %vm2469_vm13, %v2394_v51 }
 0x337   : > { %3401 = vrot.lane.b32.xlu1 %v6553_v42, %s5264_s25  ;;  %3403 = vrot.lane.b32.xlu0 %v6566_v19, %s5264_s25  ;;  %v2955_v42 = vld [vmem:[#allocation3 + $0x3a] sm:$0xff] }
 0x339   : > { %v2396_v23 = vpop.permute.xlu1 %2395  ;;  %v2398_v54 = vpop.permute.xlu0 %2397 }
 0x33a   : > { %2481 = vst.msk [vmem:[#allocation4 + $0x108] sm:$0xff] %vm2469_vm13, %v2396_v23  ;;  %2482 = vst.msk [vmem:[#allocation4 + $0x120] sm:$0xff] %vm2469_vm13, %v2398_v54  ;;  %v6993_v54 = vld [vmem:[#allocation3 + $0xaa] sm:$0xff] }
 0x33b   : > { %2759 = vrot.lane.b32.xlu1 %v6543_v15, %s5264_s25  ;;  %2761 = vrot.lane.b32.xlu0 %v6555_v43, %s5264_s25  ;;  %v2956_v15 = vld [vmem:[#allocation3 + $0x4a] sm:$0xff]  ;;  %v2957_v43 = vld [vmem:[#allocation3 + $0x52] sm:$0xff] }
 0x33d   : > { %v2400_v55 = vpop.permute.xlu1 %2399 }
 0x33e   : > { %2483 = vst.msk [vmem:[#allocation4 + $0x138] sm:$0xff] %vm2469_vm13, %v2400_v55 }
 0x33f   : > { %3020 = vrot.lane.b32.xlu1 %v2954_v63, %s5261_s7  ;;  %3022 = vrot.lane.b32.xlu0 %v2955_v42, %s5261_s7 }
 0x343   : > { %3213 = vrot.lane.b32.xlu1 %v6585_v61, %s5263_s8  ;;  %3215 = vrot.lane.b32.xlu0 %v6600_v48, %s5263_s8 }
 0x347   : > { %2570 = vrot.lane.b32.xlu1 %v2952_v49, %s5263_s8  ;;  %2572 = vrot.lane.b32.xlu0 %v2953_v27, %s5263_s8 }
 0x34b   : > { %3405 = vrot.lane.b32.xlu1 %v6583_v13, %s5264_s25  ;;  %3407 = vrot.lane.b32.xlu0 %v6596_v45, %s5264_s25  ;;  %v2958_v45 = vld [vmem:[#allocation3 + $0x62] sm:$0xff] }
 0x34f   : > { %2763 = vrot.lane.b32.xlu1 %v6538_v11, %s5264_s25  ;;  %2765 = vrot.lane.b32.xlu0 %v6549_v18, %s5264_s25 }
 0x353   : > { %3024 = vrot.lane.b32.xlu1 %v2956_v15, %s5261_s7  ;;  %3026 = vrot.lane.b32.xlu0 %v2957_v43, %s5261_s7 }
 0x355   : > { %v2402_v19 = vpop.permute.xlu0 %2401 }
 0x356   : > { %2484 = vst.msk [vmem:[#allocation4 + $0x150] sm:$0xff] %vm2469_vm13, %v2402_v19 }
 0x357   : > { %3217 = vrot.lane.b32.xlu1 %v6578_v35, %s5263_s8  ;;  %3219 = vrot.lane.b32.xlu0 %v6592_v1, %s5263_s8 }
 0x359   : > { %v2404_v13 = vpop.permute.xlu1 %2403  ;;  %v2406_v11 = vpop.permute.xlu0 %2405 }
 0x35a   : > { %2485 = vst.msk [vmem:[#allocation4 + $0x168] sm:$0xff] %vm2469_vm13, %v2404_v13  ;;  %2486 = vst.msk [vmem:[#allocation4 + $0x180] sm:$0xff] %vm2469_vm13, %v2406_v11 }
 0x35b   : > { %2574 = vrot.lane.b32.xlu1 %v2954_v63, %s5263_s8  ;;  %2576 = vrot.lane.b32.xlu0 %v2955_v42, %s5263_s8 }
 0x35d   : > { %v2408_v18 = vpop.permute.xlu1 %2407 }
 0x35e   : > { %2487 = vst.msk [vmem:[#allocation4 + $0x198] sm:$0xff] %vm2469_vm13, %v2408_v18 }
 0x35f   : > { %3409 = vrot.lane.b32.xlu1 %v6598_v59, %s5264_s25  ;;  %3411 = vrot.lane.b32.xlu0 %v6614_v26, %s5264_s25  ;;  %v2960_v26 = vld [vmem:[#allocation3 + $0x7a] sm:$0xff] }
 0x363   : > { %2767 = vrot.lane.b32.xlu1 %v6585_v61, %s5264_s25  ;;  %2769 = vrot.lane.b32.xlu0 %v6600_v48, %s5264_s25 }
 0x367   : > { %3028 = vrot.lane.b32.xlu1 %v2958_v45, %s5261_s7  ;;  %3030 = vrot.lane.b32.xlu0 %v2959_v3, %s5261_s7 }
 0x36b   : > { %3221 = vrot.lane.b32.xlu1 %v6633_v6, %s5263_s8  ;;  %3223 = vrot.lane.b32.xlu0 %v6648_v32, %s5263_s8 }
 0x36f   : > { %2578 = vrot.lane.b32.xlu1 %v2956_v15, %s5263_s8  ;;  %2580 = vrot.lane.b32.xlu0 %v2957_v43, %s5263_s8 }
 0x373   : > { %3413 = vrot.lane.b32.xlu1 %v6631_v5, %s5264_s25  ;;  %3415 = vrot.lane.b32.xlu0 %v6644_v10, %s5264_s25  ;;  %v2961_v5 = vld [vmem:[#allocation3 + $0x82] sm:$0xff] }
 0x375   : > { %v2410_v61 = vpop.permute.xlu0 %2409 }
 0x376   : > { %2488 = vst.msk [vmem:[#allocation4 + $0x1b0] sm:$0xff] %vm2469_vm13, %v2410_v61 }
 0x377   : > { %2771 = vrot.lane.b32.xlu1 %v6578_v35, %s5264_s25  ;;  %2773 = vrot.lane.b32.xlu0 %v6592_v1, %s5264_s25  ;;  %v6958_v35 = vld [vmem:[#allocation3 + $0x92] sm:$0xff]  ;;  %v6960_v1 = vld [vmem:[#allocation3 + $0x9a] sm:$0xff] }
 0x379   : > { %v2412_v59 = vpop.permute.xlu1 %2411  ;;  %v2414_v48 = vpop.permute.xlu0 %2413 }
 0x37a   : > { %2489 = vst.msk [vmem:[#allocation4 + $0x1c8] sm:$0xff] %vm2469_vm13, %v2412_v59  ;;  %2490 = vst.msk [vmem:[#allocation4 + $0x1e0] sm:$0xff] %vm2469_vm13, %v2414_v48 }
 0x37b   : > { %3032 = vrot.lane.b32.xlu1 %v2960_v26, %s5261_s7  ;;  %3034 = vrot.lane.b32.xlu0 %v2961_v5, %s5261_s7 }
 0x37d   : > { %v2416_v10 = vpop.permute.xlu1 %2415 }
 0x37e   : > { %2491 = vst.msk [vmem:[#allocation4 + $0x1f8] sm:$0xff] %vm2469_vm13, %v2416_v10  ;;  %v5191_v10 = vld [vmem:[%s7773_s2] ss:$0 sm:$0xff] }
 0x37f   : > { %3225 = vrot.lane.b32.xlu1 %v6626_v2, %s5263_s8  ;;  %3227 = vrot.lane.b32.xlu0 %v6640_v8, %s5263_s8 }
 0x383   : > { %2582 = vrot.lane.b32.xlu1 %v2958_v45, %s5263_s8  ;;  %2584 = vrot.lane.b32.xlu0 %v2959_v3, %s5263_s8 }
 0x387   : > { %3417 = vrot.lane.b32.xlu1 %v6646_v31, %s5264_s25  ;;  %3419 = vrot.lane.b32.xlu0 %v6662_v30, %s5264_s25  ;;  %v5071_v31 = vpop.f32.mrf.mxu0 }
 0x388   : > { %v2102_v58 = vadd.f32 %v5071_v31, %v6519_v56 }
 0x389   : > { %v2093_v30 = vpop.f32.mrf.mxu0 }
 0x38a   : > { %v2150_v24 = vmax.f32 %v2102_v58, 0.0 }
 0x38b   : > { %2775 = vrot.lane.b32.xlu1 %v6633_v6, %s5264_s25  ;;  %2777 = vrot.lane.b32.xlu0 %v6648_v32, %s5264_s25  ;;  %v2094_v6 = vadd.f32 %v6519_v56, %v2093_v30  ;;  %v5072_v32 = vpop.f32.mrf.mxu0 }
 0x38c   : > { %2239 = vst.msk [vmem:[#allocation3 + $0x151] sm:$0xff] %vm2156_vm11, %v2150_v24  ;;  %v2105_v27 = vadd.f32 %v5072_v32, %v6519_v56 }
 0x38d   : > { %v2148_v49 = vmax.f32 %v2094_v6, 0.0  ;;  %v2096_v7 = vpop.f32.mrf.mxu0 }
 0x38e   : > { %v2151_v28 = vmax.f32 %v2105_v27, 0.0  ;;  %v2097_v21 = vadd.f32 %v6519_v56, %v2096_v7 }
 0x38f   : > { %3036 = vrot.lane.b32.xlu1 %v6958_v35, %s5261_s7  ;;  %3038 = vrot.lane.b32.xlu0 %v6960_v1, %s5261_s7  ;;  %2237 = vst.msk [vmem:[#allocation3 + $0x139] sm:$0xff] %vm2156_vm11, %v2148_v49 }
 0x390   : > { %2240 = vst.msk [vmem:[#allocation3 + $0x159] sm:$0xff] %vm2156_vm11, %v2151_v28  ;;  %v2149_v29 = vmax.f32 %v2097_v21, 0.0 }
 0x392   : > { %2238 = vst.msk [vmem:[#allocation3 + $0x141] sm:$0xff] %vm2156_vm11, %v2149_v29  ;;  %v7066_v29 = vld [vmem:[#allocation3 + $0xc2] sm:$0xff] }
 0x393   : > { %3229 = vrot.lane.b32.xlu1 %v6683_v17, %s5263_s8  ;;  %3231 = vrot.lane.b32.xlu0 %v6698_v39, %s5263_s8  ;;  %v2273_v45 = vld [vmem:[#allocation3 + $0x150] sm:$0xff] }
 0x394   : > { %2305 = vst.msk [vmem:[#allocation4 + $0x2a0] sm:$0xff] %vm2156_vm11, %v2273_v45 }
 0x395   : > { %v2418_v16 = vpop.permute.xlu0 %2417 }
 0x396   : > { %2492 = vst.msk [vmem:[#allocation4 + $0x210] sm:$0xff] %vm2469_vm13, %v2418_v16  ;;  %v2271_v13 = vld [vmem:[#allocation3 + $0x138] sm:$0xff] }
 0x397   : > { %2586 = vrot.lane.b32.xlu1 %v2960_v26, %s5263_s8  ;;  %2588 = vrot.lane.b32.xlu0 %v2961_v5, %s5263_s8  ;;  %v7019_v42 = vld [vmem:[#allocation3 + $0x152] sm:$0xff]  ;;  %v7021_v15 = vld [vmem:[#allocation3 + $0x15a] sm:$0xff]  ;;  %2303 = vst.msk [vmem:[#allocation4 + $0x270] sm:$0xff] %vm2156_vm11, %v2271_v13  ;;  %v5075_v5 = vpop.f32.mrf.mxu0 }
 0x398   : > { %3585 = vst.msk [vmem:[#allocation4 + $0x250] sm:$0xff] %vm2156_vm11, %v7019_v42  ;;  %3586 = vst.msk [vmem:[#allocation4 + $0x268] sm:$0xff] %vm2156_vm11, %v7021_v15  ;;  %v2274_v3 = vld [vmem:[#allocation3 + $0x158] sm:$0xff] }
 0x399   : > { %v2420_v46 = vpop.permute.xlu1 %2419  ;;  %v2422_v47 = vpop.permute.xlu0 %2421  ;;  %v7001_v55 = vld [vmem:[#allocation3 + $0x141] sm:$0xff]  ;;  %2306 = vst.msk [vmem:[#allocation4 + $0x2b8] sm:$0xff] %vm2156_vm11, %v2274_v3 }
 0x39a   : > { %2493 = vst.msk [vmem:[#allocation4 + $0x228] sm:$0xff] %vm2469_vm13, %v2420_v46  ;;  %2494 = vst.msk [vmem:[#allocation4 + $0x240] sm:$0xff] %vm2469_vm13, %v2422_v47  ;;  %v7003_v63 = vld [vmem:[#allocation3 + $0x13a] sm:$0xff]  ;;  %v3552_v18 = vld [vmem:[#allocation3 + $0x142] sm:$0xff] }
 0x39b   : > { %3421 = vrot.lane.b32.xlu1 %v6681_v60, %s5264_s25  ;;  %3423 = vrot.lane.b32.xlu0 %v6694_v57, %s5264_s25  ;;  %v6995_v60 = vld [vmem:[#allocation3 + $0x139] sm:$0xff]  ;;  %2945 = vst.msk [vmem:[#allocation4 + $0x260] sm:$0xff] %vm2156_vm11, %v7001_v55  ;;  %3583 = vst.msk [vmem:[#allocation4 + $0x220] sm:$0xff] %vm2156_vm11, %v7003_v63 }
 0x39c   : > { %v6999_v57 = vld [vmem:[#allocation3 + $0xb2] sm:$0xff]  ;;  %2944 = vst.msk [vmem:[#allocation4 + $0x248] sm:$0xff] %vm2156_vm11, %v6995_v60  ;;  %v2272_v11 = vld [vmem:[#allocation3 + $0x140] sm:$0xff]  ;;  %3584 = vst.msk [vmem:[#allocation4 + $0x238] sm:$0xff] %vm2156_vm11, %v3552_v18 }
 0x39d   : > { %v3017_v56 = vpop.permute.xlu1 %3016  ;;  %v3019_v50 = vpop.permute.xlu0 %3018  ;;  %2304 = vst.msk [vmem:[#allocation4 + $0x288] sm:$0xff] %vm2156_vm11, %v2272_v11 }
 0x39e   : > { %3112 = vst.msk [vmem:[#allocation4 + $0x8] sm:$0xff] %vm2469_vm13, %v3017_v56  ;;  %3113 = vst.msk [vmem:[#allocation4 + $0x20] sm:$0xff] %vm2469_vm13, %v3019_v50 }
 0x39f   : > { %2779 = vrot.lane.b32.xlu1 %v6626_v2, %s5264_s25  ;;  %2781 = vrot.lane.b32.xlu0 %v6640_v8, %s5264_s25  ;;  %v7011_v2 = vld [vmem:[#allocation3 + $0x151] sm:$0xff]  ;;  %v7017_v8 = vld [vmem:[#allocation3 + $0x159] sm:$0xff] }
 0x3a0   : > { %2946 = vst.msk [vmem:[#allocation4 + $0x278] sm:$0xff] %vm2156_vm11, %v7011_v2  ;;  %2947 = vst.msk [vmem:[#allocation4 + $0x290] sm:$0xff] %vm2156_vm11, %v7017_v8 }
 0x3a1   : > { %v3210_v51 = vpop.permute.xlu1 %3209  ;;  %v3212_v23 = vpop.permute.xlu0 %3211 }
 0x3a2   : > { %3305 = vst.msk [vmem:[#allocation4 + $0x8] sm:$0xff] %vm2662_vm14, %v3210_v51  ;;  %3306 = vst.msk [vmem:[#allocation4 + $0x20] sm:$0xff] %vm2662_vm14, %v3212_v23 }
 0x3a3   : > { %3040 = vrot.lane.b32.xlu1 %v6993_v54, %s5261_s7  ;;  %3042 = vrot.lane.b32.xlu0 %v6999_v57, %s5261_s7 }
 0x3a5   : > { %v2567_v43 = vpop.permute.xlu1 %2566  ;;  %v2569_v19 = vpop.permute.xlu0 %2568 }
 0x3a6   : > { %2663 = vst.msk [vmem:[#allocation4] sm:$0xff] %vm2662_vm14, %v2567_v43  ;;  %2664 = vst.msk [vmem:[#allocation4 + $0x18] sm:$0xff] %vm2662_vm14, %v2569_v19 }
 0x3a7   : > { %3233 = vrot.lane.b32.xlu1 %v6676_v25, %s5263_s8  ;;  %3235 = vrot.lane.b32.xlu0 %v6690_v52, %s5263_s8 }
 0x3a9   : > { %v3402_v61 = vpop.permute.xlu1 %3401  ;;  %v3404_v59 = vpop.permute.xlu0 %3403 }
 0x3aa   : > { %3497 = vst.msk [vmem:[#allocation4 + $0x8] sm:$0xff] %vm2855_vm15, %v3402_v61  ;;  %3498 = vst.msk [vmem:[#allocation4 + $0x20] sm:$0xff] %vm2855_vm15, %v3404_v59 }
 0x3ab   : > { %2590 = vrot.lane.b32.xlu1 %v6958_v35, %s5263_s8  ;;  %2592 = vrot.lane.b32.xlu0 %v6960_v1, %s5263_s8  ;;  %v2118_v35 = vadd.f32 %v5191_v10, %v5075_v5 }
 0x3ad   : > { %v2760_v48 = vpop.permute.xlu1 %2759  ;;  %v2762_v26 = vpop.permute.xlu0 %2761  ;;  %v2154_v6 = vmax.f32 %v2118_v35, 0.0 }
 0x3ae   : > { %2856 = vst.msk [vmem:[#allocation4] sm:$0xff] %vm2855_vm15, %v2760_v48  ;;  %2857 = vst.msk [vmem:[#allocation4 + $0x18] sm:$0xff] %vm2855_vm15, %v2762_v26 }
 0x3af   : > { %3425 = vrot.lane.b32.xlu1 %v6696_v12, %s5264_s25  ;;  %3427 = vrot.lane.b32.xlu0 %v6712_v4, %s5264_s25  ;;  %v2109_v12 = vpop.f32.mrf.mxu0  ;;  %2243 = vst.msk [vmem:[#allocation3 + $0x181] sm:$0xff] %vm2156_vm11, %v2154_v6 }
 0x3b0   : > { %v2110_v4 = vadd.f32 %v5191_v10, %v2109_v12 }
 0x3b1   : > { %v3021_v31 = vpop.permute.xlu1 %3020  ;;  %v3023_v1 = vpop.permute.xlu0 %3022  ;;  %v3786_v58 = vld [vmem:[#allocation4 + $0x8] sm:$0xff]  ;;  %v3789_v30 = vld [vmem:[#allocation4 + $0x20] sm:$0xff] }
 0x3b2   : > { %3114 = vst.msk [vmem:[#allocation4 + $0x38] sm:$0xff] %vm2469_vm13, %v3021_v31  ;;  %3115 = vst.msk [vmem:[#allocation4 + $0x50] sm:$0xff] %vm2469_vm13, %v3023_v1  ;;  %v3882_v24 = vpack.c.bf16 %v3789_v30, %v3786_v58  ;;  %v5076_v32 = vpop.f32.mrf.mxu0  ;;  %v2152_v28 = vmax.f32 %v2110_v4, 0.0  ;;  %v7143_v30 = vld [vmem:[#allocation3 + $0xda] sm:$0xff] }
 0x3b3   : > { %2783 = vrot.lane.b32.xlu1 %v6683_v17, %s5264_s25  ;;  %2785 = vrot.lane.b32.xlu0 %v6698_v39, %s5264_s25  ;;  %v2121_v21 = vadd.f32 %v5191_v10, %v5076_v32  ;;  %v7068_v17 = vld [vmem:[#allocation3 + $0xca] sm:$0xff] }
 0x3b4   : > { %4167 = vmatprep.mubr.bf16.mxu1 %v3882_v24  ;;  %v2112_v46 = vpop.f32.mrf.mxu0  ;;  %2241 = vst.msk [vmem:[#allocation3 + $0x169] sm:$0xff] %vm2156_vm11, %v2152_v28  ;;  %v7145_v24 = vld [vmem:[#allocation3 + $0xe2] sm:$0xff] }
 0x3b5   : > { %v3214_v49 = vpop.permute.xlu1 %3213  ;;  %v3216_v27 = vpop.permute.xlu0 %3215  ;;  %v3785_v16 = vld [vmem:[#allocation4] sm:$0xff]  ;;  %v3788_v7 = vld [vmem:[#allocation4 + $0x18] sm:$0xff]  ;;  %v2155_v47 = vmax.f32 %v2121_v21, 0.0  ;;  %v2113_v56 = vadd.f32 %v5191_v10, %v2112_v46 }
 0x3b6   : > { %3307 = vst.msk [vmem:[#allocation4 + $0x38] sm:$0xff] %vm2662_vm14, %v3214_v49  ;;  %3308 = vst.msk [vmem:[#allocation4 + $0x50] sm:$0xff] %vm2662_vm14, %v3216_v27  ;;  %v3881_v39 = vpack.c.bf16 %v3788_v7, %v3785_v16  ;;  %v7121_v5 = vld [vmem:[#allocation3 + $0x181] sm:$0xff]  ;;  %v5188_v27 = vld [vmem:[%s7774_s3 + $0x90] ss:$0 sps:$4 sm:$0x33]  }
 0x3b7   : > { %3044 = vrot.lane.b32.xlu1 %v7066_v29, %s5261_s7  ;;  %3046 = vrot.lane.b32.xlu0 %v7068_v17, %s5261_s7  ;;  %2244 = vst.msk [vmem:[#allocation3 + $0x189] sm:$0xff] %vm2156_vm11, %v2155_v47  ;;  %v2153_v23 = vmax.f32 %v2113_v56, 0.0  ;;  %2950 = vst.msk [vmem:[#allocation4 + $0x2d8] sm:$0xff] %vm2156_vm11, %v7121_v5  ;;  %v4133_v28 = vsel %vm1959_vm4, %v5188_v27, 0  ;;  %v5189_v21 = vld [vmem:[%s7774_s3 + $0x88] sm:$0xff]  }
 0x3b8   : > { %4168 = vmatmul.mubr.bf16.vlgmr.msra.gmra.mxu1 %v3881_v39  ;;  %5116 = vmatprep.subr.msk.bf16.mxu0 %vm1959_vm4, %v5188_v27  ;;  %v4816_v56 = vld [vmem:[%s5350_s9 + $0x21] sm:$0xff] }
 0x3b9   : > { %v2571_v50 = vpop.permute.xlu1 %2570  ;;  %v2573_v51 = vpop.permute.xlu0 %2572  ;;  %2242 = vst.msk [vmem:[#allocation3 + $0x171] sm:$0xff] %vm2156_vm11, %v2153_v23  ;;  %5078 = vmatpush3.bf16.msra.mxu0 %v4133_v28 }
 0x3ba   : > { %2665 = vst.msk [vmem:[#allocation4 + $0x30] sm:$0xff] %vm2662_vm14, %v2571_v50  ;;  %2666 = vst.msk [vmem:[#allocation4 + $0x48] sm:$0xff] %vm2662_vm14, %v2573_v51  ;;  %5079 = vmatprep.subr.bf16.mxu0 %v5189_v21 }
 0x3bb   : > { %3237 = vrot.lane.b32.xlu1 %v6733_v37, %s5263_s8  ;;  %3239 = vrot.lane.b32.xlu0 %v6749_v40, %s5263_s8  ;;  %v7095_v18 = vld [vmem:[#allocation3 + $0x168] sm:$0xff] }
 0x3bc   : > { %2307 = vst.msk [vmem:[#allocation4 + $0x2d0] sm:$0xff] %vm2156_vm11, %v7095_v18 }
 0x3bd   : > { %v3406_v43 = vpop.permute.xlu1 %3405  ;;  %v3408_v19 = vpop.permute.xlu0 %3407  ;;  %5080 = vmatpush3.bf16.msra.mxu0 %v5189_v21 }
 0x3be   : > { %3499 = vst.msk [vmem:[#allocation4 + $0x38] sm:$0xff] %vm2855_vm15, %v3406_v43  ;;  %3500 = vst.msk [vmem:[#allocation4 + $0x50] sm:$0xff] %vm2855_vm15, %v3408_v19  ;;  %v7123_v10 = vld [vmem:[#allocation3 + $0x189] sm:$0xff]  ;;  %v4818_v19 = vld [vmem:[%s5350_s9 + $0x39] sm:$0xff] }
 0x3bf   : > { %2594 = vrot.lane.b32.xlu1 %v6993_v54, %s5263_s8  ;;  %2596 = vrot.lane.b32.xlu0 %v6999_v57, %s5263_s8  ;;  %v7099_v54 = vld [vmem:[#allocation3 + $0x169] sm:$0xff]  ;;  %2951 = vst.msk [vmem:[#allocation4 + $0x2f0] sm:$0xff] %vm2156_vm11, %v7123_v10 }
 0x3c0   : > { %v7097_v45 = vld [vmem:[#allocation3 + $0x170] sm:$0xff]  ;;  %2948 = vst.msk [vmem:[#allocation4 + $0x2a8] sm:$0xff] %vm2156_vm11, %v7099_v54  ;;  %v7129_v35 = vld [vmem:[#allocation3 + $0x182] sm:$0xff] }
 0x3c1   : > { %v2764_v13 = vpop.permute.xlu1 %2763  ;;  %v2766_v11 = vpop.permute.xlu0 %2765  ;;  %v7101_v3 = vld [vmem:[#allocation3 + $0x171] sm:$0xff]  ;;  %2308 = vst.msk [vmem:[#allocation4 + $0x2e8] sm:$0xff] %vm2156_vm11, %v7097_v45  ;;  %3589 = vst.msk [vmem:[#allocation4 + $0x2b0] sm:$0xff] %vm2156_vm11, %v7129_v35 }
 0x3c2   : > { %2858 = vst.msk [vmem:[#allocation4 + $0x30] sm:$0xff] %vm2855_vm15, %v2764_v13  ;;  %2859 = vst.msk [vmem:[#allocation4 + $0x48] sm:$0xff] %vm2855_vm15, %v2766_v11  ;;  %v7103_v57 = vld [vmem:[#allocation3 + $0x16a] sm:$0xff]  ;;  %v7105_v61 = vld [vmem:[#allocation3 + $0x172] sm:$0xff] }
 0x3c3   : > { %3429 = vrot.lane.b32.xlu1 %v6731_v36, %s5264_s25  ;;  %3431 = vrot.lane.b32.xlu0 %v6745_v53, %s5264_s25  ;;  %2949 = vst.msk [vmem:[#allocation4 + $0x2c0] sm:$0xff] %vm2156_vm11, %v7101_v3  ;;  %3587 = vst.msk [vmem:[#allocation4 + $0x280] sm:$0xff] %vm2156_vm11, %v7103_v57  ;;  %v7131_v31 = vld [vmem:[#allocation3 + $0x18a] sm:$0xff] }
 0x3c4   : > { %3588 = vst.msk [vmem:[#allocation4 + $0x298] sm:$0xff] %vm2156_vm11, %v7105_v61  ;;  %3590 = vst.msk [vmem:[#allocation4 + $0x2c8] sm:$0xff] %vm2156_vm11, %v7131_v31 }
 0x3c5   : > { %v3025_v36 = vpop.permute.xlu1 %3024  ;;  %v3027_v53 = vpop.permute.xlu0 %3026  ;;  %v3792_v59 = vld [vmem:[#allocation4 + $0x38] sm:$0xff]  ;;  %v3795_v48 = vld [vmem:[#allocation4 + $0x50] sm:$0xff] }
 0x3c6   : > { %3116 = vst.msk [vmem:[#allocation4 + $0x68] sm:$0xff] %vm2469_vm13, %v3025_v36  ;;  %3117 = vst.msk [vmem:[#allocation4 + $0x80] sm:$0xff] %vm2469_vm13, %v3027_v53  ;;  %v3885_v26 = vpack.c.bf16 %v3795_v48, %v3792_v59  ;;  %v7200_v59 = vld [vmem:[#allocation3 + $0xf2] sm:$0xff]  ;;  %v7202_v48 = vld [vmem:[#allocation3 + $0xfa] sm:$0xff] }
 0x3c7   : > { %2787 = vrot.lane.b32.xlu1 %v6676_v25, %s5264_s25  ;;  %2789 = vrot.lane.b32.xlu0 %v6690_v52, %s5264_s25 }
 0x3c8   : > { %4175 = vmatprep.mubr.bf16.mxu1 %v3885_v26 }
 0x3c9   : > { %v3218_v25 = vpop.permute.xlu1 %3217  ;;  %v3220_v1 = vpop.permute.xlu0 %3219  ;;  %v3791_v52 = vld [vmem:[#allocation4 + $0x30] sm:$0xff]  ;;  %v3794_v58 = vld [vmem:[#allocation4 + $0x48] sm:$0xff] }
 0x3ca   : > { %3309 = vst.msk [vmem:[#allocation4 + $0x68] sm:$0xff] %vm2662_vm14, %v3218_v25  ;;  %3310 = vst.msk [vmem:[#allocation4 + $0x80] sm:$0xff] %vm2662_vm14, %v3220_v1  ;;  %v3884_v6 = vpack.c.bf16 %v3794_v58, %v3791_v52 }
 0x3cb   : > { %3048 = vrot.lane.b32.xlu1 %v7143_v30, %s5261_s7  ;;  %3050 = vrot.lane.b32.xlu0 %v7145_v24, %s5261_s7 }
 0x3cc   : > { %4176 = vmatmul.mubr.bf16.gmra.mxu1 %v3884_v6 }
 0x3cd   : > { %v2575_v12 = vpop.permute.xlu1 %2574  ;;  %v2577_v4 = vpop.permute.xlu0 %2576 }
 0x3ce   : > { %2667 = vst.msk [vmem:[#allocation4 + $0x60] sm:$0xff] %vm2662_vm14, %v2575_v12  ;;  %2668 = vst.msk [vmem:[#allocation4 + $0x78] sm:$0xff] %vm2662_vm14, %v2577_v4 }
 0x3cf   : > { %3241 = vrot.lane.b32.xlu1 %v6726_v34, %s5263_s8  ;;  %3243 = vrot.lane.b32.xlu0 %v6740_v44, %s5263_s8 }
 0x3d1   : > { %v3410_v32 = vpop.permute.xlu1 %3409  ;;  %v3412_v49 = vpop.permute.xlu0 %3411 }
 0x3d2   : > { %3501 = vst.msk [vmem:[#allocation4 + $0x68] sm:$0xff] %vm2855_vm15, %v3410_v32  ;;  %3502 = vst.msk [vmem:[#allocation4 + $0x80] sm:$0xff] %vm2855_vm15, %v3412_v49 }
 0x3d3   : > { %2598 = vrot.lane.b32.xlu1 %v7066_v29, %s5263_s8  ;;  %2600 = vrot.lane.b32.xlu0 %v7068_v17, %s5263_s8 }
 0x3d5   : > { %v2768_v16 = vpop.permute.xlu1 %2767  ;;  %v2770_v7 = vpop.permute.xlu0 %2769 }
 0x3d6   : > { %2860 = vst.msk [vmem:[#allocation4 + $0x60] sm:$0xff] %vm2855_vm15, %v2768_v16  ;;  %2861 = vst.msk [vmem:[#allocation4 + $0x78] sm:$0xff] %vm2855_vm15, %v2770_v7  ;;  %v4819_v7 = vld [vmem:[%s5350_s9 + $0x49] sm:$0xff] }
 0x3d7   : > { %3433 = vrot.lane.b32.xlu1 %v6747_v38, %s5264_s25  ;;  %3435 = vrot.lane.b32.xlu0 %v6765_v33, %s5264_s25  ;;  %v5190_v38 = vld [vmem:[%s7774_s3 + $0x80] sm:$0xff]  }
 0x3d8   : > { %v4815_v33 = vld [vmem:[%s5350_s9 + $0x19] sm:$0xff]  ;;  %5081 = vmatprep.subr.bf16.mxu0 %v5190_v38 }
 0x3d9   : > { %v3029_v29 = vpop.permute.xlu1 %3028  ;;  %v3031_v17 = vpop.permute.xlu0 %3030  ;;  %v3798_v39 = vld [vmem:[#allocation4 + $0x68] sm:$0xff]  ;;  %v3801_v46 = vld [vmem:[#allocation4 + $0x80] sm:$0xff]  ;;  %5082 = vmatpush3.bf16.msra.mxu0 %v5190_v38 }
 0x3da   : > { %3118 = vst.msk [vmem:[#allocation4 + $0x98] sm:$0xff] %vm2469_vm13, %v3029_v29  ;;  %3119 = vst.msk [vmem:[#allocation4 + $0xb0] sm:$0xff] %vm2469_vm13, %v3031_v17  ;;  %v3888_v47 = vpack.c.bf16 %v3801_v46, %v3798_v39  ;;  %v4822_v29 = vld [vmem:[%s5350_s9 + $0x69] sm:$0xff] }
 0x3db   : > { %2791 = vrot.lane.b32.xlu1 %v6733_v37, %s5264_s25  ;;  %2793 = vrot.lane.b32.xlu0 %v6749_v40, %s5264_s25  ;;  %v4817_v40 = vld [vmem:[%s5350_s9 + $0x31] sm:$0xff] }
 0x3dc   : > { %4183 = vmatprep.mubr.bf16.mxu1 %v3888_v47  ;;  %v7246_v38 = vld [vmem:[#allocation3 + $0x10a] sm:$0xff] }
 0x3dd   : > { %v3222_v50 = vpop.permute.xlu1 %3221  ;;  %v3224_v51 = vpop.permute.xlu0 %3223  ;;  %v3797_v23 = vld [vmem:[#allocation4 + $0x60] sm:$0xff]  ;;  %v3800_v43 = vld [vmem:[#allocation4 + $0x78] sm:$0xff] }
 0x3de   : > { %3311 = vst.msk [vmem:[#allocation4 + $0x98] sm:$0xff] %vm2662_vm14, %v3222_v50  ;;  %3312 = vst.msk [vmem:[#allocation4 + $0xb0] sm:$0xff] %vm2662_vm14, %v3224_v51  ;;  %v3887_v37 = vpack.c.bf16 %v3800_v43, %v3797_v23 }
 0x3df   : > { %3657 = vrot.lane.b32.xlu1 %v4815_v33, %s5261_s7  ;;  %3659 = vrot.lane.b32.xlu0 %v4816_v56, %s5261_s7  ;;  %v7248_v33 = vld [vmem:[#allocation3 + $0x112] sm:$0xff] }
 0x3e0   : > { %4184 = vmatmul.mubr.bf16.gmra.mxu1 %v3887_v37  ;;  %v7256_v37 = vld [vmem:[#allocation3 + $0x128] sm:$0xff] }
 0x3e1   : > { %v2579_v13 = vpop.permute.xlu1 %2578  ;;  %v2581_v11 = vpop.permute.xlu0 %2580 }
 0x3e2   : > { %2669 = vst.msk [vmem:[#allocation4 + $0x90] sm:$0xff] %vm2662_vm14, %v2579_v13  ;;  %2670 = vst.msk [vmem:[#allocation4 + $0xa8] sm:$0xff] %vm2662_vm14, %v2581_v11 }
 0x3e3   : > { %3661 = vrot.lane.b32.xlu1 %v4817_v40, %s5261_s7  ;;  %3663 = vrot.lane.b32.xlu0 %v4818_v19, %s5261_s7 }
 0x3e5   : > { %v3414_v36 = vpop.permute.xlu1 %3413  ;;  %v3416_v53 = vpop.permute.xlu0 %3415 }
 0x3e6   : > { %3503 = vst.msk [vmem:[#allocation4 + $0x98] sm:$0xff] %vm2855_vm15, %v3414_v36  ;;  %3504 = vst.msk [vmem:[#allocation4 + $0xb0] sm:$0xff] %vm2855_vm15, %v3416_v53 }
 0x3e7   : > { %3052 = vrot.lane.b32.xlu1 %v7200_v59, %s5261_s7  ;;  %3054 = vrot.lane.b32.xlu0 %v7202_v48, %s5261_s7 }
 0x3e9   : > { %v2772_v26 = vpop.permute.xlu1 %2771  ;;  %v2774_v25 = vpop.permute.xlu0 %2773 }
 0x3ea   : > { %2862 = vst.msk [vmem:[#allocation4 + $0x90] sm:$0xff] %vm2855_vm15, %v2772_v26  ;;  %2863 = vst.msk [vmem:[#allocation4 + $0xa8] sm:$0xff] %vm2855_vm15, %v2774_v25 }
 0x3eb   : > { %3245 = vrot.lane.b32.xlu1 %v6809_v14, %s5263_s8  ;;  %3247 = vrot.lane.b32.xlu0 %v6829_v62, %s5263_s8 }
 0x3ed   : > { %v3033_v1 = vpop.permute.xlu1 %3032  ;;  %v3035_v52 = vpop.permute.xlu0 %3034  ;;  %v3804_v58 = vld [vmem:[#allocation4 + $0x98] sm:$0xff]  ;;  %v3807_v6 = vld [vmem:[#allocation4 + $0xb0] sm:$0xff] }
 0x3ee   : > { %3120 = vst.msk [vmem:[#allocation4 + $0xc8] sm:$0xff] %vm2469_vm13, %v3033_v1  ;;  %3121 = vst.msk [vmem:[#allocation4 + $0xe0] sm:$0xff] %vm2469_vm13, %v3035_v52  ;;  %v3891_v12 = vpack.c.bf16 %v3807_v6, %v3804_v58  ;;  %v4826_v6 = vld [vmem:[%s5350_s9 + $0x99] sm:$0xff] }
 0x3ef   : > { %2602 = vrot.lane.b32.xlu1 %v7143_v30, %s5263_s8  ;;  %2604 = vrot.lane.b32.xlu0 %v7145_v24, %s5263_s8 }
 0x3f0   : > { %4191 = vmatprep.mubr.bf16.mxu1 %v3891_v12 }
 0x3f1   : > { %v3226_v4 = vpop.permute.xlu1 %3225  ;;  %v3228_v32 = vpop.permute.xlu0 %3227  ;;  %v3803_v49 = vld [vmem:[#allocation4 + $0x90] sm:$0xff]  ;;  %v3806_v27 = vld [vmem:[#allocation4 + $0xa8] sm:$0xff] }
 0x3f2   : > { %3313 = vst.msk [vmem:[#allocation4 + $0xc8] sm:$0xff] %vm2662_vm14, %v3226_v4  ;;  %3314 = vst.msk [vmem:[#allocation4 + $0xe0] sm:$0xff] %vm2662_vm14, %v3228_v32  ;;  %v3890_v16 = vpack.c.bf16 %v3806_v27, %v3803_v49 }
 0x3f3   : > { %3437 = vrot.lane.b32.xlu1 %v6807_v9, %s5264_s25  ;;  %3439 = vrot.lane.b32.xlu0 %v6827_v22, %s5264_s25  ;;  %v4820_v9 = vld [vmem:[%s5350_s9 + $0x51] sm:$0xff]  ;;  %v4821_v22 = vld [vmem:[%s5350_s9 + $0x61] sm:$0xff] }
 0x3f4   : > { %4192 = vmatmul.mubr.bf16.gmra.mxu1 %v3890_v16 }
 0x3f5   : > { %v2583_v30 = vpop.permute.xlu1 %2582  ;;  %v2585_v24 = vpop.permute.xlu0 %2584 }
 0x3f6   : > { %2671 = vst.msk [vmem:[#allocation4 + $0xc0] sm:$0xff] %vm2662_vm14, %v2583_v30  ;;  %2672 = vst.msk [vmem:[#allocation4 + $0xd8] sm:$0xff] %vm2662_vm14, %v2585_v24  ;;  %v7294_v30 = vld [vmem:[#allocation3 + $0x122] sm:$0xff]  ;;  %v7296_v24 = vld [vmem:[#allocation3 + $0x12a] sm:$0xff] }
 0x3f7   : > { %2795 = vrot.lane.b32.xlu1 %v6726_v34, %s5264_s25  ;;  %2797 = vrot.lane.b32.xlu0 %v6740_v44, %s5264_s25 }
 0x3f9   : > { %v3418_v28 = vpop.permute.xlu1 %3417  ;;  %v3420_v21 = vpop.permute.xlu0 %3419 }
 0x3fa   : > { %3505 = vst.msk [vmem:[#allocation4 + $0xc8] sm:$0xff] %vm2855_vm15, %v3418_v28  ;;  %3506 = vst.msk [vmem:[#allocation4 + $0xe0] sm:$0xff] %vm2855_vm15, %v3420_v21  ;;  %v7304_v28 = vld [vmem:[#allocation3 + $0x138] sm:$0xff]  ;;  %v7306_v21 = vld [vmem:[#allocation3 + $0x140] sm:$0xff] }
 0x3fb   : > { %3665 = vrot.lane.b32.xlu1 %v4819_v7, %s5261_s7  ;;  %3667 = vrot.lane.b32.xlu0 %v4820_v9, %s5261_s7 }
 0x3fd   : > { %v2776_v17 = vpop.permute.xlu1 %2775  ;;  %v2778_v39 = vpop.permute.xlu0 %2777 }
 0x3fe   : > { %2864 = vst.msk [vmem:[#allocation4 + $0xc0] sm:$0xff] %vm2855_vm15, %v2776_v17  ;;  %2865 = vst.msk [vmem:[#allocation4 + $0xd8] sm:$0xff] %vm2855_vm15, %v2778_v39 }
 0x3ff   : > { %3669 = vrot.lane.b32.xlu1 %v4821_v22, %s5261_s7  ;;  %3671 = vrot.lane.b32.xlu0 %v4822_v29, %s5261_s7 }
 0x401   : > { %v3037_v34 = vpop.permute.xlu1 %3036  ;;  %v3039_v44 = vpop.permute.xlu0 %3038  ;;  %v3810_v46 = vld [vmem:[#allocation4 + $0xc8] sm:$0xff]  ;;  %v3813_v47 = vld [vmem:[#allocation4 + $0xe0] sm:$0xff] }
 0x402   : > { %3122 = vst.msk [vmem:[#allocation4 + $0xf8] sm:$0xff] %vm2469_vm13, %v3037_v34  ;;  %3123 = vst.msk [vmem:[#allocation4 + $0x110] sm:$0xff] %vm2469_vm13, %v3039_v44  ;;  %v3894_v56 = vpack.c.bf16 %v3813_v47, %v3810_v46 }
 0x403   : > { %3056 = vrot.lane.b32.xlu1 %v7246_v38, %s5261_s7  ;;  %3058 = vrot.lane.b32.xlu0 %v7248_v33, %s5261_s7 }
 0x404   : > { %4199 = vmatprep.mubr.bf16.mxu1 %v3894_v56 }
 0x405   : > { %v3230_v50 = vpop.permute.xlu1 %3229  ;;  %v3232_v51 = vpop.permute.xlu0 %3231  ;;  %v3809_v23 = vld [vmem:[#allocation4 + $0xc0] sm:$0xff]  ;;  %v3812_v43 = vld [vmem:[#allocation4 + $0xd8] sm:$0xff] }
 0x406   : > { %3315 = vst.msk [vmem:[#allocation4 + $0xf8] sm:$0xff] %vm2662_vm14, %v3230_v50  ;;  %3316 = vst.msk [vmem:[#allocation4 + $0x110] sm:$0xff] %vm2662_vm14, %v3232_v51  ;;  %v3893_v40 = vpack.c.bf16 %v3812_v43, %v3809_v23  ;;  %v4827_v51 = vld [vmem:[%s5350_s9 + $0xa9] sm:$0xff]  ;;  %v4828_v23 = vld [vmem:[%s5350_s9 + $0xb1] sm:$0xff] }
 0x407   : > { %3249 = vrot.lane.b32.xlu1 %v6797_v0, %s5263_s8  ;;  %3251 = vrot.lane.b32.xlu0 %v7256_v37, %s5263_s8 }
 0x408   : > { %4200 = vmatmul.mubr.bf16.gmra.mxu1 %v3893_v40 }
 0x409   : > { %v2587_v19 = vpop.permute.xlu1 %2586  ;;  %v2589_v13 = vpop.permute.xlu0 %2588 }
 0x40a   : > { %2673 = vst.msk [vmem:[#allocation4 + $0xf0] sm:$0xff] %vm2662_vm14, %v2587_v19  ;;  %2674 = vst.msk [vmem:[#allocation4 + $0x108] sm:$0xff] %vm2662_vm14, %v2589_v13  ;;  %v4829_v19 = vld [vmem:[%s5350_s9 + $0xc1] sm:$0xff]  ;;  %v4830_v13 = vld [vmem:[%s5350_s9 + $0xc9] sm:$0xff] }
 0x40b   : > { %2606 = vrot.lane.b32.xlu1 %v7200_v59, %s5263_s8  ;;  %2608 = vrot.lane.b32.xlu0 %v7202_v48, %s5263_s8  ;;  %v4823_v59 = vld [vmem:[%s5350_s9 + $0x79] sm:$0xff]  ;;  %v4824_v48 = vld [vmem:[%s5350_s9 + $0x81] sm:$0xff] }
 0x40d   : > { %v3422_v11 = vpop.permute.xlu1 %3421  ;;  %v3424_v36 = vpop.permute.xlu0 %3423 }
 0x40e   : > { %3507 = vst.msk [vmem:[#allocation4 + $0xf8] sm:$0xff] %vm2855_vm15, %v3422_v11  ;;  %3508 = vst.msk [vmem:[#allocation4 + $0x110] sm:$0xff] %vm2855_vm15, %v3424_v36 }
 0x40f   : > { %3441 = vrot.lane.b32.xlu1 %v6799_v41, %s5264_s25  ;;  %3443 = vrot.lane.b32.xlu0 %v6822_v20, %s5264_s25 }
 0x411   : > { %v2780_v53 = vpop.permute.xlu1 %2779  ;;  %v2782_v26 = vpop.permute.xlu0 %2781 }
 0x412   : > { %2866 = vst.msk [vmem:[#allocation4 + $0xf0] sm:$0xff] %vm2855_vm15, %v2780_v53  ;;  %2867 = vst.msk [vmem:[#allocation4 + $0x108] sm:$0xff] %vm2855_vm15, %v2782_v26  ;;  %v7344_v53 = vld [vmem:[#allocation3 + $0x142] sm:$0xff] }
 0x413   : > { %2799 = vrot.lane.b32.xlu1 %v6809_v14, %s5264_s25  ;;  %2801 = vrot.lane.b32.xlu0 %v6829_v62, %s5264_s25  ;;  %v4825_v14 = vld [vmem:[%s5350_s9 + $0x91] sm:$0xff] }
 0x415   : > { %v3041_v41 = vpop.permute.xlu1 %3040  ;;  %v3043_v25 = vpop.permute.xlu0 %3042  ;;  %v3816_v1 = vld [vmem:[#allocation4 + $0xf8] sm:$0xff]  ;;  %v3819_v52 = vld [vmem:[#allocation4 + $0x110] sm:$0xff] }
 0x416   : > { %3124 = vst.msk [vmem:[#allocation4 + $0x128] sm:$0xff] %vm2469_vm13, %v3041_v41  ;;  %3125 = vst.msk [vmem:[#allocation4 + $0x140] sm:$0xff] %vm2469_vm13, %v3043_v25  ;;  %v3897_v58 = vpack.c.bf16 %v3819_v52, %v3816_v1  ;;  %v7352_v25 = vld [vmem:[#allocation3 + $0x150] sm:$0xff] }
 0x417   : > { %3673 = vrot.lane.b32.xlu1 %v4823_v59, %s5261_s7  ;;  %3675 = vrot.lane.b32.xlu0 %v4824_v48, %s5261_s7 }
 0x418   : > { %4207 = vmatprep.mubr.bf16.mxu1 %v3897_v58 }
 0x419   : > { %v3234_v12 = vpop.permute.xlu1 %3233  ;;  %v3236_v62 = vpop.permute.xlu0 %3235  ;;  %v3815_v4 = vld [vmem:[#allocation4 + $0xf0] sm:$0xff]  ;;  %v3818_v32 = vld [vmem:[#allocation4 + $0x108] sm:$0xff] }
 0x41a   : > { %3317 = vst.msk [vmem:[#allocation4 + $0x128] sm:$0xff] %vm2662_vm14, %v3234_v12  ;;  %3318 = vst.msk [vmem:[#allocation4 + $0x140] sm:$0xff] %vm2662_vm14, %v3236_v62  ;;  %v3896_v49 = vpack.c.bf16 %v3818_v32, %v3815_v4  ;;  %v7360_v12 = vld [vmem:[#allocation3 + $0x158] sm:$0xff] }
 0x41b   : > { %3677 = vrot.lane.b32.xlu1 %v4825_v14, %s5261_s7  ;;  %3679 = vrot.lane.b32.xlu0 %v4826_v6, %s5261_s7 }
 0x41c   : > { %4208 = vmatmul.mubr.bf16.gmra.mxu1 %v3896_v49 }
 0x41d   : > { %v2591_v27 = vpop.permute.xlu1 %2590  ;;  %v2593_v16 = vpop.permute.xlu0 %2592 }
 0x41e   : > { %2675 = vst.msk [vmem:[#allocation4 + $0x120] sm:$0xff] %vm2662_vm14, %v2591_v27  ;;  %2676 = vst.msk [vmem:[#allocation4 + $0x138] sm:$0xff] %vm2662_vm14, %v2593_v16  ;;  %v4831_v27 = vld [vmem:[%s5350_s9 + $0xd9] sm:$0xff] }
 0x41f   : > { %3060 = vrot.lane.b32.xlu1 %v7294_v30, %s5261_s7  ;;  %3062 = vrot.lane.b32.xlu0 %v7296_v24, %s5261_s7 }
 0x421   : > { %v3426_v7 = vpop.permute.xlu1 %3425  ;;  %v3428_v9 = vpop.permute.xlu0 %3427 }
 0x422   : > { %3509 = vst.msk [vmem:[#allocation4 + $0x128] sm:$0xff] %vm2855_vm15, %v3426_v7  ;;  %3510 = vst.msk [vmem:[#allocation4 + $0x140] sm:$0xff] %vm2855_vm15, %v3428_v9  ;;  %v4833_v7 = vld [vmem:[%s5350_s9 + $0xf1] sm:$0xff] }
 0x423   : > { %3253 = vrot.lane.b32.xlu1 %v7304_v28, %s5263_s8  ;;  %3255 = vrot.lane.b32.xlu0 %v7306_v21, %s5263_s8 }
 0x425   : > { %v2784_v22 = vpop.permute.xlu1 %2783  ;;  %v2786_v29 = vpop.permute.xlu0 %2785 }
 0x426   : > { %2868 = vst.msk [vmem:[#allocation4 + $0x120] sm:$0xff] %vm2855_vm15, %v2784_v22  ;;  %2869 = vst.msk [vmem:[#allocation4 + $0x138] sm:$0xff] %vm2855_vm15, %v2786_v29 }
 0x427   : > { %2610 = vrot.lane.b32.xlu1 %v7246_v38, %s5263_s8  ;;  %2612 = vrot.lane.b32.xlu0 %v7248_v33, %s5263_s8 }
 0x429   : > { %v3045_v17 = vpop.permute.xlu1 %3044  ;;  %v3047_v39 = vpop.permute.xlu0 %3046  ;;  %v3822_v34 = vld [vmem:[#allocation4 + $0x128] sm:$0xff]  ;;  %v3825_v44 = vld [vmem:[#allocation4 + $0x140] sm:$0xff] }
 0x42a   : > { %3126 = vst.msk [vmem:[#allocation4 + $0x158] sm:$0xff] %vm2469_vm13, %v3045_v17  ;;  %3127 = vst.msk [vmem:[#allocation4 + $0x170] sm:$0xff] %vm2469_vm13, %v3047_v39  ;;  %v3900_v46 = vpack.c.bf16 %v3825_v44, %v3822_v34  ;;  %v4834_v39 = vld [vmem:[%s5350_s9 + $0xf9] sm:$0xff] }
 0x42b   : > { %3445 = vrot.lane.b32.xlu1 %v6995_v60, %s5264_s25  ;;  %3447 = vrot.lane.b32.xlu0 %v7001_v55, %s5264_s25 }
 0x42c   : > { %4215 = vmatprep.mubr.bf16.mxu1 %v3900_v46 }
 0x42d   : > { %v3238_v47 = vpop.permute.xlu1 %3237  ;;  %v3240_v38 = vpop.permute.xlu0 %3239  ;;  %v3821_v33 = vld [vmem:[#allocation4 + $0x120] sm:$0xff]  ;;  %v3824_v56 = vld [vmem:[#allocation4 + $0x138] sm:$0xff] }
 0x42e   : > { %3319 = vst.msk [vmem:[#allocation4 + $0x158] sm:$0xff] %vm2662_vm14, %v3238_v47  ;;  %3320 = vst.msk [vmem:[#allocation4 + $0x170] sm:$0xff] %vm2662_vm14, %v3240_v38  ;;  %v3899_v50 = vpack.c.bf16 %v3824_v56, %v3821_v33 }
 0x42f   : > { %2803 = vrot.lane.b32.xlu1 %v6797_v0, %s5264_s25  ;;  %2805 = vrot.lane.b32.xlu0 %v7256_v37, %s5264_s25 }
 0x430   : > { %4216 = vmatmul.mubr.bf16.gmra.mxu1 %v3899_v50 }
 0x431   : > { %v2595_v43 = vpop.permute.xlu1 %2594  ;;  %v2597_v40 = vpop.permute.xlu0 %2596 }
 0x432   : > { %2677 = vst.msk [vmem:[#allocation4 + $0x150] sm:$0xff] %vm2662_vm14, %v2595_v43  ;;  %2678 = vst.msk [vmem:[#allocation4 + $0x168] sm:$0xff] %vm2662_vm14, %v2597_v40 }
 0x433   : > { %3681 = vrot.lane.b32.xlu1 %v4827_v51, %s5261_s7  ;;  %3683 = vrot.lane.b32.xlu0 %v4828_v23, %s5261_s7 }
 0x435   : > { %v3430_v11 = vpop.permute.xlu1 %3429  ;;  %v3432_v0 = vpop.permute.xlu0 %3431 }
 0x436   : > { %3511 = vst.msk [vmem:[#allocation4 + $0x158] sm:$0xff] %vm2855_vm15, %v3430_v11  ;;  %3512 = vst.msk [vmem:[#allocation4 + $0x170] sm:$0xff] %vm2855_vm15, %v3432_v0 }
 0x437   : > { %3685 = vrot.lane.b32.xlu1 %v4829_v19, %s5261_s7  ;;  %3687 = vrot.lane.b32.xlu0 %v4830_v13, %s5261_s7 }
 0x439   : > { %v2788_v37 = vpop.permute.xlu1 %2787  ;;  %v2790_v36 = vpop.permute.xlu0 %2789 }
 0x43a   : > { %2870 = vst.msk [vmem:[#allocation4 + $0x150] sm:$0xff] %vm2855_vm15, %v2788_v37  ;;  %2871 = vst.msk [vmem:[#allocation4 + $0x168] sm:$0xff] %vm2855_vm15, %v2790_v36 }
 0x43b   : > { %3064 = vrot.lane.b32.xlu1 %v7003_v63, %s5261_s7  ;;  %3066 = vrot.lane.b32.xlu0 %v7344_v53, %s5261_s7 }
 0x43d   : > { %v3049_v26 = vpop.permute.xlu1 %3048  ;;  %v3051_v59 = vpop.permute.xlu0 %3050  ;;  %v3828_v48 = vld [vmem:[#allocation4 + $0x158] sm:$0xff]  ;;  %v3831_v41 = vld [vmem:[#allocation4 + $0x170] sm:$0xff] }
 0x43e   : > { %3128 = vst.msk [vmem:[#allocation4 + $0x188] sm:$0xff] %vm2469_vm13, %v3049_v26  ;;  %3129 = vst.msk [vmem:[#allocation4 + $0x1a0] sm:$0xff] %vm2469_vm13, %v3051_v59  ;;  %v3903_v1 = vpack.c.bf16 %v3831_v41, %v3828_v48 }
 0x43f   : > { %2423 = vrot.lane.b32.xlu1 %v6822_v20, %s5261_s7  ;;  %3257 = vrot.lane.b32.xlu0 %v7352_v25, %s5263_s8 }
 0x440   : > { %4223 = vmatprep.mubr.bf16.mxu1 %v3903_v1  ;;  %v4836_v1 = vld [vmem:[%s5350_s9 + $0x111] sm:$0xff] }
 0x441   : > { %v3242_v52 = vpop.permute.xlu1 %3241  ;;  %v3244_v58 = vpop.permute.xlu0 %3243  ;;  %v3827_v14 = vld [vmem:[#allocation4 + $0x150] sm:$0xff]  ;;  %v3830_v6 = vld [vmem:[#allocation4 + $0x168] sm:$0xff] }
 0x442   : > { %3321 = vst.msk [vmem:[#allocation4 + $0x188] sm:$0xff] %vm2662_vm14, %v3242_v52  ;;  %3322 = vst.msk [vmem:[#allocation4 + $0x1a0] sm:$0xff] %vm2662_vm14, %v3244_v58  ;;  %v3902_v62 = vpack.c.bf16 %v3830_v6, %v3827_v14  ;;  %v4837_v52 = vld [vmem:[%s5350_s9 + $0x121] sm:$0xff] }
 0x443   : > { %3259 = vrot.lane.b32.xlu1 %v7360_v12, %s5263_s8  ;;  %2614 = vrot.lane.b32.xlu0 %v7294_v30, %s5263_s8 }
 0x444   : > { %4224 = vmatmul.mubr.bf16.gmra.mxu1 %v3902_v62 }
 0x445   : > { %v2599_v20 = vpop.permute.xlu1 %2598  ;;  %v2601_v4 = vpop.permute.xlu0 %2600 }
 0x446   : > { %2679 = vst.msk [vmem:[#allocation4 + $0x180] sm:$0xff] %vm2662_vm14, %v2599_v20  ;;  %2680 = vst.msk [vmem:[#allocation4 + $0x198] sm:$0xff] %vm2662_vm14, %v2601_v4 }
 0x447   : > { %2616 = vrot.lane.b32.xlu1 %v7296_v24, %s5263_s8  ;;  %3449 = vrot.lane.b32.xlu0 %v7011_v2, %s5264_s25  ;;  %v4832_v24 = vld [vmem:[%s5350_s9 + $0xe1] sm:$0xff] }
 0x449   : > { %v3434_v32 = vpop.permute.xlu1 %3433  ;;  %v3436_v49 = vpop.permute.xlu0 %3435 }
 0x44a   : > { %3513 = vst.msk [vmem:[#allocation4 + $0x188] sm:$0xff] %vm2855_vm15, %v3434_v32  ;;  %3514 = vst.msk [vmem:[#allocation4 + $0x1a0] sm:$0xff] %vm2855_vm15, %v3436_v49 }
 0x44b   : > { %3451 = vrot.lane.b32.xlu1 %v7017_v8, %s5264_s25  ;;  %2807 = vrot.lane.b32.xlu0 %v7304_v28, %s5264_s25 }
 0x44d   : > { %v2792_v16 = vpop.permute.xlu1 %2791  ;;  %v2794_v30 = vpop.permute.xlu0 %2793 }
 0x44e   : > { %2872 = vst.msk [vmem:[#allocation4 + $0x180] sm:$0xff] %vm2855_vm15, %v2792_v16  ;;  %2873 = vst.msk [vmem:[#allocation4 + $0x198] sm:$0xff] %vm2855_vm15, %v2794_v30 }
 0x44f   : > { %2809 = vrot.lane.b32.xlu1 %v7306_v21, %s5264_s25  ;;  %3689 = vrot.lane.b32.xlu0 %v4831_v27, %s5261_s7 }
 0x451   : > { %v3658_v9 = vpop.permute.xlu1 %3657  ;;  %v3660_v22 = vpop.permute.xlu0 %3659  ;;  %v3834_v29 = vld [vmem:[#allocation4 + $0x188] sm:$0xff]  ;;  %v3837_v17 = vld [vmem:[#allocation4 + $0x1a0] sm:$0xff] }
 0x452   : > { %3753 = vst.msk [vmem:[#allocation4 + $0x10] sm:$0xff] %vm1802_vm9, %v3658_v9  ;;  %3754 = vst.msk [vmem:[#allocation4 + $0x28] sm:$0xff] %vm1802_vm9, %v3660_v22  ;;  %v3906_v28 = vpack.c.bf16 %v3837_v17, %v3834_v29  ;;  %v7456_v17 = vld [vmem:[#allocation3 + $0x180] sm:$0xff] }
 0x453   : > { %3691 = vrot.lane.b32.xlu1 %v4832_v24, %s5261_s7  ;;  %3693 = vrot.lane.b32.xlu0 %v4833_v7, %s5261_s7 }
 0x454   : > { %4231 = vmatprep.mubr.bf16.mxu1 %v3906_v28 }
 0x455   : > { %v3662_v21 = vpop.permute.xlu1 %3661  ;;  %v3664_v34 = vpop.permute.xlu0 %3663  ;;  %v3833_v44 = vld [vmem:[#allocation4 + $0x180] sm:$0xff]  ;;  %v3836_v46 = vld [vmem:[#allocation4 + $0x198] sm:$0xff] }
 0x456   : > { %3755 = vst.msk [vmem:[#allocation4 + $0x40] sm:$0xff] %vm1802_vm9, %v3662_v21  ;;  %3756 = vst.msk [vmem:[#allocation4 + $0x58] sm:$0xff] %vm1802_vm9, %v3664_v34  ;;  %v3905_v47 = vpack.c.bf16 %v3836_v46, %v3833_v44 }
 0x457   : > { %3695 = vrot.lane.b32.xlu1 %v4834_v39, %s5261_s7  ;;  %3068 = vrot.lane.b32.xlu0 %v7019_v42, %s5261_s7 }
 0x458   : > { %4232 = vmatmul.mubr.bf16.gmra.mxu1 %v3905_v47 }
 0x459   : > { %v3053_v38 = vpop.permute.xlu1 %3052  ;;  %v3055_v33 = vpop.permute.xlu0 %3054  ;;  %v3787_v56 = vld [vmem:[#allocation4 + $0x10] sm:$0xff]  ;;  %v3790_v50 = vld [vmem:[#allocation4 + $0x28] sm:$0xff] }
 0x45a   : > { %3130 = vst.msk [vmem:[#allocation4 + $0x1b8] sm:$0xff] %vm2469_vm13, %v3053_v38  ;;  %3131 = vst.msk [vmem:[#allocation4 + $0x1d0] sm:$0xff] %vm2469_vm13, %v3055_v33  ;;  %v3883_v51 = vpack.c.bf16 %v3790_v50, %v3787_v56 }
 0x45b   : > { %3070 = vrot.lane.b32.xlu1 %v7021_v15, %s5261_s7  ;;  %2425 = vrot.lane.b32.xlu0 %v6995_v60, %s5261_s7 }
 0x45c   : > { %5083 = vmatprep.mubr.msk.bf16.mxu0 %vm1910_vm10, %v3883_v51 }
 0x45d   : > { %v3246_v23 = vpop.permute.xlu1 %3245  ;;  %v3248_v43 = vpop.permute.xlu0 %3247  ;;  %v3793_v40 = vld [vmem:[#allocation4 + $0x40] sm:$0xff]  ;;  %v3796_v19 = vld [vmem:[#allocation4 + $0x58] sm:$0xff] }
 0x45e   : > { %3323 = vst.msk [vmem:[#allocation4 + $0x1b8] sm:$0xff] %vm2662_vm14, %v3246_v23  ;;  %3324 = vst.msk [vmem:[#allocation4 + $0x1d0] sm:$0xff] %vm2662_vm14, %v3248_v43  ;;  %v3886_v13 = vpack.c.bf16 %v3796_v19, %v3793_v40 }
 0x45f   : > { %2427 = vrot.lane.b32.xlu1 %v7001_v55, %s5261_s7  ;;  %3261 = vrot.lane.b32.xlu0 %v7095_v18, %s5263_s8 }
 0x460   : > { %5084 = vmatmul.mubr.msk.bf16.vlgmr.msra.gmra.mxu0 %vm1910_vm10, %v3886_v13 }
 0x461   : > { %v2603_v60 = vpop.permute.xlu1 %2602  ;;  %v2605_v11 = vpop.permute.xlu0 %2604 }
 0x462   : > { %2681 = vst.msk [vmem:[#allocation4 + $0x1b0] sm:$0xff] %vm2662_vm14, %v2603_v60  ;;  %2682 = vst.msk [vmem:[#allocation4 + $0x1c8] sm:$0xff] %vm2662_vm14, %v2605_v11 }
 0x463   : > { %3263 = vrot.lane.b32.xlu1 %v7097_v45, %s5263_s8  ;;  %2618 = vrot.lane.b32.xlu0 %v7003_v63, %s5263_s8  ;;  %v4835_v63 = vld [vmem:[%s5350_s9 + $0x109] sm:$0xff] }
 0x465   : > { %v3438_v0 = vpop.permute.xlu1 %3437  ;;  %v3440_v55 = vpop.permute.xlu0 %3439 }
 0x466   : > { %3515 = vst.msk [vmem:[#allocation4 + $0x1b8] sm:$0xff] %vm2855_vm15, %v3438_v0  ;;  %3516 = vst.msk [vmem:[#allocation4 + $0x1d0] sm:$0xff] %vm2855_vm15, %v3440_v55 }
 0x467   : > { %2620 = vrot.lane.b32.xlu1 %v7344_v53, %s5263_s8  ;;  %3453 = vrot.lane.b32.xlu0 %v7099_v54, %s5264_s25 }
 0x469   : > { %v2796_v37 = vpop.permute.xlu1 %2795  ;;  %v2798_v36 = vpop.permute.xlu0 %2797 }
 0x46a   : > { %2874 = vst.msk [vmem:[#allocation4 + $0x1b0] sm:$0xff] %vm2855_vm15, %v2796_v37  ;;  %2875 = vst.msk [vmem:[#allocation4 + $0x1c8] sm:$0xff] %vm2855_vm15, %v2798_v36 }
 0x46b   : > { %3455 = vrot.lane.b32.xlu1 %v7101_v3, %s5264_s25  ;;  %2811 = vrot.lane.b32.xlu0 %v7352_v25, %s5264_s25 }
 0x46d   : > { %v3666_v26 = vpop.permute.xlu1 %3665  ;;  %v3668_v53 = vpop.permute.xlu0 %3667  ;;  %v3840_v59 = vld [vmem:[#allocation4 + $0x1b8] sm:$0xff]  ;;  %v3843_v48 = vld [vmem:[#allocation4 + $0x1d0] sm:$0xff] }
 0x46e   : > { %3757 = vst.msk [vmem:[#allocation4 + $0x70] sm:$0xff] %vm1802_vm9, %v3666_v26  ;;  %3758 = vst.msk [vmem:[#allocation4 + $0x88] sm:$0xff] %vm1802_vm9, %v3668_v53  ;;  %v3909_v41 = vpack.c.bf16 %v3843_v48, %v3840_v59 }
 0x46f   : > { %2813 = vrot.lane.b32.xlu1 %v7360_v12, %s5264_s25  ;;  %3697 = vrot.lane.b32.xlu0 %v4835_v63, %s5261_s7  ;;  %v4838_v12 = vld [vmem:[%s5350_s9 + $0x129] sm:$0xff]  ;;  %v3175_v63 = vld [vmem:[#allocation3 + $0x198] sm:$0xff] }
 0x470   : > { %4239 = vmatprep.mubr.bf16.mxu1 %v3909_v41 }
 0x471   : > { %v3670_v25 = vpop.permute.xlu1 %3669  ;;  %v3672_v58 = vpop.permute.xlu0 %3671  ;;  %v3839_v14 = vld [vmem:[#allocation4 + $0x1b0] sm:$0xff]  ;;  %v3842_v6 = vld [vmem:[#allocation4 + $0x1c8] sm:$0xff] }
 0x472   : > { %3759 = vst.msk [vmem:[#allocation4 + $0xa0] sm:$0xff] %vm1802_vm9, %v3670_v25  ;;  %3760 = vst.msk [vmem:[#allocation4 + $0xb8] sm:$0xff] %vm1802_vm9, %v3672_v58  ;;  %v3908_v62 = vpack.c.bf16 %v3842_v6, %v3839_v14  ;;  %v3368_v25 = vld [vmem:[#allocation3 + $0x1a1] sm:$0xff] }
 0x473   : > { %3699 = vrot.lane.b32.xlu1 %v4836_v1, %s5261_s7  ;;  %3701 = vrot.lane.b32.xlu0 %v4837_v52, %s5261_s7 }
 0x474   : > { %4240 = vmatmul.mubr.bf16.gmra.mxu1 %v3908_v62 }
 0x475   : > { %v3057_v20 = vpop.permute.xlu1 %3056  ;;  %v3059_v4 = vpop.permute.xlu0 %3058  ;;  %v3799_v32 = vld [vmem:[#allocation4 + $0x70] sm:$0xff]  ;;  %v3802_v49 = vld [vmem:[#allocation4 + $0x88] sm:$0xff] }
 0x476   : > { %3132 = vst.msk [vmem:[#allocation4 + $0x1e8] sm:$0xff] %vm2469_vm13, %v3057_v20  ;;  %3133 = vst.msk [vmem:[#allocation4 + $0x200] sm:$0xff] %vm2469_vm13, %v3059_v4  ;;  %v3889_v27 = vpack.c.bf16 %v3802_v49, %v3799_v32  ;;  %v4843_v20 = vld [vmem:[%s5350_s9 + $0x169] sm:$0xff] }
 0x477   : > { %3703 = vrot.lane.b32.xlu1 %v4838_v12, %s5261_s7  ;;  %3072 = vrot.lane.b32.xlu0 %v7103_v57, %s5261_s7  ;;  %v3559_v12 = vld [vmem:[#allocation3 + $0x19a] sm:$0xff] }
 0x478   : > { %5087 = vmatprep.mubr.msk.bf16.mxu0 %vm1910_vm10, %v3889_v27  ;;  %3591 = vst.msk [vmem:[#allocation4 + $0x2e0] sm:$0xff] %vm2156_vm11, %v3559_v12 }
 0x479   : > { %v3250_v16 = vpop.permute.xlu1 %3249  ;;  %v3252_v30 = vpop.permute.xlu0 %3251  ;;  %v3805_v24 = vld [vmem:[#allocation4 + $0xa0] sm:$0xff]  ;;  %v3808_v7 = vld [vmem:[#allocation4 + $0xb8] sm:$0xff] }
 0x47a   : > { %3325 = vst.msk [vmem:[#allocation4 + $0x1e8] sm:$0xff] %vm2662_vm14, %v3250_v16  ;;  %3326 = vst.msk [vmem:[#allocation4 + $0x200] sm:$0xff] %vm2662_vm14, %v3252_v30  ;;  %v3892_v9 = vpack.c.bf16 %v3808_v7, %v3805_v24  ;;  %v4844_v30 = vld [vmem:[%s5350_s9 + $0x171] sm:$0xff]  ;;  %v4845_v24 = vld [vmem:[%s5350_s9 + $0x181] sm:$0xff] }
 0x47b   : > { %3074 = vrot.lane.b32.xlu1 %v7105_v61, %s5261_s7  ;;  %2429 = vrot.lane.b32.xlu0 %v7011_v2, %s5261_s7  ;;  %v7464_v2 = vld [vmem:[#allocation3 + $0x188] sm:$0xff] }
 0x47c   : > { %5088 = vmatmul.mubr.msk.bf16.gmra.mxu0 %vm1910_vm10, %v3892_v9 }
 0x47d   : > { %v2607_v22 = vpop.permute.xlu1 %2606  ;;  %v2609_v29 = vpop.permute.xlu0 %2608 }
 0x47e   : > { %2683 = vst.msk [vmem:[#allocation4 + $0x1e0] sm:$0xff] %vm2662_vm14, %v2607_v22  ;;  %2684 = vst.msk [vmem:[#allocation4 + $0x1f8] sm:$0xff] %vm2662_vm14, %v2609_v29 }
 0x47f   : > { %2431 = vrot.lane.b32.xlu1 %v7017_v8, %s5261_s7  ;;  %3265 = vrot.lane.b32.xlu0 %v7456_v17, %s5263_s8 }
 0x481   : > { %v3442_v28 = vpop.permute.xlu1 %3441  ;;  %v3444_v39 = vpop.permute.xlu0 %3443 }
 0x482   : > { %3517 = vst.msk [vmem:[#allocation4 + $0x1e8] sm:$0xff] %vm2855_vm15, %v3442_v28  ;;  %3518 = vst.msk [vmem:[#allocation4 + $0x200] sm:$0xff] %vm2855_vm15, %v3444_v39  ;;  %v4846_v28 = vld [vmem:[%s5350_s9 + $0x189] sm:$0xff] }
 0x483   : > { %3267 = vrot.lane.b32.xlu1 %v7464_v2, %s5263_s8  ;;  %2622 = vrot.lane.b32.xlu0 %v7019_v42, %s5263_s8 }
 0x485   : > { %v2800_v21 = vpop.permute.xlu1 %2799  ;;  %v2802_v8 = vpop.permute.xlu0 %2801 }
 0x486   : > { %2876 = vst.msk [vmem:[#allocation4 + $0x1e0] sm:$0xff] %vm2855_vm15, %v2800_v21  ;;  %2877 = vst.msk [vmem:[#allocation4 + $0x1f8] sm:$0xff] %vm2855_vm15, %v2802_v8 }
 0x487   : > { %2624 = vrot.lane.b32.xlu1 %v7021_v15, %s5263_s8  ;;  %3457 = vrot.lane.b32.xlu0 %v7121_v5, %s5264_s25  ;;  %v4839_v15 = vld [vmem:[%s5350_s9 + $0x139] sm:$0xff] }
 0x489   : > { %v3674_v34 = vpop.permute.xlu1 %3673  ;;  %v3676_v44 = vpop.permute.xlu0 %3675  ;;  %v3846_v46 = vld [vmem:[#allocation4 + $0x1e8] sm:$0xff]  ;;  %v3849_v47 = vld [vmem:[#allocation4 + $0x200] sm:$0xff] }
 0x48a   : > { %3761 = vst.msk [vmem:[#allocation4 + $0xd0] sm:$0xff] %vm1802_vm9, %v3674_v34  ;;  %3762 = vst.msk [vmem:[#allocation4 + $0xe8] sm:$0xff] %vm1802_vm9, %v3676_v44  ;;  %v3912_v42 = vpack.c.bf16 %v3849_v47, %v3846_v46 }
 0x48b   : > { %3459 = vrot.lane.b32.xlu1 %v7123_v10, %s5264_s25  ;;  %2815 = vrot.lane.b32.xlu0 %v7095_v18, %s5264_s25  ;;  %v4840_v10 = vld [vmem:[%s5350_s9 + $0x141] sm:$0xff]  ;;  %v4841_v18 = vld [vmem:[%s5350_s9 + $0x151] sm:$0xff] }
 0x48c   : > { %4247 = vmatprep.mubr.bf16.mxu1 %v3912_v42 }
 0x48d   : > { %v3678_v5 = vpop.permute.xlu1 %3677  ;;  %v3680_v38 = vpop.permute.xlu0 %3679  ;;  %v3845_v33 = vld [vmem:[#allocation4 + $0x1e0] sm:$0xff]  ;;  %v3848_v56 = vld [vmem:[#allocation4 + $0x1f8] sm:$0xff] }
 0x48e   : > { %3763 = vst.msk [vmem:[#allocation4 + $0x100] sm:$0xff] %vm1802_vm9, %v3678_v5  ;;  %3764 = vst.msk [vmem:[#allocation4 + $0x118] sm:$0xff] %vm1802_vm9, %v3680_v38  ;;  %v3911_v50 = vpack.c.bf16 %v3848_v56, %v3845_v33 }
 0x48f   : > { %2817 = vrot.lane.b32.xlu1 %v7097_v45, %s5264_s25  ;;  %3705 = vrot.lane.b32.xlu0 %v4839_v15, %s5261_s7  ;;  %v4842_v45 = vld [vmem:[%s5350_s9 + $0x159] sm:$0xff]  ;;  %s215_s9 = sand.u32 1, %s5244_s19  }
 0x490   : > { %4248 = vmatmul.mubr.bf16.gmra.mxu1 %v3911_v50  ;;  %s4601_s16 = sshll.u32 %s215_s9, 8  ;;  %s7730_s22 = scalar_lea.sflag [#allocation6], %s215_s9 }
 0x491   : > { %v3061_v51 = vpop.permute.xlu1 %3060  ;;  %v3063_v23 = vpop.permute.xlu0 %3062  ;;  %v3811_v43 = vld [vmem:[#allocation4 + $0xd0] sm:$0xff]  ;;  %v3814_v40 = vld [vmem:[#allocation4 + $0xe8] sm:$0xff]  ;;  %s7619_s17 = scalar_lea.vmem [#allocation5], %s4601_s16 }
 0x492   : > { %3134 = vst.msk [vmem:[#allocation4 + $0x218] sm:$0xff] %vm2469_vm13, %v3061_v51  ;;  %3135 = vst.msk [vmem:[#allocation4 + $0x230] sm:$0xff] %vm2469_vm13, %v3063_v23  ;;  %v3895_v19 = vpack.c.bf16 %v3814_v40, %v3811_v43 }
 0x493   : > { %3707 = vrot.lane.b32.xlu1 %v4840_v10, %s5261_s7  ;;  %3709 = vrot.lane.b32.xlu0 %v4841_v18, %s5261_s7 }
 0x494   : > { %5091 = vmatprep.mubr.msk.bf16.mxu0 %vm1910_vm10, %v3895_v19 }
 0x495   : > { %v3254_v13 = vpop.permute.xlu1 %3253  ;;  %v3256_v60 = vpop.permute.xlu0 %3255  ;;  %v3817_v11 = vld [vmem:[#allocation4 + $0x100] sm:$0xff]  ;;  %v3820_v0 = vld [vmem:[#allocation4 + $0x118] sm:$0xff] }
 0x496   : > { %3327 = vst.msk [vmem:[#allocation4 + $0x218] sm:$0xff] %vm2662_vm14, %v3254_v13  ;;  %3328 = vst.msk [vmem:[#allocation4 + $0x230] sm:$0xff] %vm2662_vm14, %v3256_v60  ;;  %v3898_v55 = vpack.c.bf16 %v3820_v0, %v3817_v11 }
 0x497   : > { %3711 = vrot.lane.b32.xlu1 %v4842_v45, %s5261_s7  ;;  %3076 = vrot.lane.b32.xlu0 %v7129_v35, %s5261_s7  ;;  %v3176_v35 = vld [vmem:[#allocation3 + $0x1a0] sm:$0xff] }
 0x498   : > { %5092 = vmatmul.mubr.msk.bf16.gmra.mxu0 %vm1910_vm10, %v3898_v55 }
 0x499   : > { %v2611_v37 = vpop.permute.xlu1 %2610  ;;  %v2613_v36 = vpop.permute.xlu0 %2612 }
 0x49a   : > { %2685 = vst.msk [vmem:[#allocation4 + $0x210] sm:$0xff] %vm2662_vm14, %v2611_v37  ;;  %2686 = vst.msk [vmem:[#allocation4 + $0x228] sm:$0xff] %vm2662_vm14, %v2613_v36 }
 0x49b   : > { %3078 = vrot.lane.b32.xlu1 %v7131_v31, %s5261_s7  ;;  %2433 = vrot.lane.b32.xlu0 %v7099_v54, %s5261_s7  ;;  %v3367_v54 = vld [vmem:[#allocation3 + $0x199] sm:$0xff] }
 0x49d   : > { %v3446_v26 = vpop.permute.xlu1 %3445  ;;  %v3448_v53 = vpop.permute.xlu0 %3447 }
 0x49e   : > { %3519 = vst.msk [vmem:[#allocation4 + $0x218] sm:$0xff] %vm2855_vm15, %v3446_v26  ;;  %3520 = vst.msk [vmem:[#allocation4 + $0x230] sm:$0xff] %vm2855_vm15, %v3448_v53 }
 0x49f   : > { %2435 = vrot.lane.b32.xlu1 %v7101_v3, %s5261_s7  ;;  %3269 = vrot.lane.b32.xlu0 %v3175_v63, %s5263_s8 }
 0x4a1   : > { %v2804_v59 = vpop.permute.xlu1 %2803  ;;  %v2806_v48 = vpop.permute.xlu0 %2805 }
 0x4a2   : > { %2878 = vst.msk [vmem:[#allocation4 + $0x210] sm:$0xff] %vm2855_vm15, %v2804_v59  ;;  %2879 = vst.msk [vmem:[#allocation4 + $0x228] sm:$0xff] %vm2855_vm15, %v2806_v48 }
 0x4a3   : > { %3271 = vrot.lane.b32.xlu1 %v3176_v35, %s5263_s8  ;;  %2626 = vrot.lane.b32.xlu0 %v7103_v57, %s5263_s8 }
 0x4a5   : > { %v3682_v31 = vpop.permute.xlu1 %3681  ;;  %v3684_v41 = vpop.permute.xlu0 %3683  ;;  %v3852_v1 = vld [vmem:[#allocation4 + $0x218] sm:$0xff]  ;;  %v3855_v52 = vld [vmem:[#allocation4 + $0x230] sm:$0xff] }
 0x4a6   : > { %3765 = vst.msk [vmem:[#allocation4 + $0x130] sm:$0xff] %vm1802_vm9, %v3682_v31  ;;  %3766 = vst.msk [vmem:[#allocation4 + $0x148] sm:$0xff] %vm1802_vm9, %v3684_v41  ;;  %v3915_v3 = vpack.c.bf16 %v3855_v52, %v3852_v1 }
 0x4a7   : > { %2628 = vrot.lane.b32.xlu1 %v7105_v61, %s5263_s8  ;;  %3461 = vrot.lane.b32.xlu0 %v3367_v54, %s5264_s25  ;;  %v3560_v61 = vld [vmem:[#allocation3 + $0x1a2] sm:$0xff] }
 0x4a8   : > { %4255 = vmatprep.mubr.bf16.mxu1 %v3915_v3  ;;  %3592 = vst.msk [vmem:[#allocation4 + $0x2f8] sm:$0xff] %vm2156_vm11, %v3560_v61 }
 0x4a9   : > { %v3686_v58 = vpop.permute.xlu1 %3685  ;;  %v3688_v57 = vpop.permute.xlu0 %3687  ;;  %v3851_v14 = vld [vmem:[#allocation4 + $0x210] sm:$0xff]  ;;  %v3854_v6 = vld [vmem:[#allocation4 + $0x228] sm:$0xff] }
 0x4aa   : > { %3767 = vst.msk [vmem:[#allocation4 + $0x160] sm:$0xff] %vm1802_vm9, %v3686_v58  ;;  %3768 = vst.msk [vmem:[#allocation4 + $0x178] sm:$0xff] %vm1802_vm9, %v3688_v57  ;;  %v3914_v62 = vpack.c.bf16 %v3854_v6, %v3851_v14 }
 0x4ab   : > { %3463 = vrot.lane.b32.xlu1 %v3368_v25, %s5264_s25  ;;  %2819 = vrot.lane.b32.xlu0 %v7456_v17, %s5264_s25 }
 0x4ac   : > { %4256 = vmatmul.mubr.bf16.gmra.mxu1 %v3914_v62 }
 0x4ad   : > { %v3065_v4 = vpop.permute.xlu1 %3064  ;;  %v3067_v32 = vpop.permute.xlu0 %3066  ;;  %v3823_v49 = vld [vmem:[#allocation4 + $0x130] sm:$0xff]  ;;  %v3826_v27 = vld [vmem:[#allocation4 + $0x148] sm:$0xff] }
 0x4ae   : > { %3136 = vst.msk [vmem:[#allocation4 + $0x248] sm:$0xff] %vm2469_vm13, %v3065_v4  ;;  %3137 = vst.msk [vmem:[#allocation4 + $0x260] sm:$0xff] %vm2469_vm13, %v3067_v32  ;;  %v3901_v16 = vpack.c.bf16 %v3826_v27, %v3823_v49 }
 0x4af   : > { %2821 = vrot.lane.b32.xlu1 %v7464_v2, %s5264_s25  ;;  %3713 = vrot.lane.b32.xlu0 %v4843_v20, %s5261_s7  ;;  %s4535_s25 = sshll.u32 %s7619_s17, 4  ;;  %s7724_s25 = int_to_ptr.vmem [resolvable:$true] %s4535_s25 }
 0x4b0   : > { %5095 = vmatprep.mubr.msk.bf16.mxu0 %vm1910_vm10, %v3901_v16  ;;  %s5192_s10 = scalar_lea.vmem %s7724_s25, 4096  ;;  %p5199_p0 = scmp.lt.s32.totalorder %s7724_s25, %s5197_s13 }
 0x4b1   : > { %v2424_v7 = vpop.permute.xlu1 %2423  ;;  %v3258_v9 = vpop.permute.xlu0 %3257  ;;  %v3829_v22 = vld [vmem:[#allocation4 + $0x160] sm:$0xff]  ;;  %v3832_v29 = vld [vmem:[#allocation4 + $0x178] sm:$0xff]  ;;  %p5193_p11 = scmp.ne.s32.totalorder %s7724_s25, %s5192_s10  ;;  %p5200_p1 = scmp.lt.s32.totalorder %s5198_s14, %s5192_s10 }
 0x4b2   : > { %2495 = vst.msk [vmem:[#allocation4 + $0x258] sm:$0xff] %vm2469_vm13, %v2424_v7  ;;  %v3904_v17 = vpack.c.bf16 %v3832_v29, %v3829_v22 }
 0x4b3   : > { %3329 = vst.msk [vmem:[#allocation4 + $0x248] sm:$0xff] %vm2662_vm14, %v3258_v9  ;;  %3715 = vrot.lane.b32.xlu1 %v4844_v30, %s5261_s7  ;;  %3717 = vrot.lane.b32.xlu0 %v4845_v24, %s5261_s7  ;;  %p5194_p12 = pnand %p5193_p11, %p5335_p5  ;;  %p5201_p2 = por %p5200_p1, %p5199_p0 }
 0x4b4   : > { %5096 = vmatmul.mubr.msk.bf16.gmra.mxu0 %vm1910_vm10, %v3904_v17 }
 0x4b5   : > { %v3260_v39 = vpop.permute.xlu1 %3259  ;;  %v2615_v2 = vpop.permute.xlu0 %2614  ;;  %p5195_p13 = pneg %p5194_p12 }
 0x4b6   : > { %3330 = vst.msk [vmem:[#allocation4 + $0x260] sm:$0xff] %vm2662_vm14, %v3260_v39  ;;  %2687 = vst.msk [vmem:[#allocation4 + $0x240] sm:$0xff] %vm2662_vm14, %v2615_v2  ;;  %v4924_v39 = vpop.f32.mrf.mxu1 }
 0x4b7   : > { %3719 = vrot.lane.b32.xlu1 %v4846_v28, %s5261_s7  ;;  %p5202_p3 = pnand %p5201_p2, %p5195_p13 }
 0x4b9   : > { %v2617_v21 = vpop.permute.xlu1 %2616  ;;  %v3450_v8 = vpop.permute.xlu0 %3449 }
 0x4ba   : > { %2688 = vst.msk [vmem:[#allocation4 + $0x258] sm:$0xff] %vm2662_vm14, %v2617_v21 }
 0x4bb   : > { %3521 = vst.msk [vmem:[#allocation4 + $0x248] sm:$0xff] %vm2855_vm15, %v3450_v8 }
 0x4bd   : > { %v3452_v34 = vpop.permute.xlu1 %3451  ;;  %v2808_v44 = vpop.permute.xlu0 %2807 }
 0x4be   : > { %3522 = vst.msk [vmem:[#allocation4 + $0x260] sm:$0xff] %vm2855_vm15, %v3452_v34  ;;  %2880 = vst.msk [vmem:[#allocation4 + $0x240] sm:$0xff] %vm2855_vm15, %v2808_v44  ;;  %v4925_v44 = vpop.f32.mrf.mxu1 }
 0x4c1   : > { %v2810_v46 = vpop.permute.xlu1 %2809  ;;  %v3690_v47 = vpop.permute.xlu0 %3689 }
 0x4c2   : > { %2881 = vst.msk [vmem:[#allocation4 + $0x258] sm:$0xff] %vm2855_vm15, %v2810_v46  ;;  %v3858_v5 = vld [vmem:[#allocation4 + $0x248] sm:$0xff] }
 0x4c3   : > { %3769 = vst.msk [vmem:[#allocation4 + $0x190] sm:$0xff] %vm1802_vm9, %v3690_v47 }
 0x4c5   : > { %v3692_v42 = vpop.permute.xlu1 %3691  ;;  %v3694_v15 = vpop.permute.xlu0 %3693  ;;  %v3861_v38 = vld [vmem:[#allocation4 + $0x260] sm:$0xff] }
 0x4c6   : > { %3770 = vst.msk [vmem:[#allocation4 + $0x1a8] sm:$0xff] %vm1802_vm9, %v3692_v42  ;;  %3771 = vst.msk [vmem:[#allocation4 + $0x1c0] sm:$0xff] %vm1802_vm9, %v3694_v15  ;;  %v3918_v33 = vpack.c.bf16 %v3861_v38, %v3858_v5  ;;  %v3857_v10 = vld [vmem:[#allocation4 + $0x240] sm:$0xff]  ;;  %v4927_v38 = vpop.f32.mrf.mxu1 }
 0x4c8   : > { %4263 = vmatprep.mubr.bf16.mxu1 %v3918_v33 }
 0x4c9   : > { %v3696_v56 = vpop.permute.xlu1 %3695  ;;  %v3069_v50 = vpop.permute.xlu0 %3068  ;;  %v3860_v18 = vld [vmem:[#allocation4 + $0x258] sm:$0xff] }
 0x4ca   : > { %3772 = vst.msk [vmem:[#allocation4 + $0x1d8] sm:$0xff] %vm1802_vm9, %v3696_v56  ;;  %v3917_v51 = vpack.c.bf16 %v3860_v18, %v3857_v10  ;;  %v3835_v23 = vld [vmem:[#allocation4 + $0x190] sm:$0xff] }
 0x4cb   : > { %3138 = vst.msk [vmem:[#allocation4 + $0x278] sm:$0xff] %vm2469_vm13, %v3069_v50 }
 0x4cc   : > { %4264 = vmatmul.mubr.bf16.gmra.mxu1 %v3917_v51  ;;  %v4928_v51 = vpop.f32.mrf.mxu1 }
 0x4cd   : > { %v3071_v43 = vpop.permute.xlu1 %3070  ;;  %v2426_v40 = vpop.permute.xlu0 %2425  ;;  %v3838_v19 = vld [vmem:[#allocation4 + $0x1a8] sm:$0xff]  ;;  %v3841_v13 = vld [vmem:[#allocation4 + $0x1c0] sm:$0xff] }
 0x4ce   : > { %3139 = vst.msk [vmem:[#allocation4 + $0x290] sm:$0xff] %vm2469_vm13, %v3071_v43  ;;  %2496 = vst.msk [vmem:[#allocation4 + $0x270] sm:$0xff] %vm2469_vm13, %v2426_v40  ;;  %v3907_v45 = vpack.c.bf16 %v3838_v19, %v3835_v23  ;;  %v4930_v40 = vpop.f32.mrf.mxu1 }
 0x4d0   : > { %5099 = vmatprep.mubr.msk.bf16.mxu0 %vm1910_vm10, %v3907_v45 }
 0x4d1   : > { %v2428_v60 = vpop.permute.xlu1 %2427  ;;  %v3262_v11 = vpop.permute.xlu0 %3261  ;;  %v3844_v0 = vld [vmem:[#allocation4 + $0x1d8] sm:$0xff] }
 0x4d2   : > { %2497 = vst.msk [vmem:[#allocation4 + $0x288] sm:$0xff] %vm2469_vm13, %v2428_v60  ;;  %v3910_v55 = vpack.c.bf16 %v3844_v0, %v3841_v13 }
 0x4d3   : > { %3331 = vst.msk [vmem:[#allocation4 + $0x278] sm:$0xff] %vm2662_vm14, %v3262_v11  ;;  %v4931_v11 = vpop.f32.mrf.mxu1 }
 0x4d4   : > { %5100 = vmatmul.mubr.msk.bf16.gmra.mxu0 %vm1910_vm10, %v3910_v55 }
 0x4d5   : > { %v3264_v37 = vpop.permute.xlu1 %3263  ;;  %v2619_v36 = vpop.permute.xlu0 %2618 }
 0x4d6   : > { %3332 = vst.msk [vmem:[#allocation4 + $0x290] sm:$0xff] %vm2662_vm14, %v3264_v37  ;;  %2689 = vst.msk [vmem:[#allocation4 + $0x270] sm:$0xff] %vm2662_vm14, %v2619_v36  ;;  %v4933_v37 = vpop.f32.mrf.mxu1 }
 0x4d9   : > { %v2621_v63 = vpop.permute.xlu1 %2620  ;;  %v3454_v26 = vpop.permute.xlu0 %3453 }
 0x4da   : > { %2690 = vst.msk [vmem:[#allocation4 + $0x288] sm:$0xff] %vm2662_vm14, %v2621_v63 }
 0x4db   : > { %3523 = vst.msk [vmem:[#allocation4 + $0x278] sm:$0xff] %vm2855_vm15, %v3454_v26  ;;  %v4932_v26 = vadd.f32 %v4931_v11, %v4930_v40 }
 0x4dd   : > { %v3456_v53 = vpop.permute.xlu1 %3455  ;;  %v2812_v35 = vpop.permute.xlu0 %2811 }
 0x4de   : > { %3524 = vst.msk [vmem:[#allocation4 + $0x290] sm:$0xff] %vm2855_vm15, %v3456_v53  ;;  %2882 = vst.msk [vmem:[#allocation4 + $0x270] sm:$0xff] %vm2855_vm15, %v2812_v35  ;;  %v4934_v53 = vpop.f32.mrf.mxu1  ;;  %v4926_v35 = vadd.f32 %v4925_v44, %v4924_v39 }
 0x4e1   : > { %v2814_v59 = vpop.permute.xlu1 %2813  ;;  %v3698_v48 = vpop.permute.xlu0 %3697 }
 0x4e2   : > { %2883 = vst.msk [vmem:[#allocation4 + $0x288] sm:$0xff] %vm2855_vm15, %v2814_v59  ;;  %v3864_v41 = vld [vmem:[#allocation4 + $0x278] sm:$0xff] }
 0x4e3   : > { %3773 = vst.msk [vmem:[#allocation4 + $0x1f0] sm:$0xff] %vm1802_vm9, %v3698_v48 }
 0x4e5   : > { %v3700_v54 = vpop.permute.xlu1 %3699  ;;  %v3702_v31 = vpop.permute.xlu0 %3701  ;;  %v3867_v1 = vld [vmem:[#allocation4 + $0x290] sm:$0xff] }
 0x4e6   : > { %3774 = vst.msk [vmem:[#allocation4 + $0x208] sm:$0xff] %vm1802_vm9, %v3700_v54  ;;  %3775 = vst.msk [vmem:[#allocation4 + $0x220] sm:$0xff] %vm1802_vm9, %v3702_v31  ;;  %v3921_v52 = vpack.c.bf16 %v3867_v1, %v3864_v41  ;;  %v3863_v58 = vld [vmem:[#allocation4 + $0x270] sm:$0xff]  ;;  %v4936_v54 = vpop.f32.mrf.mxu1  ;;  %v4935_v41 = vadd.f32 %v4934_v53, %v4933_v37 }
 0x4e7   : > { %v7610_v31 = vld [vmem:[%s7775_s4] ss:$0 sm:$0xff] }
 0x4e8   : > { %4271 = vmatprep.mubr.bf16.mxu1 %v3921_v52  ;;  %v4178_v1 = vadd.f32 %v4932_v26, %v7610_v31 }
 0x4e9   : > { %v3704_v3 = vpop.permute.xlu1 %3703  ;;  %v3073_v25 = vpop.permute.xlu0 %3072  ;;  %v3866_v57 = vld [vmem:[#allocation4 + $0x288] sm:$0xff] }
 0x4ea   : > { %3776 = vst.msk [vmem:[#allocation4 + $0x238] sm:$0xff] %vm1802_vm9, %v3704_v3  ;;  %v3920_v14 = vpack.c.bf16 %v3866_v57, %v3863_v58  ;;  %v3847_v6 = vld [vmem:[#allocation4 + $0x1f0] sm:$0xff]  ;;  %v4929_v3 = vadd.f32 %v4928_v51, %v4927_v38  ;;  %v4170_v57 = vadd.f32 %v4926_v35, %v7610_v31 }
 0x4eb   : > { %3140 = vst.msk [vmem:[#allocation4 + $0x2a8] sm:$0xff] %vm2469_vm13, %v3073_v25 }
 0x4ec   : > { %4272 = vmatmul.mubr.bf16.gmra.mxu1 %v3920_v14 }
 0x4ed   : > { %v3075_v62 = vpop.permute.xlu1 %3074  ;;  %v2430_v61 = vpop.permute.xlu0 %2429  ;;  %v3850_v12 = vld [vmem:[#allocation4 + $0x208] sm:$0xff]  ;;  %v3853_v4 = vld [vmem:[#allocation4 + $0x220] sm:$0xff] }
 0x4ee   : > { %3141 = vst.msk [vmem:[#allocation4 + $0x2c0] sm:$0xff] %vm2469_vm13, %v3075_v62  ;;  %2498 = vst.msk [vmem:[#allocation4 + $0x2a0] sm:$0xff] %vm2469_vm13, %v2430_v61  ;;  %v3913_v20 = vpack.c.bf16 %v3850_v12, %v3847_v6  ;;  %v4937_v6 = vpop.f32.mrf.mxu1 }
 0x4ef   : > { %v4938_v51 = vadd.f32 %v4937_v6, %v4936_v54 }
 0x4f0   : > { %5103 = vmatprep.mubr.msk.bf16.mxu0 %vm1910_vm10, %v3913_v20  ;;  %v4181_v20 = vadd.f32 %v4935_v41, %v7610_v31 }
 0x4f1   : > { %v2432_v32 = vpop.permute.xlu1 %2431  ;;  %v3266_v49 = vpop.permute.xlu0 %3265  ;;  %v3856_v27 = vld [vmem:[#allocation4 + $0x238] sm:$0xff] }
 0x4f2   : > { %2499 = vst.msk [vmem:[#allocation4 + $0x2b8] sm:$0xff] %vm2469_vm13, %v2432_v32  ;;  %v3916_v16 = vpack.c.bf16 %v3856_v27, %v3853_v4 }
 0x4f3   : > { %3333 = vst.msk [vmem:[#allocation4 + $0x2a8] sm:$0xff] %vm2662_vm14, %v3266_v49 }
 0x4f4   : > { %5104 = vmatmul.mubr.msk.bf16.gmra.mxu0 %vm1910_vm10, %v3916_v16 }
 0x4f5   : > { %v3268_v30 = vpop.permute.xlu1 %3267  ;;  %v2623_v24 = vpop.permute.xlu0 %2622 }
 0x4f6   : > { %3334 = vst.msk [vmem:[#allocation4 + $0x2c0] sm:$0xff] %vm2662_vm14, %v3268_v30  ;;  %2691 = vst.msk [vmem:[#allocation4 + $0x2a0] sm:$0xff] %vm2662_vm14, %v2623_v24  ;;  %v4173_v30 = vadd.f32 %v4929_v3, %v7610_v31 }
 0x4f9   : > { %v2625_v7 = vpop.permute.xlu1 %2624  ;;  %v3458_v9 = vpop.permute.xlu0 %3457 }
 0x4fa   : > { %2692 = vst.msk [vmem:[#allocation4 + $0x2b8] sm:$0xff] %vm2662_vm14, %v2625_v7 }
 0x4fb   : > { %3525 = vst.msk [vmem:[#allocation4 + $0x2a8] sm:$0xff] %vm2855_vm15, %v3458_v9  ;;  %v4939_v9 = vpop.f32.mrf.mxu1 }
 0x4fd   : > { %v3460_v22 = vpop.permute.xlu1 %3459  ;;  %v2816_v29 = vpop.permute.xlu0 %2815 }
 0x4fe   : > { %3526 = vst.msk [vmem:[#allocation4 + $0x2c0] sm:$0xff] %vm2855_vm15, %v3460_v22  ;;  %2884 = vst.msk [vmem:[#allocation4 + $0x2a0] sm:$0xff] %vm2855_vm15, %v2816_v29 }
 0x501   : > { %v2818_v17 = vpop.permute.xlu1 %2817  ;;  %v3706_v28 = vpop.permute.xlu0 %3705 }
 0x502   : > { %2885 = vst.msk [vmem:[#allocation4 + $0x2b8] sm:$0xff] %vm2855_vm15, %v2818_v17  ;;  %v3870_v8 = vld [vmem:[#allocation4 + $0x2a8] sm:$0xff] }
 0x503   : > { %3777 = vst.msk [vmem:[#allocation4 + $0x250] sm:$0xff] %vm1802_vm9, %v3706_v28 }
 0x505   : > { %v3708_v2 = vpop.permute.xlu1 %3707  ;;  %v3710_v21 = vpop.permute.xlu0 %3709  ;;  %v3873_v34 = vld [vmem:[#allocation4 + $0x2c0] sm:$0xff] }
 0x506   : > { %3778 = vst.msk [vmem:[#allocation4 + $0x268] sm:$0xff] %vm1802_vm9, %v3708_v2  ;;  %3779 = vst.msk [vmem:[#allocation4 + $0x280] sm:$0xff] %vm1802_vm9, %v3710_v21  ;;  %v3924_v46 = vpack.c.bf16 %v3873_v34, %v3870_v8  ;;  %v3869_v15 = vld [vmem:[#allocation4 + $0x2a0] sm:$0xff]  ;;  %v4940_v34 = vpop.f32.mrf.mxu1 }
 0x508   : > { %4279 = vmatprep.mubr.bf16.mxu1 %v3924_v46 }
 0x509   : > { %v3712_v47 = vpop.permute.xlu1 %3711  ;;  %v3077_v42 = vpop.permute.xlu0 %3076  ;;  %v3872_v5 = vld [vmem:[#allocation4 + $0x2b8] sm:$0xff] }
 0x50a   : > { %3780 = vst.msk [vmem:[#allocation4 + $0x298] sm:$0xff] %vm1802_vm9, %v3712_v47  ;;  %v3923_v33 = vpack.c.bf16 %v3872_v5, %v3869_v15  ;;  %v3859_v56 = vld [vmem:[#allocation4 + $0x250] sm:$0xff]  ;;  %v4942_v47 = vpop.f32.mrf.mxu1 }
 0x50b   : > { %3142 = vst.msk [vmem:[#allocation4 + $0x2d8] sm:$0xff] %vm2469_vm13, %v3077_v42 }
 0x50c   : > { %4280 = vmatmul.mubr.bf16.gmra.mxu1 %v3923_v33  ;;  %v4943_v38 = vpop.f32.mrf.mxu1 }
 0x50d   : > { %v3079_v50 = vpop.permute.xlu1 %3078  ;;  %v2434_v10 = vpop.permute.xlu0 %2433  ;;  %v3862_v18 = vld [vmem:[#allocation4 + $0x268] sm:$0xff]  ;;  %v3865_v43 = vld [vmem:[#allocation4 + $0x280] sm:$0xff] }
 0x50e   : > { %3143 = vst.msk [vmem:[#allocation4 + $0x2f0] sm:$0xff] %vm2469_vm13, %v3079_v50  ;;  %2500 = vst.msk [vmem:[#allocation4 + $0x2d0] sm:$0xff] %vm2469_vm13, %v2434_v10  ;;  %v3919_v23 = vpack.c.bf16 %v3862_v18, %v3859_v56  ;;  %v4945_v50 = vpop.f32.mrf.mxu1  ;;  %v4944_v10 = vadd.f32 %v4943_v38, %v4942_v47 }
 0x510   : > { %5107 = vmatprep.mubr.msk.bf16.mxu0 %vm1910_vm10, %v3919_v23  ;;  %v4946_v18 = vpop.f32.mrf.mxu1  ;;  %v4194_v40 = vadd.f32 %v4944_v10, %v7610_v31 }
 0x511   : > { %v2436_v19 = vpop.permute.xlu1 %2435  ;;  %v3270_v45 = vpop.permute.xlu0 %3269  ;;  %v3868_v13 = vld [vmem:[#allocation4 + $0x298] sm:$0xff] }
 0x512   : > { %2501 = vst.msk [vmem:[#allocation4 + $0x2e8] sm:$0xff] %vm2469_vm13, %v2436_v19  ;;  %v3922_v60 = vpack.c.bf16 %v3868_v13, %v3865_v43  ;;  %v4948_v23 = vpop.f32.mrf.mxu1  ;;  %v4947_v43 = vadd.f32 %v4946_v18, %v4945_v50 }
 0x513   : > { %3335 = vst.msk [vmem:[#allocation4 + $0x2d8] sm:$0xff] %vm2662_vm14, %v3270_v45  ;;  %v4941_v45 = vadd.f32 %v4940_v34, %v4939_v9 }
 0x514   : > { %5108 = vmatmul.mubr.msk.bf16.gmra.mxu0 %vm1910_vm10, %v3922_v60  ;;  %v4186_v60 = vadd.f32 %v4938_v51, %v7610_v31  ;;  %v4949_v11 = vpop.f32.mrf.mxu1 }
 0x515   : > { %v3272_v0 = vpop.permute.xlu1 %3271  ;;  %v2627_v55 = vpop.permute.xlu0 %2626  ;;  %v4189_v35 = vadd.f32 %v4941_v45, %v7610_v31  ;;  %v4950_v6 = vadd.f32 %v4949_v11, %v4948_v23 }
 0x516   : > { %3336 = vst.msk [vmem:[#allocation4 + $0x2f0] sm:$0xff] %vm2662_vm14, %v3272_v0  ;;  %2693 = vst.msk [vmem:[#allocation4 + $0x2d0] sm:$0xff] %vm2662_vm14, %v2627_v55 }
 0x519   : > { %v2629_v36 = vpop.permute.xlu1 %2628  ;;  %v3462_v63 = vpop.permute.xlu0 %3461 }
 0x51a   : > { %2694 = vst.msk [vmem:[#allocation4 + $0x2e8] sm:$0xff] %vm2662_vm14, %v2629_v36  ;;  %v4197_v36 = vadd.f32 %v4947_v43, %v7610_v31 }
 0x51b   : > { %3527 = vst.msk [vmem:[#allocation4 + $0x2d8] sm:$0xff] %vm2855_vm15, %v3462_v63 }
 0x51d   : > { %v3464_v59 = vpop.permute.xlu1 %3463  ;;  %v2820_v48 = vpop.permute.xlu0 %2819 }
 0x51e   : > { %3528 = vst.msk [vmem:[#allocation4 + $0x2f0] sm:$0xff] %vm2855_vm15, %v3464_v59  ;;  %2886 = vst.msk [vmem:[#allocation4 + $0x2d0] sm:$0xff] %vm2855_vm15, %v2820_v48  ;;  %v4951_v59 = vpop.f32.mrf.mxu1 }
 0x520   : > { %v5085_v52 = vpop.f32.mrf.mxu0 }
 0x521   : > { %v4339_v25 = vadd.f32 %v5085_v52, %v4178_v1  ;;  %v2822_v58 = vpop.permute.xlu1 %2821  ;;  %v3714_v14 = vpop.permute.xlu0 %3713 }
 0x522   : > { %2887 = vst.msk [vmem:[#allocation4 + $0x2e8] sm:$0xff] %vm2855_vm15, %v2822_v58  ;;  %v4330_v62 = vpop.f32.mrf.mxu0  ;;  %v3876_v4 = vld [vmem:[#allocation4 + $0x2d8] sm:$0xff]  ;;  %v4952_v52 = vpop.f32.mrf.mxu1 }
 0x523   : > { %3781 = vst.msk [vmem:[#allocation4 + $0x2b0] sm:$0xff] %vm1802_vm9, %v3714_v14  ;;  %v4459_v61 = vmax.f32 %v4339_v25, 0.0  ;;  %v4331_v12 = vadd.f32 %v4330_v62, %v4170_v57 }
 0x524   : > { %v5086_v32 = vpop.f32.mrf.mxu0  ;;  %v4954_v3 = vpop.f32.mrf.mxu1 }
 0x525   : > { %4491 = vst.msk [vmem:[%s7619_s17 + $0x10] sm:$0xff] %vm2156_vm11, %v4459_v61  ;;  %v4457_v49 = vmax.f32 %v4331_v12, 0.0  ;;  %v4342_v27 = vadd.f32 %v5086_v32, %v4181_v20  ;;  %v3716_v16 = vpop.permute.xlu1 %3715  ;;  %v3879_v24 = vld [vmem:[#allocation4 + $0x2f0] sm:$0xff]  ;;  %v3718_v7 = vpop.permute.xlu0 %3717 }
 0x526   : > { %3782 = vst.msk [vmem:[#allocation4 + $0x2c8] sm:$0xff] %vm1802_vm9, %v3716_v16  ;;  %v4333_v22 = vpop.f32.mrf.mxu0  ;;  %v3927_v29 = vpack.c.bf16 %v3879_v24, %v3876_v4  ;;  %3783 = vst.msk [vmem:[#allocation4 + $0x2e0] sm:$0xff] %vm1802_vm9, %v3718_v7  ;;  %v3875_v21 = vld [vmem:[#allocation4 + $0x2d0] sm:$0xff]  ;;  %v4955_v25 = vpop.f32.mrf.mxu1  ;;  %v4953_v4 = vadd.f32 %v4952_v52, %v4951_v59 }
 0x527   : > { %4489 = vst.msk [vmem:[%s7619_s17] sm:$0xff] %vm2156_vm11, %v4457_v49  ;;  %v4460_v17 = vmax.f32 %v4342_v27, 0.0  ;;  %v4334_v28 = vadd.f32 %v4333_v22, %v4173_v30  ;;  %v4956_v57 = vadd.f32 %v4955_v25, %v4954_v3  ;;  %v4202_v49 = vadd.f32 %v4950_v6, %v7610_v31 }
 0x528   : > { %4287 = vmatprep.mubr.bf16.mxu1 %v3927_v29  ;;  %v4957_v58 = vpop.f32.mrf.mxu1 }
 0x529   : > { %4492 = vst.msk [vmem:[%s7619_s17 + $0x18] sm:$0xff] %vm2156_vm11, %v4460_v17  ;;  %v4458_v39 = vmax.f32 %v4334_v28, 0.0  ;;  %v3720_v2 = vpop.permute.xlu1 %3719  ;;  %v3878_v8 = vld [vmem:[#allocation4 + $0x2e8] sm:$0xff]  ;;  %v4210_v12 = vadd.f32 %v4956_v57, %v7610_v31  ;;  %v4205_v17 = vadd.f32 %v4953_v4, %v7610_v31 }
 0x52a   : > { %3784 = vst.msk [vmem:[#allocation4 + $0x2f8] sm:$0xff] %vm1802_vm9, %v3720_v2  ;;  %v3926_v44 = vpack.c.bf16 %v3878_v8, %v3875_v21  ;;  %v3871_v46 = vld [vmem:[#allocation4 + $0x2b0] sm:$0xff]  ;;  %v4958_v14 = vpop.f32.mrf.mxu1 }
 0x52b   : > { %4490 = vst.msk [vmem:[%s7619_s17 + $0x8] sm:$0xff] %vm2156_vm11, %v4458_v39  ;;  %v4959_v61 = vadd.f32 %v4958_v14, %v4957_v58 }
 0x52c   : > { %4288 = vmatmul.mubr.bf16.gmra.mxu1 %v3926_v44  ;;  %v4960_v62 = vpop.f32.mrf.mxu1 }
 0x52d   : > { %v3874_v42 = vld [vmem:[#allocation4 + $0x2c8] sm:$0xff]  ;;  %v3877_v5 = vld [vmem:[#allocation4 + $0x2e0] sm:$0xff]  ;;  %v4213_v7 = vadd.f32 %v4959_v61, %v7610_v31 }
 0x52e   : > { %v3925_v15 = vpack.c.bf16 %v3874_v42, %v3871_v46  ;;  %v4961_v27 = vpop.f32.mrf.mxu1 }
 0x530   : > { %5111 = vmatprep.mubr.msk.bf16.mxu0 %vm1910_vm10, %v3925_v15  ;;  %v4963_v28 = vpop.f32.mrf.mxu1 }
 0x531   : > { %v3880_v33 = vld [vmem:[#allocation4 + $0x2f8] sm:$0xff] }
 0x532   : > { %v3928_v56 = vpack.c.bf16 %v3880_v33, %v3877_v5  ;;  %v4964_v34 = vpop.f32.mrf.mxu1  ;;  %v4962_v5 = vadd.f32 %v4961_v27, %v4960_v62 }
 0x533   : > { %v4965_v50 = vadd.f32 %v4964_v34, %v4963_v28 }
 0x534   : > { %5112 = vmatmul.mubr.msk.bf16.gmra.mxu0 %vm1910_vm10, %v3928_v56  ;;  %v4966_v44 = vpop.f32.mrf.mxu1  ;;  %v4218_v18 = vadd.f32 %v4962_v5, %v7610_v31 }
 0x535   : > { %v4221_v11 = vadd.f32 %v4965_v50, %v7610_v31 }
 0x536   : > { %v4967_v46 = vpop.f32.mrf.mxu1 }
 0x537   : > { %v4968_v42 = vadd.f32 %v4967_v46, %v4966_v44 }
 0x538   : > { %v4969_v47 = vpop.f32.mrf.mxu1 }
 0x539   : > { %v4226_v33 = vadd.f32 %v4968_v42, %v7610_v31 }
 0x53a   : > { %v4970_v15 = vpop.f32.mrf.mxu1 }
 0x53b   : > { %v4971_v38 = vadd.f32 %v4970_v15, %v4969_v47 }
 0x53c   : > { %v5089_v19 = vpop.f32.mrf.mxu0  ;;  %v4972_v51 = vpop.f32.mrf.mxu1 }
 0x53d   : > { %v4355_v13 = vadd.f32 %v5089_v19, %v4194_v40  ;;  %v4229_v19 = vadd.f32 %v4971_v38, %v7610_v31 }
 0x53e   : > { %v4346_v0 = vpop.f32.mrf.mxu0 }
 0x53f   : > { %v4463_v55 = vmax.f32 %v4355_v13, 0.0  ;;  %v4347_v37 = vadd.f32 %v4346_v0, %v4186_v60  ;;  %v4973_v0 = vpop.f32.mrf.mxu1 }
 0x540   : > { %v5090_v63 = vpop.f32.mrf.mxu0 }
 0x541   : > { %4495 = vst.msk [vmem:[%s7619_s17 + $0x30] sm:$0xff] %vm2156_vm11, %v4463_v55  ;;  %v4461_v26 = vmax.f32 %v4347_v37, 0.0  ;;  %v4358_v53 = vadd.f32 %v5090_v63, %v4197_v36 }
 0x542   : > { %v4349_v48 = vpop.f32.mrf.mxu0 }
 0x543   : > { %4493 = vst.msk [vmem:[%s7619_s17 + $0x20] sm:$0xff] %vm2156_vm11, %v4461_v26  ;;  %v4464_v54 = vmax.f32 %v4358_v53, 0.0  ;;  %v4350_v41 = vadd.f32 %v4349_v48, %v4189_v35  ;;  %v4975_v26 = vpop.f32.mrf.mxu1 }
 0x545   : > { %4496 = vst.msk [vmem:[%s7619_s17 + $0x38] sm:$0xff] %vm2156_vm11, %v4464_v54  ;;  %v4462_v1 = vmax.f32 %v4350_v41, 0.0  ;;  %v4976_v53 = vpop.f32.mrf.mxu1 }
 0x546   : > { %v4977_v58 = vadd.f32 %v4976_v53, %v4975_v26 }
 0x547   : > { %4494 = vst.msk [vmem:[%s7619_s17 + $0x28] sm:$0xff] %vm2156_vm11, %v4462_v1  ;;  %v4978_v35 = vpop.f32.mrf.mxu1  ;;  %v4974_v1 = vadd.f32 %v4973_v0, %v4972_v51 }
 0x548   : > { %v4237_v27 = vadd.f32 %v4977_v58, %v7610_v31 }
 0x549   : > { %v4979_v59 = vpop.f32.mrf.mxu1  ;;  %v4234_v14 = vadd.f32 %v4974_v1, %v7610_v31 }
 0x54a   : > { %v4980_v54 = vadd.f32 %v4979_v59, %v4978_v35 }
 0x54b   : > { %v4981_v48 = vpop.f32.mrf.mxu1 }
 0x54c   : > { %v4242_v3 = vadd.f32 %v4980_v54, %v7610_v31 }
 0x54d   : > { %v4982_v41 = vpop.f32.mrf.mxu1 }
 0x54e   : > { %v4983_v52 = vadd.f32 %v4982_v41, %v4981_v48 }
 0x550   : > { %v4984_v6 = vpop.f32.mrf.mxu1 }
 0x558   : > { %v5093_v20 = vpop.f32.mrf.mxu0 }
 0x559   : > { %v4371_v32 = vadd.f32 %v5093_v20, %v4210_v12  ;;  %v4245_v20 = vadd.f32 %v4983_v52, %v7610_v31 }
 0x55a   : > { %v4362_v16 = vpop.f32.mrf.mxu0 }
 0x55b   : > { %v4467_v30 = vmax.f32 %v4371_v32, 0.0  ;;  %v4363_v24 = vadd.f32 %v4362_v16, %v4202_v49  ;;  %v4985_v16 = vpop.f32.mrf.mxu1 }
 0x55c   : > { %v5094_v9 = vpop.f32.mrf.mxu0 }
 0x55d   : > { %4499 = vst.msk [vmem:[%s7619_s17 + $0x50] sm:$0xff] %vm2156_vm11, %v4467_v30  ;;  %v4465_v22 = vmax.f32 %v4363_v24, 0.0  ;;  %v4374_v29 = vadd.f32 %v5094_v9, %v4213_v7 }
 0x55e   : > { %v4365_v39 = vpop.f32.mrf.mxu0 }
 0x55f   : > { %4497 = vst.msk [vmem:[%s7619_s17 + $0x40] sm:$0xff] %vm2156_vm11, %v4465_v22  ;;  %v4468_v2 = vmax.f32 %v4374_v29, 0.0  ;;  %v4366_v21 = vadd.f32 %v4365_v39, %v4205_v17  ;;  %v4987_v22 = vpop.f32.mrf.mxu1 }
 0x561   : > { %4500 = vst.msk [vmem:[%s7619_s17 + $0x58] sm:$0xff] %vm2156_vm11, %v4468_v2  ;;  %v4466_v8 = vmax.f32 %v4366_v21, 0.0  ;;  %v4988_v29 = vpop.f32.mrf.mxu1 }
 0x562   : > { %v4989_v47 = vadd.f32 %v4988_v29, %v4987_v22 }
 0x563   : > { %4498 = vst.msk [vmem:[%s7619_s17 + $0x48] sm:$0xff] %vm2156_vm11, %v4466_v8  ;;  %v4986_v8 = vadd.f32 %v4985_v16, %v4984_v6 }
 0x565   : > { %v4250_v15 = vadd.f32 %v4986_v8, %v7610_v31 }
 0x56c   : > { %v4990_v17 = vpop.f32.mrf.mxu1 }
 0x56e   : > { %v4991_v28 = vpop.f32.mrf.mxu1 }
 0x56f   : > { %v4992_v2 = vadd.f32 %v4991_v28, %v4990_v17 }
 0x570   : > { %v4993_v39 = vpop.f32.mrf.mxu1 }
 0x571   : > { %v4258_v44 = vadd.f32 %v4992_v2, %v7610_v31 }
 0x572   : > { %v4994_v21 = vpop.f32.mrf.mxu1 }
 0x573   : > { %v4995_v34 = vadd.f32 %v4994_v21, %v4993_v39 }
 0x574   : > { %v5097_v56 = vpop.f32.mrf.mxu0 }
 0x575   : > { %v4387_v10 = vadd.f32 %v5097_v56, %v4226_v33  ;;  %v4261_v50 = vadd.f32 %v4995_v34, %v7610_v31 }
 0x576   : > { %v4378_v23 = vpop.f32.mrf.mxu0 }
 0x577   : > { %v4471_v43 = vmax.f32 %v4387_v10, 0.0  ;;  %v4379_v40 = vadd.f32 %v4378_v23, %v4218_v18  ;;  %v4253_v23 = vadd.f32 %v4989_v47, %v7610_v31 }
 0x578   : > { %v5098_v45 = vpop.f32.mrf.mxu0 }
 0x579   : > { %4503 = vst.msk [vmem:[%s7619_s17 + $0x70] sm:$0xff] %vm2156_vm11, %v4471_v43  ;;  %v4469_v13 = vmax.f32 %v4379_v40, 0.0  ;;  %v4390_v60 = vadd.f32 %v5098_v45, %v4229_v19 }
 0x57a   : > { %v4381_v55 = vpop.f32.mrf.mxu0 }
 0x57b   : > { %4501 = vst.msk [vmem:[%s7619_s17 + $0x60] sm:$0xff] %vm2156_vm11, %v4469_v13  ;;  %v4472_v37 = vmax.f32 %v4390_v60, 0.0  ;;  %v4382_v36 = vadd.f32 %v4381_v55, %v4221_v11 }
 0x57d   : > { %4504 = vst.msk [vmem:[%s7619_s17 + $0x78] sm:$0xff] %vm2156_vm11, %v4472_v37  ;;  %v4470_v63 = vmax.f32 %v4382_v36, 0.0 }
 0x57f   : > { %4502 = vst.msk [vmem:[%s7619_s17 + $0x68] sm:$0xff] %vm2156_vm11, %v4470_v63 }
 0x58c   : > { %v4996_v5 = vpop.f32.mrf.mxu1 }
 0x58e   : > { %v4997_v43 = vpop.f32.mrf.mxu1 }
 0x58f   : > { %v4998_v26 = vadd.f32 %v4997_v43, %v4996_v5 }
 0x590   : > { %v4999_v60 = vpop.f32.mrf.mxu1 }
 0x591   : > { %v4266_v41 = vadd.f32 %v4998_v26, %v7610_v31 }
 0x592   : > { %v5000_v11 = vpop.f32.mrf.mxu1 }
 0x593   : > { %v5001_v48 = vadd.f32 %v5000_v11, %v4999_v60 }
 0x594   : > { %v5101_v25 = vpop.f32.mrf.mxu0 }
 0x595   : > { %v4403_v57 = vadd.f32 %v5101_v25, %v4242_v3  ;;  %v4269_v6 = vadd.f32 %v5001_v48, %v7610_v31 }
 0x596   : > { %v4394_v62 = vpop.f32.mrf.mxu0 }
 0x597   : > { %v4475_v61 = vmax.f32 %v4403_v57, 0.0  ;;  %v4395_v12 = vadd.f32 %v4394_v62, %v4234_v14 }
 0x598   : > { %v5102_v4 = vpop.f32.mrf.mxu0 }
 0x599   : > { %4507 = vst.msk [vmem:[%s7619_s17 + $0x90] sm:$0xff] %vm2156_vm11, %v4475_v61  ;;  %v4473_v32 = vmax.f32 %v4395_v12, 0.0  ;;  %v4406_v49 = vadd.f32 %v5102_v4, %v4245_v20 }
 0x59a   : > { %v4397_v30 = vpop.f32.mrf.mxu0 }
 0x59b   : > { %4505 = vst.msk [vmem:[%s7619_s17 + $0x80] sm:$0xff] %vm2156_vm11, %v4473_v32  ;;  %v4476_v24 = vmax.f32 %v4406_v49, 0.0  ;;  %v4398_v7 = vadd.f32 %v4397_v30, %v4237_v27 }
 0x59d   : > { %4508 = vst.msk [vmem:[%s7619_s17 + $0x98] sm:$0xff] %vm2156_vm11, %v4476_v24  ;;  %v4474_v9 = vmax.f32 %v4398_v7, 0.0 }
 0x59f   : > { %4506 = vst.msk [vmem:[%s7619_s17 + $0x88] sm:$0xff] %vm2156_vm11, %v4474_v9 }
 0x5ac   : > { %v5002_v0 = vpop.f32.mrf.mxu1 }
 0x5ae   : > { %v5003_v55 = vpop.f32.mrf.mxu1 }
 0x5af   : > { %v5004_v36 = vadd.f32 %v5003_v55, %v5002_v0 }
 0x5b0   : > { %v5005_v37 = vpop.f32.mrf.mxu1 }
 0x5b1   : > { %v4274_v35 = vadd.f32 %v5004_v36, %v7610_v31 }
 0x5b2   : > { %v5006_v63 = vpop.f32.mrf.mxu1 }
 0x5b3   : > { %v5007_v53 = vadd.f32 %v5006_v63, %v5005_v37 }
 0x5b4   : > { %v5105_v46 = vpop.f32.mrf.mxu0 }
 0x5b5   : > { %v4419_v42 = vadd.f32 %v5105_v46, %v4258_v44  ;;  %v4277_v25 = vadd.f32 %v5007_v53, %v7610_v31 }
 0x5b6   : > { %v4410_v38 = vpop.f32.mrf.mxu0 }
 0x5b7   : > { %v4479_v33 = vmax.f32 %v4419_v42, 0.0  ;;  %v4411_v56 = vadd.f32 %v4410_v38, %v4250_v15 }
 0x5b8   : > { %v5106_v10 = vpop.f32.mrf.mxu0 }
 0x5b9   : > { %4511 = vst.msk [vmem:[%s7619_s17 + $0xb0] sm:$0xff] %vm2156_vm11, %v4479_v33  ;;  %v4477_v18 = vmax.f32 %v4411_v56, 0.0  ;;  %v4422_v51 = vadd.f32 %v5106_v10, %v4261_v50 }
 0x5ba   : > { %v4413_v40 = vpop.f32.mrf.mxu0 }
 0x5bb   : > { %4509 = vst.msk [vmem:[%s7619_s17 + $0xa0] sm:$0xff] %vm2156_vm11, %v4477_v18  ;;  %v4480_v19 = vmax.f32 %v4422_v51, 0.0  ;;  %v4414_v45 = vadd.f32 %v4413_v40, %v4253_v23 }
 0x5bd   : > { %4512 = vst.msk [vmem:[%s7619_s17 + $0xb8] sm:$0xff] %vm2156_vm11, %v4480_v19  ;;  %v4478_v13 = vmax.f32 %v4414_v45, 0.0 }
 0x5bf   : > { %4510 = vst.msk [vmem:[%s7619_s17 + $0xa8] sm:$0xff] %vm2156_vm11, %v4478_v13 }
 0x5cc   : > { %v5008_v4 = vpop.f32.mrf.mxu1 }
 0x5ce   : > { %v5009_v32 = vpop.f32.mrf.mxu1 }
 0x5cf   : > { %v5010_v9 = vadd.f32 %v5009_v32, %v5008_v4 }
 0x5d0   : > { %v5011_v49 = vpop.f32.mrf.mxu1 }
 0x5d1   : > { %v4282_v21 = vadd.f32 %v5010_v9, %v7610_v31 }
 0x5d2   : > { %v5012_v27 = vpop.f32.mrf.mxu1 }
 0x5d3   : > { %v5013_v39 = vadd.f32 %v5012_v27, %v5011_v49 }
 0x5d4   : > { %v5109_v59 = vpop.f32.mrf.mxu0 }
 0x5d5   : > { %v4435_v54 = vadd.f32 %v5109_v59, %v4274_v35  ;;  %v4285_v5 = vadd.f32 %v5013_v39, %v7610_v31 }
 0x5d6   : > { %v4426_v1 = vpop.f32.mrf.mxu0 }
 0x5d7   : > { %v4483_v52 = vmax.f32 %v4435_v54, 0.0  ;;  %v4427_v3 = vadd.f32 %v4426_v1, %v4266_v41 }
 0x5d8   : > { %v5110_v58 = vpop.f32.mrf.mxu0 }
 0x5d9   : > { %4515 = vst.msk [vmem:[%s7619_s17 + $0xd0] sm:$0xff] %vm2156_vm11, %v4483_v52  ;;  %v4481_v57 = vmax.f32 %v4427_v3, 0.0  ;;  %v4438_v14 = vadd.f32 %v5110_v58, %v4277_v25 }
 0x5da   : > { %v4429_v62 = vpop.f32.mrf.mxu0 }
 0x5db   : > { %4513 = vst.msk [vmem:[%s7619_s17 + $0xc0] sm:$0xff] %vm2156_vm11, %v4481_v57  ;;  %v4484_v61 = vmax.f32 %v4438_v14, 0.0  ;;  %v4430_v12 = vadd.f32 %v4429_v62, %v4269_v6 }
 0x5dd   : > { %4516 = vst.msk [vmem:[%s7619_s17 + $0xd8] sm:$0xff] %vm2156_vm11, %v4484_v61  ;;  %v4482_v20 = vmax.f32 %v4430_v12, 0.0 }
 0x5df   : > { %4514 = vst.msk [vmem:[%s7619_s17 + $0xc8] sm:$0xff] %vm2156_vm11, %v4482_v20 }
 0x5ec   : > { %v5014_v16 = vpop.f32.mrf.mxu1 }
 0x5ee   : > { %v5015_v30 = vpop.f32.mrf.mxu1 }
 0x5ef   : > { %v5016_v24 = vadd.f32 %v5015_v30, %v5014_v16 }
 0x5f0   : > { %v5017_v7 = vpop.f32.mrf.mxu1 }
 0x5f1   : > { %v4290_v17 = vadd.f32 %v5016_v24, %v7610_v31 }
 0x5f2   : > { %v5018_v22 = vpop.f32.mrf.mxu1 }
 0x5f3   : > { %v5019_v29 = vadd.f32 %v5018_v22, %v5017_v7 }
 0x5f4   : > { %v5113_v28 = vpop.f32.mrf.mxu0 }
 0x5f5   : > { %v4451_v2 = vadd.f32 %v5113_v28, %v4290_v17  ;;  %v4293_v46 = vadd.f32 %v5019_v29, %v7610_v31 }
 0x5f6   : > { %v4442_v8 = vpop.f32.mrf.mxu0 }
 0x5f7   : > { %v4487_v34 = vmax.f32 %v4451_v2, 0.0  ;;  %v4443_v44 = vadd.f32 %v4442_v8, %v4282_v21 }
 0x5f8   : > { %v5114_v47 = vpop.f32.mrf.mxu0 }
 0x5f9   : > { %4519 = vst.msk [vmem:[%s7619_s17 + $0xf0] sm:$0xff] %vm2156_vm11, %v4487_v34  ;;  %v4485_v42 = vmax.f32 %v4443_v44, 0.0  ;;  %v4454_v15 = vadd.f32 %v5114_v47, %v4293_v46 }
 0x5fa   : > { %v4445_v38 = vpop.f32.mrf.mxu0 }
 0x5fb   : > { %4517 = vst.msk [vmem:[%s7619_s17 + $0xe0] sm:$0xff] %vm2156_vm11, %v4485_v42  ;;  %v4488_v33 = vmax.f32 %v4454_v15, 0.0  ;;  %v4446_v56 = vadd.f32 %v4445_v38, %v4285_v5 }
 0x5fd   : > { %4520 = vst.msk [vmem:[%s7619_s17 + $0xf8] sm:$0xff] %vm2156_vm11, %v4488_v33  ;;  %v4486_v50 = vmax.f32 %v4446_v56, 0.0 }
 0x5ff   : > { %4518 = vst.msk [vmem:[%s7619_s17 + $0xe8] sm:$0xff] %vm2156_vm11, %v4486_v50 }
 0x600   : > { %5205 = shalt.err (!%p5202_p3)
}
 0x601   : > { %s5206_s15 = scalar_lea.hbm %s7720_s6, 4096  ;;  %s5210_s8 = scalar_lea.hbm %s7776_s5, 8192 }
 0x602   : > { %p5207_p4 = scmp.ne.s32.totalorder %s7720_s6, %s5206_s15  ;;  %p5211_p9 = scmp.lt.s32.totalorder %s7720_s6, %s7776_s5 }
 0x603   : > { %p5212_p10 = scmp.lt.s32.totalorder %s5210_s8, %s5206_s15 }
 0x604   : > { %p5208_p7 = pnand %p5207_p4, %p5335_p5 }
 0x605   : > { %p5213_p11 = por %p5212_p10, %p5211_p9 }
 0x606   : > { %p5209_p8 = pneg %p5208_p7 }
 0x608   : > { %p5214_p12 = pnand %p5213_p11, %p5209_p8 }
 0x60a   : > { %5217 = shalt.err (!%p5214_p12)
}
 0x60b   : > { %s5266_s23 = smov 128  }
 0x60c   : > { %5118 = dma.vmem_to_hbm [thread:$0]  (%p5335_p5), %s7724_s25, 4096, %s7720_s6, %s7730_s22, %s5266_s23, %s5266_s23, %s5255_s11  }
 0x60d PF: > { %p5124_p13 = scmp.ge.s32.totalorder %s5252_s21, 2  ;;  %s4550_s26 = sand.u32 1, %s5240_s18  }
 0x60e   : > { %s4551_s30 = scalar_lea.sflag [#allocation6], %s4550_s26 }
 0x60f   : > { %p5121_p0 = pnand %p5124_p13, %p5339_p6 }
 0x611   : > { %p5122_p1 = pneg %p5121_p0 }
 0x613   : > { %5235 = dma.done.wait (%p5122_p1), %s4551_s30, 4096  }
 0x614   : > { %5237 = vsyncadd (%p5122_p1), %s4551_s30, 4294963200  ;;  %p15_p2 = scmp.ge.s32.totalorder %s5322_s24, 4   ;;  %s7837_s18 = smov %s5244_s19 }
 0x615   : > { %s7838_s19 = smov %s5248_s20  ;;  %s7839_s20 = smov %s5333_s27 }
 0x616   : > { %s7840_s21 = smov %s5322_s24  ;;  %17 = sbr.rel (!%p15_p2) target bundleno = 3 (0x3), region = 79 }
 0x61b   :  { %4556 = vsyncpa [#allocation6], 1 }
 0x61c   :  { %4558 = vsyncpa [#allocation6 + $0x1], 1 }

</bundles_post_ra>
